<compile_context>
chip_gen: v5e
topology: v5e:2x2
jax: 0.10.0
libtpu: 0.0.40
codegen_flags: <defaults>
</compile_context>

<pallas_src>
import jax
import jax.numpy as jnp
from jax.experimental import pallas as pl
from jax.experimental.pallas import tpu as pltpu


def _round_up(x, m):
    return ((x + m - 1) // m) * m


# ---------------------------------------------------------------------------
# Pallas kernel: T time steps of a 2-layer LSTM + vocab-tiled output linear.
# Grid = (num_vocab_tiles, T); vocab outer so each wfc tile is DMA'd once.
# ---------------------------------------------------------------------------
def lstm_seq_kernel(
    x_ref,       # (1, B, E)   bf16  embedded token at time step t
    h_in_ref,    # (2, B, H)   f32   initial hidden state (both layers)
    c_in_ref,    # (2, B, H)   f32   initial cell state
    w0_ref,      # (E+H, 4H)   bf16  [W_ih0^T ; W_hh0^T]
    b0_ref,      # (1, 4H)     f32   b_ih0 + b_hh0
    w1_ref,      # (2H, 4H)    bf16  [W_ih1^T ; W_hh1^T]
    b1_ref,      # (1, 4H)     f32   b_ih1 + b_hh1
    wfc_ref,     # (H, TN)     bf16  vocab tile of fc weight
    bfc_ref,     # (1, TN)     f32   vocab tile of fc bias
    # outputs
    logits_ref,  # (1, B, TN)  f32   logits tile for step t
    h_out_ref,   # (2, B, H)   f32   new hidden state (VMEM-resident carry)
    c_out_ref,   # (2, B, H)   f32   new cell state   (VMEM-resident carry)
    # scratch
    h1_seq_ref,  # (T, B, H)   f32   layer-1 hidden for every step
):
    j = pl.program_id(0)   # vocab tile index (outer)
    t = pl.program_id(1)   # time step (inner, sequential recurrence)
    H = h_in_ref.shape[2]

    # Seed the VMEM-resident state carry from the caller-provided hidden state.
    @pl.when(jnp.logical_and(j == 0, t == 0))
    def _init_state():
        h_out_ref[...] = h_in_ref[...]
        c_out_ref[...] = c_in_ref[...]

    # Run both LSTM cells only on the first vocab tile of each time step.
    @pl.when(j == 0)
    def _lstm_step():
        def cell(xh_bf16, c, w_ref, b_ref):
            # gates = [x, h] @ [W_ih^T ; W_hh^T] + (b_ih + b_hh)   (PyTorch i,f,g,o)
            gates = (jnp.dot(xh_bf16, w_ref[...],
                             preferred_element_type=jnp.float32) + b_ref[...])
            i = jax.nn.sigmoid(gates[:, 0 * H:1 * H])
            f = jax.nn.sigmoid(gates[:, 1 * H:2 * H])
            g = jnp.tanh(gates[:, 2 * H:3 * H])
            o = jax.nn.sigmoid(gates[:, 3 * H:4 * H])
            c_new = f * c + i * g
            h_new = o * jnp.tanh(c_new)
            return h_new, c_new

        x = x_ref[0]                                   # (B, E) bf16
        h0 = h_out_ref[0]
        c0 = c_out_ref[0]
        h1 = h_out_ref[1]
        c1 = c_out_ref[1]

        xh0 = jnp.concatenate([x, h0.astype(jnp.bfloat16)], axis=1)
        h0n, c0n = cell(xh0, c0, w0_ref, b0_ref)

        # TODO(synk): nn.LSTM inter-layer dropout (p=0.3) is train-mode only;
        #             the inference forward has no dropout, so it is omitted.
        xh1 = jnp.concatenate(
            [h0n.astype(jnp.bfloat16), h1.astype(jnp.bfloat16)], axis=1)
        h1n, c1n = cell(xh1, c1, w1_ref, b1_ref)

        h_out_ref[0] = h0n
        h_out_ref[1] = h1n
        c_out_ref[0] = c0n
        c_out_ref[1] = c1n
        h1_seq_ref[t] = h1n

    # FC projection for this vocab tile (every grid point).
    h1_t = h1_seq_ref[t].astype(jnp.bfloat16)          # (B, H)
    logits_ref[0] = (jnp.dot(h1_t, wfc_ref[...],
                             preferred_element_type=jnp.float32) + bfc_ref[...])


# ---------------------------------------------------------------------------
# Wrappers
# ---------------------------------------------------------------------------
def rnn_generator_forward_seq(tokens, hidden, params):
    """Run T fused time steps.

    tokens : (B, T) int32 token ids
    hidden : (h, c), each (num_layers=2, B, H) f32
    returns: (logits (B, T, V) f32, (h_new, c_new))
    """
    B, T = tokens.shape
    emb = params["embedding"]                  # (V, E) bf16
    E = emb.shape[1]
    H = params["wfc"].shape[0]
    V = params["vocab_size"]
    V_pad = params["wfc"].shape[1]
    TN = params["tile_n"]
    NV = V_pad // TN

    h, c = hidden

    # Glue: one embedding gather for the whole sequence (not per token).
    x_seq = jnp.take(emb, tokens.T, axis=0).astype(jnp.bfloat16)   # (T, B, E)

    out_shapes = (
        jax.ShapeDtypeStruct((T, B, V_pad), jnp.float32),   # logits (padded vocab)
        jax.ShapeDtypeStruct((2, B, H), jnp.float32),       # h_new
        jax.ShapeDtypeStruct((2, B, H), jnp.float32),       # c_new
    )

    grid_spec = pltpu.PrefetchScalarGridSpec(
        num_scalar_prefetch=0,
        grid=(NV, T),
        in_specs=[
            pl.BlockSpec((1, B, E), lambda j, t: (t, 0, 0)),        # x_seq
            pl.BlockSpec((2, B, H), lambda j, t: (0, 0, 0)),        # h_in (resident)
            pl.BlockSpec((2, B, H), lambda j, t: (0, 0, 0)),        # c_in (resident)
            pl.BlockSpec((E + H, 4 * H), lambda j, t: (0, 0)),      # w0   (resident)
            pl.BlockSpec((1, 4 * H), lambda j, t: (0, 0)),          # b0
            pl.BlockSpec((2 * H, 4 * H), lambda j, t: (0, 0)),      # w1   (resident)
            pl.BlockSpec((1, 4 * H), lambda j, t: (0, 0)),          # b1
            pl.BlockSpec((H, TN), lambda j, t: (0, j)),             # wfc tile
            pl.BlockSpec((1, TN), lambda j, t: (0, j)),             # bfc tile
        ],
        out_specs=(
            pl.BlockSpec((1, B, TN), lambda j, t: (t, 0, j)),       # logits
            pl.BlockSpec((2, B, H), lambda j, t: (0, 0, 0)),        # h_new (carry)
            pl.BlockSpec((2, B, H), lambda j, t: (0, 0, 0)),        # c_new (carry)
        ),
        scratch_shapes=[pltpu.VMEM((T, B, H), jnp.float32)],        # layer-1 h's
    )

    logits_pad, h_new, c_new = pl.pallas_call(
        lstm_seq_kernel,
        out_shape=out_shapes,
        grid_spec=grid_spec,
        # State update is in-place in HBM (h_in -> h_new, c_in -> c_new).
        input_output_aliases={1: 1, 2: 2},
        compiler_params=pltpu.CompilerParams(
            # Time axis must be sequential; vocab axis must also stay
            # "arbitrary" because the LSTM state carry lives in per-core VMEM.
            dimension_semantics=("arbitrary", "arbitrary"),
            vmem_limit_bytes=32 * 1024 * 1024,
        ),
    )(x_seq, h, c,
      params["w0"], params["b0"], params["w1"], params["b1"],
      params["wfc"], params["bfc"])

    logits = jnp.transpose(logits_pad, (1, 0, 2))[:, :, :V]         # (B, T, V)
    return logits, (h_new, c_new)


def rnn_generator_forward(input_seq, hidden, params):
    """Single time step — matches Method_RNN_Generator.forward exactly.

    input_seq: (B, 1) int32, hidden: ((2,B,H), (2,B,H)).
    returns  : (logits (B, V), (h_new, c_new))
    """
    logits_seq, hidden_new = rnn_generator_forward_seq(input_seq[:, :1], hidden, params)
    return logits_seq[:, 0, :], hidden_new


# ---------------------------------------------------------------------------
# Pure-JAX reference (f32, same bf16-rounded weights) for a silent check.
# ---------------------------------------------------------------------------
def reference_forward_seq(tokens, hidden, params):
    emb = params["embedding"].astype(jnp.float32)
    w0 = params["w0"].astype(jnp.float32)
    w1 = params["w1"].astype(jnp.float32)
    wfc = params["wfc"].astype(jnp.float32)
    b0, b1, bfc = params["b0"], params["b1"], params["bfc"]
    V = params["vocab_size"]
    H = wfc.shape[0]
    h, c = hidden
    h0, h1 = h[0], h[1]
    c0, c1 = c[0], c[1]
    B, T = tokens.shape

    def cell(xh, cc, w, b):
        g = xh @ w + b
        i = jax.nn.sigmoid(g[:, :H])
        f = jax.nn.sigmoid(g[:, H:2 * H])
        gg = jnp.tanh(g[:, 2 * H:3 * H])
        o = jax.nn.sigmoid(g[:, 3 * H:])
        cn = f * cc + i * gg
        return o * jnp.tanh(cn), cn

    outs = []
    for t in range(T):
        x = jnp.take(emb, tokens[:, t], axis=0)
        h0, c0 = cell(jnp.concatenate([x, h0], axis=1), c0, w0, b0)
        h1, c1 = cell(jnp.concatenate([h0, h1], axis=1), c1, w1, b1)
        outs.append(h1 @ wfc[:, :V] + bfc[:, :V])
    logits = jnp.stack(outs, axis=1)
    return logits, (jnp.stack([h0, h1]), jnp.stack([c0, c1]))


# ---------------------------------------------------------------------------
# Deterministic parameter init (shapes from __init__ / _build_model), packed
# into the kernel layout: bf16 weights, fused [W_ih^T ; W_hh^T], padded vocab.
# ---------------------------------------------------------------------------
def init_params(key, vocab_size, embedding_dim, hidden_dim, tile_n=1024):
    ks = jax.random.split(key, 10)
    scale = 0.05

    def rnd(k, shape):
        return (scale * jax.random.normal(k, shape)).astype(jnp.float32)

    # Vocab tiling: TN multiple of 128, padded vocab a multiple of TN.
    tile_n = min(_round_up(tile_n, 128), _round_up(vocab_size, 128))
    v_pad = _round_up(vocab_size, tile_n)

    emb = rnd(ks[0], (vocab_size, embedding_dim)).at[0].set(0.0)  # padding_idx=0

    wih0 = rnd(ks[1], (embedding_dim, 4 * hidden_dim))
    whh0 = rnd(ks[2], (hidden_dim, 4 * hidden_dim))
    b0 = rnd(ks[3], (1, 4 * hidden_dim))          # b_ih0 + b_hh0 combined
    wih1 = rnd(ks[4], (hidden_dim, 4 * hidden_dim))
    whh1 = rnd(ks[5], (hidden_dim, 4 * hidden_dim))
    b1 = rnd(ks[6], (1, 4 * hidden_dim))          # b_ih1 + b_hh1 combined
    wfc = rnd(ks[7], (hidden_dim, vocab_size))
    bfc = rnd(ks[8], (1, vocab_size))

    wfc_pad = jnp.zeros((hidden_dim, v_pad), jnp.float32).at[:, :vocab_size].set(wfc)
    bfc_pad = jnp.zeros((1, v_pad), jnp.float32).at[:, :vocab_size].set(bfc)

    return {
        "embedding": emb.astype(jnp.bfloat16),                        # (V, E)
        "w0": jnp.concatenate([wih0, whh0], 0).astype(jnp.bfloat16),  # (E+H, 4H)
        "b0": b0,
        "w1": jnp.concatenate([wih1, whh1], 0).astype(jnp.bfloat16),  # (2H, 4H)
        "b1": b1,
        "wfc": wfc_pad.astype(jnp.bfloat16),                          # (H, V_pad)
        "bfc": bfc_pad,                                               # (1, V_pad)
        "vocab_size": vocab_size,
        "tile_n": tile_n,
    }


if __name__ == "__main__":
    # Small shapes consistent with the module (defaults E=128, H=256, 2 layers;
    # vocab is data-dependent -> pick 500, deliberately not a 128-multiple to
    # exercise vocab padding; tile_n=256 so the vocab grid axis has 2 tiles).
    B = 8
    VOCAB = 500
    E = 128
    H = 256
    NUM_LAYERS = 2
    T = 6
    TILE_N = 256

    key = jax.random.PRNGKey(0)
    kp, kt, kh, kc = jax.random.split(key, 4)

    params = init_params(kp, VOCAB, E, H, tile_n=TILE_N)

    tokens = jax.random.randint(kt, (B, T), 0, VOCAB, dtype=jnp.int32)

    # init_hidden gives zeros; use small random values (fresh buffers per call,
    # since the kernel aliases/donates the state inputs for in-place update).
    def make_hidden():
        h0 = 0.1 * jax.random.normal(kh, (NUM_LAYERS, B, H), dtype=jnp.float32)
        c0 = 0.1 * jax.random.normal(kc, (NUM_LAYERS, B, H), dtype=jnp.float32)
        return (h0, c0)

    # Reference first (pure JAX, no donation involved).
    ref_logits, (ref_h, ref_c) = reference_forward_seq(tokens, make_hidden(), params)

    # Fused multi-step kernel call (as used by the training / priming loops).
    logits_seq, (h_new, c_new) = rnn_generator_forward_seq(tokens, make_hidden(), params)
    jax.block_until_ready((logits_seq, h_new, c_new))

    assert logits_seq.shape == (B, T, VOCAB)
    assert h_new.shape == (NUM_LAYERS, B, H) and c_new.shape == (NUM_LAYERS, B, H)
    assert jnp.allclose(logits_seq, ref_logits, atol=2e-2, rtol=2e-2)
    assert jnp.allclose(h_new, ref_h, atol=2e-2, rtol=2e-2)
    assert jnp.allclose(c_new, ref_c, atol=2e-2, rtol=2e-2)

    # Single-step forward matching Method_RNN_Generator.forward's signature.
    logits1, (h1_, c1_) = rnn_generator_forward(tokens[:, :1], make_hidden(), params)
    jax.block_until_ready((logits1, h1_, c1_))
    assert logits1.shape == (B, VOCAB)
    assert jnp.allclose(logits1, ref_logits[:, 0, :], atol=2e-2, rtol=2e-2)

    print("KERNEL_OK")
</pallas_src>

<mosaic_0001>
module attributes {stable_mosaic.version = 11 : i64} {
  func.func @lstm_seq_kernel(%arg0: i32, %arg1: i32, %arg2: memref<1x8x128xbf16, #tpu.memory_space<vmem>>, %arg3: memref<2x8x256xf32, #tpu.memory_space<vmem>>, %arg4: memref<2x8x256xf32, #tpu.memory_space<vmem>>, %arg5: memref<384x1024xbf16, #tpu.memory_space<vmem>>, %arg6: memref<1x1024xf32, #tpu.memory_space<vmem>>, %arg7: memref<512x1024xbf16, #tpu.memory_space<vmem>>, %arg8: memref<1x1024xf32, #tpu.memory_space<vmem>>, %arg9: memref<256x256xbf16, #tpu.memory_space<vmem>>, %arg10: memref<1x256xf32, #tpu.memory_space<vmem>>, %arg11: memref<1x8x256xf32, #tpu.memory_space<vmem>>, %arg12: memref<2x8x256xf32, #tpu.memory_space<vmem>>, %arg13: memref<2x8x256xf32, #tpu.memory_space<vmem>>, %arg14: memref<6x8x256xf32, #tpu.memory_space<vmem>>) attributes {dimension_semantics = [#tpu.dimension_semantics<arbitrary>, #tpu.dimension_semantics<arbitrary>], iteration_bounds = array<i64: 2, 6>, scalar_prefetch = 0 : i64, scratch_operands = 1 : i64, tpu.core_type = #tpu.core_type<tc>, window_params = [{transform_indices = @transform_0, window_bounds = array<i64: 1, 8, 128>}, {pipeline_mode = #tpu.pipeline_mode<synchronous>, transform_indices = @transform_1, window_bounds = array<i64: 2, 8, 256>}, {pipeline_mode = #tpu.pipeline_mode<synchronous>, transform_indices = @transform_2, window_bounds = array<i64: 2, 8, 256>}, {pipeline_mode = #tpu.pipeline_mode<synchronous>, transform_indices = @transform_3, window_bounds = array<i64: 384, 1024>}, {pipeline_mode = #tpu.pipeline_mode<synchronous>, transform_indices = @transform_4, window_bounds = array<i64: 1, 1024>}, {pipeline_mode = #tpu.pipeline_mode<synchronous>, transform_indices = @transform_5, window_bounds = array<i64: 512, 1024>}, {pipeline_mode = #tpu.pipeline_mode<synchronous>, transform_indices = @transform_6, window_bounds = array<i64: 1, 1024>}, {transform_indices = @transform_7, window_bounds = array<i64: 256, 256>}, {transform_indices = @transform_8, window_bounds = array<i64: 1, 256>}, {transform_indices = @transform_9, window_bounds = array<i64: 1, 8, 256>}, {pipeline_mode = #tpu.pipeline_mode<synchronous>, transform_indices = @transform_10, window_bounds = array<i64: 2, 8, 256>}, {pipeline_mode = #tpu.pipeline_mode<synchronous>, transform_indices = @transform_11, window_bounds = array<i64: 2, 8, 256>}]} {
    %c0_i32 = arith.constant 0 : i32
    %0 = arith.cmpi eq, %arg0, %c0_i32 : i32
    %c0_i32_0 = arith.constant 0 : i32
    %1 = arith.cmpi eq, %arg1, %c0_i32_0 : i32
    %2 = arith.andi %0, %1 : i1
    %3 = arith.extui %2 : i1 to i32
    %c0_i32_1 = arith.constant 0 : i32
    %4 = arith.cmpi ne, %3, %c0_i32_1 : i32
    scf.if %4 {
      %c0_12 = arith.constant 0 : index
      %c0_13 = arith.constant 0 : index
      %c0_14 = arith.constant 0 : index
      %20 = vector.load %arg3[%c0_12, %c0_13, %c0_14] : memref<2x8x256xf32, #tpu.memory_space<vmem>>, vector<2x8x256xf32>
      %c0_15 = arith.constant 0 : index
      %c0_16 = arith.constant 0 : index
      %c0_17 = arith.constant 0 : index
      %21 = vector.load %arg12[%c0_15, %c0_16, %c0_17] : memref<2x8x256xf32, #tpu.memory_space<vmem>>, vector<2x8x256xf32>
      tpu.vector_store %arg12[%c0_15, %c0_16, %c0_17], %20 {strides = array<i32>} : memref<2x8x256xf32, #tpu.memory_space<vmem>>, vector<2x8x256xf32>,
      %c0_18 = arith.constant 0 : index
      %c0_19 = arith.constant 0 : index
      %c0_20 = arith.constant 0 : index
      %22 = vector.load %arg4[%c0_18, %c0_19, %c0_20] : memref<2x8x256xf32, #tpu.memory_space<vmem>>, vector<2x8x256xf32>
      %c0_21 = arith.constant 0 : index
      %c0_22 = arith.constant 0 : index
      %c0_23 = arith.constant 0 : index
      %23 = vector.load %arg13[%c0_21, %c0_22, %c0_23] : memref<2x8x256xf32, #tpu.memory_space<vmem>>, vector<2x8x256xf32>
      tpu.vector_store %arg13[%c0_21, %c0_22, %c0_23], %22 {strides = array<i32>} : memref<2x8x256xf32, #tpu.memory_space<vmem>>, vector<2x8x256xf32>,
    } else {
    }
    %c0_i32_2 = arith.constant 0 : i32
    %5 = arith.cmpi eq, %arg0, %c0_i32_2 : i32
    %6 = arith.extui %5 : i1 to i32
    %c0_i32_3 = arith.constant 0 : i32
    %7 = arith.cmpi ne, %6, %c0_i32_3 : i32
    scf.if %7 {
      %c0_12 = arith.constant 0 : index
      %c0_13 = arith.constant 0 : index
      %c0_14 = arith.constant 0 : index
      %20 = vector.load %arg2[%c0_12, %c0_13, %c0_14] : memref<1x8x128xbf16, #tpu.memory_space<vmem>>, vector<1x8x128xbf16>
      %21 = vector.shape_cast %20 : vector<1x8x128xbf16> to vector<8x128xbf16>
      %c0_15 = arith.constant 0 : index
      %c0_16 = arith.constant 0 : index
      %c0_17 = arith.constant 0 : index
      %22 = vector.load %arg12[%c0_15, %c0_16, %c0_17] : memref<2x8x256xf32, #tpu.memory_space<vmem>>, vector<1x8x256xf32>
      %23 = vector.shape_cast %22 : vector<1x8x256xf32> to vector<8x256xf32>
      %c0_18 = arith.constant 0 : index
      %c0_19 = arith.constant 0 : index
      %c0_20 = arith.constant 0 : index
      %24 = vector.load %arg13[%c0_18, %c0_19, %c0_20] : memref<2x8x256xf32, #tpu.memory_space<vmem>>, vector<1x8x256xf32>
      %25 = vector.shape_cast %24 : vector<1x8x256xf32> to vector<8x256xf32>
      %c1 = arith.constant 1 : index
      %c0_21 = arith.constant 0 : index
      %c0_22 = arith.constant 0 : index
      %26 = vector.load %arg12[%c1, %c0_21, %c0_22] : memref<2x8x256xf32, #tpu.memory_space<vmem>>, vector<1x8x256xf32>
      %27 = vector.shape_cast %26 : vector<1x8x256xf32> to vector<8x256xf32>
      %c1_23 = arith.constant 1 : index
      %c0_24 = arith.constant 0 : index
      %c0_25 = arith.constant 0 : index
      %28 = vector.load %arg13[%c1_23, %c0_24, %c0_25] : memref<2x8x256xf32, #tpu.memory_space<vmem>>, vector<1x8x256xf32>
      %29 = vector.shape_cast %28 : vector<1x8x256xf32> to vector<8x256xf32>
      %30 = arith.truncf %23 : vector<8x256xf32> to vector<8x256xbf16>
      %31 = tpu.concatenate %21, %30 in 1 : vector<8x128xbf16>, vector<8x256xbf16> -> vector<8x384xbf16>
      %c0_26 = arith.constant 0 : index
      %c0_27 = arith.constant 0 : index
      %32 = vector.load %arg5[%c0_26, %c0_27] : memref<384x1024xbf16, #tpu.memory_space<vmem>>, vector<384x1024xbf16>
      %cst_28 = arith.constant dense<0.000000e+00> : vector<8x1024xf32>
      %33 = tpu.matmul %31, %32, %cst_28 {dimension_numbers = #tpu.dot_dimension_numbers<[1], [0], [0], [1], [0, 0, 1, 1], [], []>} : vector<8x384xbf16>, vector<384x1024xbf16>, vector<8x1024xf32> -> vector<8x1024xf32>
      %c0_29 = arith.constant 0 : index
      %c0_30 = arith.constant 0 : index
      %34 = vector.load %arg6[%c0_29, %c0_30] : memref<1x1024xf32, #tpu.memory_space<vmem>>, vector<1x1024xf32>
      %35 = vector.broadcast %34 : vector<1x1024xf32> to vector<8x1024xf32>
      %36 = arith.addf %33, %35 : vector<8x1024xf32>
      %37 = vector.extract_strided_slice %36 {offsets = [0, 0], sizes = [8, 256], strides = [1, 1]} : vector<8x1024xf32> to vector<8x256xf32>
      %38 = arith.negf %37 : vector<8x256xf32>
      %39 = math.exp %38 : vector<8x256xf32>
      %cst_31 = arith.constant 1.000000e+00 : f32
      %40 = vector.broadcast %cst_31 : f32 to vector<8x256xf32>
      %41 = arith.addf %40, %39 : vector<8x256xf32>
      %42 = arith.divf %40, %41 : vector<8x256xf32>
      %43 = vector.extract_strided_slice %36 {offsets = [0, 256], sizes = [8, 256], strides = [1, 1]} : vector<8x1024xf32> to vector<8x256xf32>
      %44 = arith.negf %43 : vector<8x256xf32>
      %45 = math.exp %44 : vector<8x256xf32>
      %cst_32 = arith.constant 1.000000e+00 : f32
      %46 = vector.broadcast %cst_32 : f32 to vector<8x256xf32>
      %47 = arith.addf %46, %45 : vector<8x256xf32>
      %48 = arith.divf %46, %47 : vector<8x256xf32>
      %49 = vector.extract_strided_slice %36 {offsets = [0, 512], sizes = [8, 256], strides = [1, 1]} : vector<8x1024xf32> to vector<8x256xf32>
      %50 = math.tanh %49 : vector<8x256xf32>
      %51 = vector.extract_strided_slice %36 {offsets = [0, 768], sizes = [8, 256], strides = [1, 1]} : vector<8x1024xf32> to vector<8x256xf32>
      %52 = arith.negf %51 : vector<8x256xf32>
      %53 = math.exp %52 : vector<8x256xf32>
      %cst_33 = arith.constant 1.000000e+00 : f32
      %54 = vector.broadcast %cst_33 : f32 to vector<8x256xf32>
      %55 = arith.addf %54, %53 : vector<8x256xf32>
      %56 = arith.divf %54, %55 : vector<8x256xf32>
      %57 = arith.mulf %48, %25 : vector<8x256xf32>
      %58 = arith.mulf %42, %50 : vector<8x256xf32>
      %59 = arith.addf %57, %58 : vector<8x256xf32>
      %60 = math.tanh %59 : vector<8x256xf32>
      %61 = arith.mulf %56, %60 : vector<8x256xf32>
      %62 = arith.truncf %61 : vector<8x256xf32> to vector<8x256xbf16>
      %63 = arith.truncf %27 : vector<8x256xf32> to vector<8x256xbf16>
      %64 = tpu.concatenate %62, %63 in 1 : vector<8x256xbf16>, vector<8x256xbf16> -> vector<8x512xbf16>
      %c0_34 = arith.constant 0 : index
      %c0_35 = arith.constant 0 : index
      %65 = vector.load %arg7[%c0_34, %c0_35] : memref<512x1024xbf16, #tpu.memory_space<vmem>>, vector<512x1024xbf16>
      %cst_36 = arith.constant dense<0.000000e+00> : vector<8x1024xf32>
      %66 = tpu.matmul %64, %65, %cst_36 {dimension_numbers = #tpu.dot_dimension_numbers<[1], [0], [0], [1], [0, 0, 1, 1], [], []>} : vector<8x512xbf16>, vector<512x1024xbf16>, vector<8x1024xf32> -> vector<8x1024xf32>
      %c0_37 = arith.constant 0 : index
      %c0_38 = arith.constant 0 : index
      %67 = vector.load %arg8[%c0_37, %c0_38] : memref<1x1024xf32, #tpu.memory_space<vmem>>, vector<1x1024xf32>
      %68 = vector.broadcast %67 : vector<1x1024xf32> to vector<8x1024xf32>
      %69 = arith.addf %66, %68 : vector<8x1024xf32>
      %70 = vector.extract_strided_slice %69 {offsets = [0, 0], sizes = [8, 256], strides = [1, 1]} : vector<8x1024xf32> to vector<8x256xf32>
      %71 = arith.negf %70 : vector<8x256xf32>
      %72 = math.exp %71 : vector<8x256xf32>
      %cst_39 = arith.constant 1.000000e+00 : f32
      %73 = vector.broadcast %cst_39 : f32 to vector<8x256xf32>
      %74 = arith.addf %73, %72 : vector<8x256xf32>
      %75 = arith.divf %73, %74 : vector<8x256xf32>
      %76 = vector.extract_strided_slice %69 {offsets = [0, 256], sizes = [8, 256], strides = [1, 1]} : vector<8x1024xf32> to vector<8x256xf32>
      %77 = arith.negf %76 : vector<8x256xf32>
      %78 = math.exp %77 : vector<8x256xf32>
      %cst_40 = arith.constant 1.000000e+00 : f32
      %79 = vector.broadcast %cst_40 : f32 to vector<8x256xf32>
      %80 = arith.addf %79, %78 : vector<8x256xf32>
      %81 = arith.divf %79, %80 : vector<8x256xf32>
      %82 = vector.extract_strided_slice %69 {offsets = [0, 512], sizes = [8, 256], strides = [1, 1]} : vector<8x1024xf32> to vector<8x256xf32>
      %83 = math.tanh %82 : vector<8x256xf32>
      %84 = vector.extract_strided_slice %69 {offsets = [0, 768], sizes = [8, 256], strides = [1, 1]} : vector<8x1024xf32> to vector<8x256xf32>
      %85 = arith.negf %84 : vector<8x256xf32>
      %86 = math.exp %85 : vector<8x256xf32>
      %cst_41 = arith.constant 1.000000e+00 : f32
      %87 = vector.broadcast %cst_41 : f32 to vector<8x256xf32>
      %88 = arith.addf %87, %86 : vector<8x256xf32>
      %89 = arith.divf %87, %88 : vector<8x256xf32>
      %90 = arith.mulf %81, %29 : vector<8x256xf32>
      %91 = arith.mulf %75, %83 : vector<8x256xf32>
      %92 = arith.addf %90, %91 : vector<8x256xf32>
      %93 = math.tanh %92 : vector<8x256xf32>
      %94 = arith.mulf %89, %93 : vector<8x256xf32>
      %c0_42 = arith.constant 0 : index
      %c0_43 = arith.constant 0 : index
      %c0_44 = arith.constant 0 : index
      %95 = vector.load %arg12[%c0_42, %c0_43, %c0_44] : memref<2x8x256xf32, #tpu.memory_space<vmem>>, vector<1x8x256xf32>
      %96 = vector.shape_cast %95 : vector<1x8x256xf32> to vector<8x256xf32>
      %97 = vector.shape_cast %61 : vector<8x256xf32> to vector<1x8x256xf32>
      tpu.vector_store %arg12[%c0_42, %c0_43, %c0_44], %97 {strides = array<i32>} : memref<2x8x256xf32, #tpu.memory_space<vmem>>, vector<1x8x256xf32>,
      %c1_45 = arith.constant 1 : index
      %c0_46 = arith.constant 0 : index
      %c0_47 = arith.constant 0 : index
      %98 = vector.load %arg12[%c1_45, %c0_46, %c0_47] : memref<2x8x256xf32, #tpu.memory_space<vmem>>, vector<1x8x256xf32>
      %99 = vector.shape_cast %98 : vector<1x8x256xf32> to vector<8x256xf32>
      %100 = vector.shape_cast %94 : vector<8x256xf32> to vector<1x8x256xf32>
      tpu.vector_store %arg12[%c1_45, %c0_46, %c0_47], %100 {strides = array<i32>} : memref<2x8x256xf32, #tpu.memory_space<vmem>>, vector<1x8x256xf32>,
      %c0_48 = arith.constant 0 : index
      %c0_49 = arith.constant 0 : index
      %c0_50 = arith.constant 0 : index
      %101 = vector.load %arg13[%c0_48, %c0_49, %c0_50] : memref<2x8x256xf32, #tpu.memory_space<vmem>>, vector<1x8x256xf32>
      %102 = vector.shape_cast %101 : vector<1x8x256xf32> to vector<8x256xf32>
      %103 = vector.shape_cast %59 : vector<8x256xf32> to vector<1x8x256xf32>
      tpu.vector_store %arg13[%c0_48, %c0_49, %c0_50], %103 {strides = array<i32>} : memref<2x8x256xf32, #tpu.memory_space<vmem>>, vector<1x8x256xf32>,
      %c1_51 = arith.constant 1 : index
      %c0_52 = arith.constant 0 : index
      %c0_53 = arith.constant 0 : index
      %104 = vector.load %arg13[%c1_51, %c0_52, %c0_53] : memref<2x8x256xf32, #tpu.memory_space<vmem>>, vector<1x8x256xf32>
      %105 = vector.shape_cast %104 : vector<1x8x256xf32> to vector<8x256xf32>
      %106 = vector.shape_cast %92 : vector<8x256xf32> to vector<1x8x256xf32>
      tpu.vector_store %arg13[%c1_51, %c0_52, %c0_53], %106 {strides = array<i32>} : memref<2x8x256xf32, #tpu.memory_space<vmem>>, vector<1x8x256xf32>,
      %107 = arith.index_cast %arg1 : i32 to index
      %c0_54 = arith.constant 0 : index
      %c0_55 = arith.constant 0 : index
      %108 = vector.load %arg14[%107, %c0_54, %c0_55] : memref<6x8x256xf32, #tpu.memory_space<vmem>>, vector<1x8x256xf32>
      %109 = vector.shape_cast %108 : vector<1x8x256xf32> to vector<8x256xf32>
      %110 = vector.shape_cast %94 : vector<8x256xf32> to vector<1x8x256xf32>
      tpu.vector_store %arg14[%107, %c0_54, %c0_55], %110 {strides = array<i32>} : memref<6x8x256xf32, #tpu.memory_space<vmem>>, vector<1x8x256xf32>,
    } else {
    }
    %8 = arith.index_cast %arg1 : i32 to index
    %c0 = arith.constant 0 : index
    %c0_4 = arith.constant 0 : index
    %9 = vector.load %arg14[%8, %c0, %c0_4] : memref<6x8x256xf32, #tpu.memory_space<vmem>>, vector<1x8x256xf32>
    %10 = vector.shape_cast %9 : vector<1x8x256xf32> to vector<8x256xf32>
    %11 = arith.truncf %10 : vector<8x256xf32> to vector<8x256xbf16>
    %c0_5 = arith.constant 0 : index
    %c0_6 = arith.constant 0 : index
    %12 = vector.load %arg9[%c0_5, %c0_6] : memref<256x256xbf16, #tpu.memory_space<vmem>>, vector<256x256xbf16>
    %cst = arith.constant dense<0.000000e+00> : vector<8x256xf32>
    %13 = tpu.matmul %11, %12, %cst {dimension_numbers = #tpu.dot_dimension_numbers<[1], [0], [0], [1], [0, 0, 1, 1], [], []>} : vector<8x256xbf16>, vector<256x256xbf16>, vector<8x256xf32> -> vector<8x256xf32>
    %c0_7 = arith.constant 0 : index
    %c0_8 = arith.constant 0 : index
    %14 = vector.load %arg10[%c0_7, %c0_8] : memref<1x256xf32, #tpu.memory_space<vmem>>, vector<1x256xf32>
    %15 = vector.broadcast %14 : vector<1x256xf32> to vector<8x256xf32>
    %16 = arith.addf %13, %15 : vector<8x256xf32>
    %c0_9 = arith.constant 0 : index
    %c0_10 = arith.constant 0 : index
    %c0_11 = arith.constant 0 : index
    %17 = vector.load %arg11[%c0_9, %c0_10, %c0_11] : memref<1x8x256xf32, #tpu.memory_space<vmem>>, vector<1x8x256xf32>
    %18 = vector.shape_cast %17 : vector<1x8x256xf32> to vector<8x256xf32>
    %19 = vector.shape_cast %16 : vector<8x256xf32> to vector<1x8x256xf32>
    tpu.vector_store %arg11[%c0_9, %c0_10, %c0_11], %19 {strides = array<i32>} : memref<1x8x256xf32, #tpu.memory_space<vmem>>, vector<1x8x256xf32>,
    return
  }
  func.func @transform_0(%arg0: i32, %arg1: i32) -> (i32, i32, i32) {
    %c0_i32 = arith.constant 0 : i32
    %c0_i32_0 = arith.constant 0 : i32
    %c0_i32_1 = arith.constant 0 : i32
    return %arg1, %c0_i32, %c0_i32_0 : i32, i32, i32
  }
  func.func @transform_1(%arg0: i32, %arg1: i32) -> (i32, i32, i32) {
    %c0_i32 = arith.constant 0 : i32
    %c0_i32_0 = arith.constant 0 : i32
    %c0_i32_1 = arith.constant 0 : i32
    %c0_i32_2 = arith.constant 0 : i32
    return %c0_i32, %c0_i32_0, %c0_i32_1 : i32, i32, i32
  }
  func.func @transform_2(%arg0: i32, %arg1: i32) -> (i32, i32, i32) {
    %c0_i32 = arith.constant 0 : i32
    %c0_i32_0 = arith.constant 0 : i32
    %c0_i32_1 = arith.constant 0 : i32
    %c0_i32_2 = arith.constant 0 : i32
    return %c0_i32, %c0_i32_0, %c0_i32_1 : i32, i32, i32
  }
  func.func @transform_3(%arg0: i32, %arg1: i32) -> (i32, i32) {
    %c0_i32 = arith.constant 0 : i32
    %c0_i32_0 = arith.constant 0 : i32
    %c0_i32_1 = arith.constant 0 : i32
    return %c0_i32, %c0_i32_0 : i32, i32
  }
  func.func @transform_4(%arg0: i32, %arg1: i32) -> (i32, i32) {
    %c0_i32 = arith.constant 0 : i32
    %c0_i32_0 = arith.constant 0 : i32
    %c0_i32_1 = arith.constant 0 : i32
    return %c0_i32, %c0_i32_0 : i32, i32
  }
  func.func @transform_5(%arg0: i32, %arg1: i32) -> (i32, i32) {
    %c0_i32 = arith.constant 0 : i32
    %c0_i32_0 = arith.constant 0 : i32
    %c0_i32_1 = arith.constant 0 : i32
    return %c0_i32, %c0_i32_0 : i32, i32
  }
  func.func @transform_6(%arg0: i32, %arg1: i32) -> (i32, i32) {
    %c0_i32 = arith.constant 0 : i32
    %c0_i32_0 = arith.constant 0 : i32
    %c0_i32_1 = arith.constant 0 : i32
    return %c0_i32, %c0_i32_0 : i32, i32
  }
  func.func @transform_7(%arg0: i32, %arg1: i32) -> (i32, i32) {
    %c0_i32 = arith.constant 0 : i32
    %c0_i32_0 = arith.constant 0 : i32
    return %c0_i32, %arg0 : i32, i32
  }
  func.func @transform_8(%arg0: i32, %arg1: i32) -> (i32, i32) {
    %c0_i32 = arith.constant 0 : i32
    %c0_i32_0 = arith.constant 0 : i32
    return %c0_i32, %arg0 : i32, i32
  }
  func.func @transform_9(%arg0: i32, %arg1: i32) -> (i32, i32, i32) {
    %c0_i32 = arith.constant 0 : i32
    %c0_i32_0 = arith.constant 0 : i32
    return %arg1, %c0_i32, %arg0 : i32, i32, i32
  }
  func.func @transform_10(%arg0: i32, %arg1: i32) -> (i32, i32, i32) {
    %c0_i32 = arith.constant 0 : i32
    %c0_i32_0 = arith.constant 0 : i32
    %c0_i32_1 = arith.constant 0 : i32
    %c0_i32_2 = arith.constant 0 : i32
    return %c0_i32, %c0_i32_0, %c0_i32_1 : i32, i32, i32
  }
  func.func @transform_11(%arg0: i32, %arg1: i32) -> (i32, i32, i32) {
    %c0_i32 = arith.constant 0 : i32
    %c0_i32_0 = arith.constant 0 : i32
    %c0_i32_1 = arith.constant 0 : i32
    %c0_i32_2 = arith.constant 0 : i32
    return %c0_i32, %c0_i32_0, %c0_i32_1 : i32, i32, i32
  }
}

</mosaic_0001>

<bundles_post_ra>
// kernel: tpu_custom_call.1
= control target key start
LH: loop header
LB: loop body
LE: loop exit
PB: predicated region body
PF: predicated region fallthrough
CT: control target
= control target key end

     0   :  { %s8500_s0 = inlined_call_operand.vmem [shape: bf16[6,8,128], index: 0, kind: input, shape index: {}]   ;;  %s8501_s1 = inlined_call_operand.hbm [shape: f32[2,8,256], index: 1, kind: input, shape index: {}, may-alias: {1,10}]   ;;  %s8502_s2 = inlined_call_operand.hbm [shape: f32[2,8,256], index: 2, kind: input, shape index: {}, may-alias: {2,11}]   ;;  %s8503_s3 = inlined_call_operand.hbm [shape: bf16[384,1024], index: 3, kind: input, shape index: {}]   ;;  %s8504_s4 = inlined_call_operand.vmem [shape: f32[1,1024], index: 4, kind: input, shape index: {}]   ;;  %s8505_s5 = inlined_call_operand.hbm [shape: bf16[512,1024], index: 5, kind: input, shape index: {}]   ;;  %s8506_s6 = inlined_call_operand.vmem [shape: f32[1,1024], index: 6, kind: input, shape index: {}]   ;;  %s8507_s7 = inlined_call_operand.hbm [shape: bf16[256,512], index: 7, kind: input, shape index: {}]   ;;  %s8508_s8 = inlined_call_operand.vmem [shape: f32[1,512], index: 8, kind: input, shape index: {}]   ;;  %s8509_s9 = inlined_call_operand.hbm [shape: f32[6,8,512], index: 9, kind: output, shape index: {0}]   ;;  %s8510_s10 = inlined_call_operand.hbm [shape: f32[2,8,256], index: 10, kind: output, shape index: {1}, may-alias: {1,10}]   ;;  %s8511_s11 = inlined_call_operand.hbm [shape: f32[2,8,256], index: 11, kind: output, shape index: {2}, may-alias: {2,11}]  }
   0x1   :  { %8522 = sst [smem:[#allocation28_spill]] %s8501_s1 }
   0x2   :  { %8523 = sst [smem:[#allocation29_spill]] %s8502_s2 }
   0x3   :  { %8524 = sst [smem:[#allocation30_spill]] %s8503_s3 }
   0x4   :  { %8525 = sst [smem:[#allocation31_spill]] %s8504_s4 }
   0x5   :  { %8526 = sst [smem:[#allocation32_spill]] %s8505_s5 }
   0x6   :  { %8527 = sst [smem:[#allocation33_spill]] %s8506_s6 }
   0x7   :  { %8528 = sst [smem:[#allocation34_spill]] %s8508_s8 }
   0x8   :  { %8529 = sst [smem:[#allocation35_spill]] %s8509_s9 }
   0x9   :  { %8530 = sst [smem:[#allocation36_spill]] %s8510_s10 }
   0xa   :  { %8531 = sst [smem:[#allocation37_spill]] %s8511_s11 }
   0xb   :  { %17 = vsyncpa [#allocation4], 0 }
   0xc   :  { %18 = vsyncpa [#allocation7], 0 }
   0xd   :  { %19 = vsyncpa [#allocation10], 0 }
   0xe   :  { %20 = vsyncpa [#allocation5], 0 }
   0xf   :  { %22 = vsyncpa [#allocation5 + $0x1], 0 }
  0x10   :  { %23 = vsyncpa [#allocation14], 0  ;;  %s7872_s17 = smov 0   ;;  %s7874_s18 = smov 0  }
  0x11   :  { %s7876_s19 = smov 0   ;;  %s7878_s20 = smov 0  }
  0x12   :  { %s7880_s21 = smov 0   ;;  %s7882_s22 = smov 0  }
  0x13   :  { %s7884_s23 = smov 0   ;;  %s7886_s24 = smov 0  }
  0x14   :  { %s7888_s25 = smov 0   ;;  %s7890_s26 = smov 0  }
  0x15   :  { %s7892_s27 = smov 0  }
  0x16 LB: > { %8532 = sst [smem:[#allocation22_spill]] %s7756_s17  ;;  %s7926_s28 = sadd.s32 4294967295, %s7796_s27   ;;  %s7796_s27 = sphi %s7892_s27, %s29_s27   ;;  %s7792_s26 = sphi %s7890_s26, %s8589_s26   ;;  %s7788_s25 = sphi %s7888_s25, %s8588_s25   ;;  %s7784_s24 = sphi %s7886_s24, %s8587_s24   ;;  %s7780_s23 = sphi %s7884_s23, %s8578_s23   ;;  %s7776_s22 = sphi %s7882_s22, %s8586_s22   ;;  %s7772_s21 = sphi %s7880_s21, %s8585_s21   ;;  %s7768_s20 = sphi %s7878_s20, %s8584_s20   ;;  %s7764_s19 = sphi %s7876_s19, %s8583_s19   ;;  %s7760_s18 = sphi %s7874_s18, %s8582_s18   ;;  %s7756_s17 = sphi %s7872_s17, %s8581_s17  }
  0x17   : > { %8533 = sst [smem:[#allocation23_spill]] %s7788_s25  ;;  %s4773_s29 = sadd.s32 4294967294, %s7796_s27  }
  0x18   : > { %8534 = sst [smem:[#allocation24_spill]] %s7796_s27  ;;  %p207_p0 = scmp.ne.s32.totalorder %s7776_s22, %s7772_s21 }
  0x19   : > { %p208_p1 = scmp.eq.s32.totalorder %s7796_s27, 0  ;;  %p213_p2 = scmp.ne.s32.totalorder %s7772_s21, %s7768_s20 }
  0x1a   : > { %p214_p3 = scmp.eq.s32.totalorder %s7926_s28, 0  ;;  %p264_p5 = scmp.ne.s32.totalorder %s7764_s19, %s7760_s18 }
  0x1b   : > { %p7936_p4 = por %p208_p1, %p207_p0  ;;  %p265_p7 = scmp.eq.s32.totalorder %s7926_s28, 11 }
  0x1c   : > { %p7944_p6 = por %p214_p3, %p213_p2  ;;  %p270_p8 = scmp.ne.s32.totalorder %s7760_s18, %s7756_s17 }
  0x1d   : > { %p271_p9 = scmp.eq.s32.totalorder %s4773_s29, 11  ;;  %p7953_p10 = por %p265_p7, %p264_p5 }
  0x1e   : > { %p4774_p11 = scmp.ge.s32.totalorder %s7796_s27, 1  ;;  %p320_p13 = scmp.lt.s32.totalorder %s7796_s27, 13 }
  0x1f   : > { %s8537_s15 = scalar_select %p7953_p10, 1, 0 }
  0x20   : > { %p7958_p12 = por %p271_p9, %p270_p8  ;;  %s8541_s1 = sld [smem:[#allocation28_spill]] }
  0x21   : > { %8538 = sst [smem:[#allocation25_spill]] %s8537_s15  ;;  %p7966_p0 = pnand %p4774_p11, %p320_p13 }
  0x22   : > { %s8539_s16 = scalar_select %p7958_p12, 1, 0 }
  0x23   : > { %p7250_p1 = pneg %p7966_p0  ;;  %s7798_s29 = smov [#allocation3]  }
  0x24   : > { %8540 = sst [smem:[#allocation26_spill]] %s8539_s16  ;;  %s333_s17 = sshll.u32 %s7798_s29, 4  ;;  %s334_s17 = int_to_ptr.vmem [resolvable:$true] %s333_s17 }
  0x25   : > { %p7974_p2 = pnand %p7250_p1, %p214_p3  ;;  %p7275_p5 = scmp.lt.s32.totalorder %s7796_s27, 12 }
  0x26   : > { %s331_s30 = sshll.u32 %s8541_s1, 4  ;;  %s8544_s2 = sld [smem:[#allocation29_spill]]  ;;  %s332_s30 = int_to_ptr.hbm [resolvable:$true] %s331_s30 }
  0x27   : > { %s8517_s15 = smov 256   ;;  %s7800_s11 = smov 16  }
  0x28   : > { %7253 = dma.hbm_to_vmem [thread:$0]  (!%p7974_p2), %s332_s30, 512, %s334_s17, [#allocation4], %s8517_s15, %s8517_s15, %s7800_s11  }
  0x29   : > { %p7988_p8 = pnand %p7275_p5, %p7936_p4  ;;  %s7801_s10 = smov [#allocation6]  }
  0x2a   : > { %s347_s6 = sshll.u32 %s7801_s10, 4  ;;  %s8546_s3 = sld [smem:[#allocation30_spill]]  ;;  %s348_s6 = int_to_ptr.vmem [resolvable:$true] %s347_s6 }
  0x2b   : > { %s7802_s17 = smov [#allocation8]   ;;  %s7803_s10 = smov 512  }
  0x2c   : > { %s345_s1 = sshll.u32 %s8544_s2, 4  ;;  %s361_s30 = sshll.u32 %s7802_s17, 4  ;;  %s346_s1 = int_to_ptr.hbm [resolvable:$true] %s345_s1  ;;  %s362_s30 = int_to_ptr.vmem [resolvable:$true] %s361_s30 }
  0x2d   : > { %7256 = dma.hbm_to_vmem [thread:$0]  (!%p7974_p2), %s346_s1, 512, %s348_s6, [#allocation7], %s8517_s15, %s8517_s15, %s7800_s11  }
  0x2e   : > { %s7804_s13 = smov 32   ;;  %s8547_s5 = sld [smem:[#allocation32_spill]] }
  0x2f   : > { %s7805_s1 = smov [#allocation9]   ;;  %s38_s11 = sadd.s32 1, %s7788_s25 }
  0x30   : > { %s359_s12 = sshll.u32 %s8546_s3, 4  ;;  %s378_s6 = sshll.u32 %s7805_s1, 4  ;;  %s360_s12 = int_to_ptr.hbm [resolvable:$true] %s359_s12  ;;  %s379_s6 = int_to_ptr.vmem [resolvable:$true] %s378_s6 }
  0x31   : > { %7259 = dma.hbm_to_vmem [thread:$0]  (!%p7974_p2), %s360_s12, 24576, %s362_s30, [#allocation7], %s7803_s10, %s7803_s10, %s7804_s13  }
  0x32   : > { %p39_p4 = scmp.ge.s32.totalorder %s38_s11, 6  ;;  %s41_s17 = sadd.s32 1, %s7792_s26 }
  0x33   : > { %s402_s15 = sand.u32 1, %s7796_s27   ;;  %s404_s2 = sand.u32 1, %s7776_s22  }
  0x34   : > { %s376_s20 = sshll.u32 %s8547_s5, 4  ;;  %s8591_s11 = smov (%p39_p4, %s38_s11), 0  ;;  %s377_s20 = int_to_ptr.hbm [resolvable:$true] %s376_s20 }
  0x35   : > { %7262 = dma.hbm_to_vmem [thread:$0]  (!%p7974_p2), %s377_s20, 32768, %s379_s6, [#allocation10], %s7803_s10, %s7803_s10, %s7804_s13  }
  0x36   : > { %8548 = sst [smem:[#allocation27_spill]] %s8591_s11  ;;  %s8593_s17 = smov (!%p39_p4, %s41_s17), %s7792_s26 }
  0x37   : > { %s249_s12 = ssub.s32 %s7788_s25, %s8591_s11  ;;  %p43_p9 = scmp.ge.s32.totalorder %s8593_s17, 2 }
  0x38   : > { %s4780_s30 = sshll.u32 %s404_s2, 8  ;;  %s6739_s4 = sshll.u32 %s7792_s26, 3 }
  0x39   : > { %s8595_s17 = smov (%p43_p9, %s8593_s17), 0  ;;  %s411_s13 = scalar_lea.hbm %s8507_s7, %s6739_s4 }
  0x3a   : > { %s406_s8 = scalar_lea.vmem [#allocation11], %s4780_s30  ;;  %s197_s1 = ssub.s32 %s7792_s26, %s8595_s17 }
  0x3b   : > { %s414_s20 = sshll.u32 %s406_s8, 4  ;;  %s412_s6 = sshll.u32 %s411_s13, 4  ;;  %s413_s6 = int_to_ptr.hbm [resolvable:$true] %s412_s6  ;;  %s415_s20 = int_to_ptr.vmem [resolvable:$true] %s414_s20 }
  0x3c   : > { %p198_p11 = scmp.eq.s32.totalorder %s197_s1, 0  ;;  %s251_s3 = sor.u32 %s249_s12, %s197_s1 }
  0x3d   : > { %p252_p13 = scmp.eq.s32.totalorder %s251_s3, 0  ;;  %s8549_s5 = sadd.s32 1, %s7776_s22 }
  0x3e   : > { %s8026_s11 = scalar_select %p198_p11, %s7776_s22, %s8549_s5  }
  0x3f   : > { %s8550_s2 = sadd.s32 1, %s7764_s19  ;;  %s403_s27 = scalar_lea.sflag [#allocation4], %s402_s15 }
  0x40   : > { %s8031_s25 = scalar_select %p252_p13, %s7764_s19, %s8550_s2  }
  0x41   : > { %s7806_s16 = smov 128   ;;  %s7807_s10 = smov 8  }
  0x42   : > { %s8551_s4 = smov 256   ;;  %434 = sbr.rel (%p7966_p0) target bundleno = 1032 (0x408), region = 56 }
  0x43   : > { %7266 = dma.hbm_to_vmem [thread:$0]  (!%p7988_p8), %s413_s6, 4096, %s415_s20, %s403_s27, %s8551_s4, %s7806_s16, %s7807_s10  }
  0x47   : > { %7731 = dma.done.wait (%p214_p3), [#allocation4], 512  }
  0x48   : > { %7733 = vsyncadd (%p214_p3), [#allocation4], 4294966784 }
  0x49   : > { %7735 = dma.done.wait (%p214_p3), [#allocation7], 25088  }
  0x4a   : > { %7737 = vsyncadd (%p214_p3), [#allocation7], 4294942208 }
  0x4b   : > { %7739 = dma.done.wait (%p214_p3), [#allocation10], 32768  }
  0x4c   : > { %7741 = vsyncadd (%p214_p3), [#allocation10], 4294934528  ;;  %s456_s3 = sand.u32 1, %s7926_s28   ;;  %s458_s5 = sand.u32 1, %s7772_s21  }
  0x4d   : > { %s4788_s9 = sshll.u32 %s458_s5, 8  ;;  %s457_s27 = scalar_lea.sflag [#allocation4], %s456_s3 }
  0x4e   : > { %s8052_s15 = scalar_lea.vmem [#allocation11], %s4788_s9 }
  0x4f   : > { %7743 = dma.done.wait (%p7944_p6), %s457_s27, 4096  }
  0x50   : > { %7745 = vsyncadd (%p7944_p6), %s457_s27, 4294963200  ;;  %s501_s29 = sand.u32 1, %s7760_s18   ;;  %p508_p3 = scmp.lt.s32.totalorder %s7780_s23, 5 }
  0x51   : > { %s4789_s12 = sshll.u32 %s501_s29, 4  ;;  %s8063_s30 = sshll.u32 %s7784_s24, 1 }
  0x52   : > { %p514_p0 = scmp.lt.s32.totalorder %s8063_s30, 3  ;;  %p519_p6 = scmp.eq.s32.totalorder %s7784_s24, 0 }
  0x53   : > { %s509_s13 = scalar_select %p508_p3, %s7780_s23, 5 }
  0x54   : > { %s8068_s8 = scalar_select %p514_p0, %s8063_s30, 3 }
  0x55   : > { %s4790_s14 = sshll.u32 %s509_s13, 2  ;;  %s8552_s10 = sld [smem:[#allocation34_spill]] }
  0x56   : > { %s8074_s6 = scalar_lea.vmem %s8500_s0, %s4790_s14  ;;  %p520_p1 = scmp.eq.s32.totalorder %s7780_s23, 0 }
  0x57   : > { %s8081_s3 = scalar_lea.vmem [#allocation12], %s4789_s12 }
  0x58   : > { %p521_p2 = pnand %p520_p1, %p519_p6 }
  0x5a   : > { %524 = sbr.rel (%p521_p2) target bundleno = 104 (0x68), region = 80 }
  0x5b   : > { %s516_s4 = scalar_lea.vmem %s8552_s10, %s8068_s8 }
  0x5f   : > { %v525_v0 = vld [vmem:[#allocation3] sm:$0xff]  ;;  %v526_v1 = vld [vmem:[#allocation3 + $0x8] sm:$0xff]  ;;  %v527_v2 = vld [vmem:[#allocation3 + $0x10] sm:$0xff] }
  0x60   : > { %529 = vst [vmem:[#allocation13] sm:$0xff] %v525_v0  ;;  %v528_v3 = vld [vmem:[#allocation3 + $0x18] sm:$0xff]  ;;  %v533_v4 = vld [vmem:[#allocation6] sm:$0xff]  ;;  %v534_v5 = vld [vmem:[#allocation6 + $0x8] sm:$0xff] }
  0x61   : > { %530 = vst [vmem:[#allocation13 + $0x8] sm:$0xff] %v526_v1  ;;  %v535_v6 = vld [vmem:[#allocation6 + $0x10] sm:$0xff]  ;;  %v536_v7 = vld [vmem:[#allocation6 + $0x18] sm:$0xff] }
  0x62   : > { %531 = vst [vmem:[#allocation13 + $0x10] sm:$0xff] %v527_v2 }
  0x63   : > { %532 = vst [vmem:[#allocation13 + $0x18] sm:$0xff] %v528_v3 }
  0x64   : > { %537 = vst [vmem:[#allocation15] sm:$0xff] %v533_v4 }
  0x65   : > { %538 = vst [vmem:[#allocation15 + $0x8] sm:$0xff] %v534_v5 }
  0x66   : > { %539 = vst [vmem:[#allocation15 + $0x10] sm:$0xff] %v535_v6 }
  0x67   : > { %540 = vst [vmem:[#allocation15 + $0x18] sm:$0xff] %v536_v7 }
  0x68 PF: > { %p4792_p5 = scmp.ne.s32.totalorder %s7784_s24, 0 }
  0x69   : > { %s8553_s9 = sld [smem:[#allocation31_spill]] (!%p4792_p5)  ;;  %s7188_s14 = sshll.u32 (!%p4792_p5), %s7780_s23, 4 }
  0x6a   : > { %543 = sbr.rel (%p4792_p5) target bundleno = 854 (0x356), region = 84  ;;  %s8566_s13 = sld [smem:[#allocation33_spill]] (!%p4792_p5) }
  0x6b   : > { %s4293_s20 = scalar_lea.vmem (!%p4792_p5), [#allocation2], %s7188_s14 }
  0x6f   : > { %v5019_v8 = vld [vmem:[#allocation8 + $0x1c0] sm:$0xf]  ;;  %v6796_v17 = vld [vmem:[#allocation8 + $0x1c4] sm:$0xf] }
  0x70   : > { %v6800_v9 = vld [vmem:[#allocation8 + $0x1dc] sm:$0xf0]  ;;  %v5021_v18 = vld [vmem:[#allocation8 + $0x1e0] sm:$0xf0] }
  0x71   : > { %v5275_v10 = vld [vmem:[#allocation8 + $0x3c0] sm:$0xf]  ;;  %v5020_v11 = vor.u32 %v6800_v9, %v5019_v8  ;;  %v5024_v20 = vor.u32 %v6796_v17, %v5021_v18  ;;  %v6788_v28 = vld [vmem:[#allocation8 + $0x184] sm:$0xf] }
  0x72   : > { %v6864_v12 = vld [vmem:[#allocation8 + $0x3dc] sm:$0xf0]  ;;  %v4989_v30 = vld [vmem:[#allocation8 + $0x1a0] sm:$0xf0] }
  0x73   : > { %v5531_v13 = vld [vmem:[#allocation8 + $0x5c0] sm:$0xf]  ;;  %v5276_v15 = vor.u32 %v6864_v12, %v5275_v10  ;;  %1733 = vmatpush.bf16.msra.mxu0 %v5020_v11  ;;  %1772 = vmatpush.bf16.msra.mxu3 %v5024_v20  ;;  %v4992_v33 = vor.u32 %v6788_v28, %v4989_v30  ;;  %v6780_v39 = vld [vmem:[#allocation8 + $0x144] sm:$0xf] }
  0x74   : > { %v6928_v14 = vld [vmem:[#allocation8 + $0x5dc] sm:$0xf0]  ;;  %v4957_v40 = vld [vmem:[#allocation8 + $0x160] sm:$0xf0] }
  0x75   : > { %v5532_v16 = vor.u32 %v6928_v14, %v5531_v13  ;;  %v4987_v19 = vld [vmem:[#allocation8 + $0x180] sm:$0xf]  ;;  %1746 = vmatpush.bf16.msra.mxu1 %v5276_v15  ;;  %v4960_v46 = vor.u32 %v6780_v39, %v4957_v40  ;;  %v6772_v50 = vld [vmem:[#allocation8 + $0x104] sm:$0xf] }
  0x76   : > { %v6792_v21 = vld [vmem:[#allocation8 + $0x19c] sm:$0xf0]  ;;  %v4925_v51 = vld [vmem:[#allocation8 + $0x120] sm:$0xf0] }
  0x77   : > { %v5243_v22 = vld [vmem:[#allocation8 + $0x380] sm:$0xf]  ;;  %1759 = vmatpush.bf16.msra.mxu2 %v5532_v16  ;;  %v4988_v24 = vor.u32 %v6792_v21, %v4987_v19  ;;  %1773 = vmatpush.bf16.msra.mxu3 %v4992_v33  ;;  %v4928_v58 = vor.u32 %v6772_v50, %v4925_v51  ;;  %v6764_v62 = vld [vmem:[#allocation8 + $0xc4] sm:$0xf] }
  0x78   : > { %v6856_v23 = vld [vmem:[#allocation8 + $0x39c] sm:$0xf0]  ;;  %v4893_v63 = vld [vmem:[#allocation8 + $0xe0] sm:$0xf0] }
  0x79   : > { %v5244_v25 = vor.u32 %v6856_v23, %v5243_v22  ;;  %v5499_v26 = vld [vmem:[#allocation8 + $0x580] sm:$0xf]  ;;  %1734 = vmatpush.bf16.msra.mxu0 %v4988_v24  ;;  %v4896_v6 = vor.u32 %v6764_v62, %v4893_v63  ;;  %v6756_v10 = vld [vmem:[#allocation8 + $0x84] sm:$0xf]  ;;  %v546_v62 = vld [vmem:[#allocation13 + $0x8] sm:$0xff] }
  0x7a   : > { %v6920_v27 = vld [vmem:[#allocation8 + $0x59c] sm:$0xf0]  ;;  %v4861_v11 = vld [vmem:[#allocation8 + $0xa0] sm:$0xf0] }
  0x7b   : > { %v5500_v29 = vor.u32 %v6920_v27, %v5499_v26  ;;  %v4955_v31 = vld [vmem:[#allocation8 + $0x140] sm:$0xf]  ;;  %1747 = vmatpush.bf16.msra.mxu1 %v5244_v25  ;;  %1774 = vmatpush.bf16.msra.mxu3 %v4960_v46  ;;  %v4864_v18 = vor.u32 %v6756_v10, %v4861_v11  ;;  %v6748_v22 = vld [vmem:[#allocation8 + $0x44] sm:$0xf]  ;;  %v6865_v46 = vld [vmem:[#allocation8 + $0x3e4] sm:$0xf0] }
  0x7c   : > { %v6784_v32 = vld [vmem:[#allocation8 + $0x15c] sm:$0xf0]  ;;  %v4829_v23 = vld [vmem:[#allocation8 + $0x60] sm:$0xf0] }
  0x7d   : > { %v5211_v34 = vld [vmem:[#allocation8 + $0x340] sm:$0xf]  ;;  %v4956_v37 = vor.u32 %v6784_v32, %v4955_v31  ;;  %1760 = vmatpush.bf16.msra.mxu2 %v5500_v29  ;;  %v4832_v32 = vor.u32 %v6748_v22, %v4829_v23  ;;  %v5533_v40 = vld [vmem:[#allocation8 + $0x5e0] sm:$0xf0] }
  0x7e   : > { %v6848_v35 = vld [vmem:[#allocation8 + $0x35c] sm:$0xf0]  ;;  %v5245_v50 = vld [vmem:[#allocation8 + $0x3a0] sm:$0xf0] }
  0x7f   : > { %v5467_v36 = vld [vmem:[#allocation8 + $0x540] sm:$0xf]  ;;  %v5212_v41 = vor.u32 %v6848_v35, %v5211_v34  ;;  %1735 = vmatpush.bf16.msra.mxu0 %v4956_v37  ;;  %1775 = vmatpush.bf16.msra.mxu3 %v4928_v58  ;;  %v6740_v34 = vld [vmem:[#allocation8 + $0x4] sm:$0xf]  ;;  %v5251_v58 = vld [vmem:[#allocation8 + $0x388] sm:$0xf] }
  0x80   : > { %v6912_v38 = vld [vmem:[#allocation8 + $0x55c] sm:$0xf0]  ;;  %v4797_v35 = vld [vmem:[#allocation8 + $0x20] sm:$0xf0] }
  0x81   : > { %v5468_v42 = vor.u32 %v6912_v38, %v5467_v36  ;;  %v4923_v43 = vld [vmem:[#allocation8 + $0x100] sm:$0xf]  ;;  %1748 = vmatpush.bf16.msra.mxu1 %v5212_v41  ;;  %v6860_v36 = vld [vmem:[#allocation8 + $0x3c4] sm:$0xf]  ;;  %v5027_v41 = vld [vmem:[#allocation8 + $0x1c8] sm:$0xf] }
  0x82   : > { %v6776_v44 = vld [vmem:[#allocation8 + $0x11c] sm:$0xf0]  ;;  %v5277_v37 = vld [vmem:[#allocation8 + $0x3e0] sm:$0xf0] }
  0x83   : > { %v5179_v45 = vld [vmem:[#allocation8 + $0x300] sm:$0xf]  ;;  %v4924_v52 = vor.u32 %v6776_v44, %v4923_v43  ;;  %1761 = vmatpush.bf16.msra.mxu2 %v5468_v42  ;;  %1776 = vmatpush.bf16.msra.mxu3 %v4896_v6  ;;  %v6924_v38 = vld [vmem:[#allocation8 + $0x5c4] sm:$0xf]  ;;  %v6801_v42 = vld [vmem:[#allocation8 + $0x1e4] sm:$0xf0] }
  0x84   : > { %v6840_v47 = vld [vmem:[#allocation8 + $0x31c] sm:$0xf0]  ;;  %v5536_v51 = vor.u32 %v6924_v38, %v5533_v40  ;;  %v5437_v23 = vld [vmem:[#allocation8 + $0x520] sm:$0xf0]  ;;  %v5155_v38 = vld [vmem:[#allocation8 + $0x2c8] sm:$0xf] }
  0x85   : > { %v5435_v48 = vld [vmem:[#allocation8 + $0x500] sm:$0xf]  ;;  %v5180_v53 = vor.u32 %v6840_v47, %v5179_v45  ;;  %1736 = vmatpush.bf16.msra.mxu0 %v4924_v52  ;;  %v5283_v45 = vld [vmem:[#allocation8 + $0x3c8] sm:$0xf]  ;;  %v4800_v47 = vor.u32 %v6740_v34, %v4797_v35  ;;  %v5028_v52 = vor.u32 %v6801_v42, %v5027_v41  ;;  %v5405_v35 = vld [vmem:[#allocation8 + $0x4e0] sm:$0xf0] }
  0x86   : > { %v6904_v49 = vld [vmem:[#allocation8 + $0x51c] sm:$0xf0] }
  0x87   : > { %v5436_v54 = vor.u32 %v6904_v49, %v5435_v48  ;;  %v4891_v55 = vld [vmem:[#allocation8 + $0xc0] sm:$0xf]  ;;  %1749 = vmatpush.bf16.msra.mxu1 %v5180_v53  ;;  %1777 = vmatpush.bf16.msra.mxu3 %v4864_v18  ;;  %v5280_v48 = vor.u32 %v6860_v36, %v5277_v37  ;;  %v6852_v49 = vld [vmem:[#allocation8 + $0x384] sm:$0xf]  ;;  %v4899_v36 = vld [vmem:[#allocation8 + $0xc8] sm:$0xf] }
  0x88   : > { %v6768_v56 = vld [vmem:[#allocation8 + $0xdc] sm:$0xf0]  ;;  %v6916_v53 = vld [vmem:[#allocation8 + $0x584] sm:$0xf]  ;;  %v5248_v63 = vor.u32 %v6852_v49, %v5245_v50  ;;  %v6769_v37 = vld [vmem:[#allocation8 + $0xe4] sm:$0xf0] }
  0x89   : > { %v5147_v57 = vld [vmem:[#allocation8 + $0x2c0] sm:$0xf]  ;;  %v4892_v0 = vor.u32 %v6768_v56, %v4891_v55  ;;  %1762 = vmatpush.bf16.msra.mxu2 %v5436_v54  ;;  %v5501_v54 = vld [vmem:[#allocation8 + $0x5a0] sm:$0xf0]  ;;  %v4995_v55 = vld [vmem:[#allocation8 + $0x188] sm:$0xf]  ;;  %v5284_v56 = vor.u32 %v6865_v46, %v5283_v45  ;;  %v4900_v42 = vor.u32 %v6769_v37, %v4899_v36 }
  0x8a   : > { %v6832_v59 = vld [vmem:[#allocation8 + $0x2dc] sm:$0xf0]  ;;  %v6884_v45 = vld [vmem:[#allocation8 + $0x484] sm:$0xf]  ;;  %v6761_v49 = vld [vmem:[#allocation8 + $0xa4] sm:$0xf0] }
  0x8b   : > { %v5403_v60 = vld [vmem:[#allocation8 + $0x4c0] sm:$0xf]  ;;  %v5148_v1 = vor.u32 %v6832_v59, %v5147_v57  ;;  %1737 = vmatpush.bf16.msra.mxu0 %v4892_v0  ;;  %1778 = vmatpush.bf16.msra.mxu3 %v4832_v32  ;;  %v6793_v57 = vld [vmem:[#allocation8 + $0x1a4] sm:$0xf0]  ;;  %v5149_v32 = vld [vmem:[#allocation8 + $0x2e0] sm:$0xf0] }
  0x8c   : > { %v6896_v61 = vld [vmem:[#allocation8 + $0x4dc] sm:$0xf0]  ;;  %v6857_v59 = vld [vmem:[#allocation8 + $0x3a4] sm:$0xf0]  ;;  %v5253_v36 = vld [vmem:[#allocation8 + $0x3a8] sm:$0xf0] }
  0x8d   : > { %v5404_v2 = vor.u32 %v6896_v61, %v5403_v60  ;;  %v4859_v3 = vld [vmem:[#allocation8 + $0x80] sm:$0xf]  ;;  %1750 = vmatpush.bf16.msra.mxu1 %v5148_v1  ;;  %v5504_v1 = vor.u32 %v6916_v53, %v5501_v54  ;;  %v5252_v6 = vor.u32 %v6857_v59, %v5251_v58  ;;  %v5123_v50 = vld [vmem:[#allocation8 + $0x288] sm:$0xf]  ;;  %v5341_v59 = vld [vmem:[#allocation8 + $0x460] sm:$0xf0] }
  0x8e   : > { %v6760_v4 = vld [vmem:[#allocation8 + $0x9c] sm:$0xf0]  ;;  %v6917_v37 = vld [vmem:[#allocation8 + $0x58c] sm:$0xf] }
  0x8f   : > { %v5115_v5 = vld [vmem:[#allocation8 + $0x280] sm:$0xf]  ;;  %v4860_v12 = vor.u32 %v6760_v4, %v4859_v3  ;;  %1763 = vmatpush.bf16.msra.mxu2 %v5404_v2  ;;  %1779 = vmatpush.bf16.msra.mxu3 %v4800_v47  ;;  %v4996_v2 = vor.u32 %v6793_v57, %v4995_v55  ;;  %v6844_v3 = vld [vmem:[#allocation8 + $0x344] sm:$0xf] }
  0x90   : > { %v6824_v7 = vld [vmem:[#allocation8 + $0x29c] sm:$0xf0]  ;;  %v5213_v4 = vld [vmem:[#allocation8 + $0x360] sm:$0xf0] }
  0x91   : > { %v5371_v8 = vld [vmem:[#allocation8 + $0x480] sm:$0xf]  ;;  %v5116_v13 = vor.u32 %v6824_v7, %v5115_v5  ;;  %1738 = vmatpush.bf16.msra.mxu0 %v4860_v12  ;;  %v6908_v5 = vld [vmem:[#allocation8 + $0x544] sm:$0xf]  ;;  %v5219_v12 = vld [vmem:[#allocation8 + $0x348] sm:$0xf] }
  0x92   : > { %v6888_v9 = vld [vmem:[#allocation8 + $0x49c] sm:$0xf0]  ;;  %v5469_v7 = vld [vmem:[#allocation8 + $0x560] sm:$0xf0] }
  0x93   : > { %v5372_v14 = vor.u32 %v6888_v9, %v5371_v8  ;;  %v4827_v15 = vld [vmem:[#allocation8 + $0x40] sm:$0xf]  ;;  %1751 = vmatpush.bf16.msra.mxu1 %v5116_v13  ;;  %1824 = vmatpush.bf16.msrb.mxu3 %v5284_v56  ;;  %v4963_v8 = vld [vmem:[#allocation8 + $0x148] sm:$0xf]  ;;  %v5373_v47 = vld [vmem:[#allocation8 + $0x4a0] sm:$0xf0] }
  0x94   : > { %v6752_v16 = vld [vmem:[#allocation8 + $0x5c] sm:$0xf0]  ;;  %v6785_v9 = vld [vmem:[#allocation8 + $0x164] sm:$0xf0]  ;;  %v5376_v53 = vor.u32 %v6884_v45, %v5373_v47  ;;  %v6812_v55 = vld [vmem:[#allocation8 + $0x244] sm:$0xf] }
  0x95   : > { %v5083_v17 = vld [vmem:[#allocation8 + $0x240] sm:$0xf]  ;;  %v4828_v24 = vor.u32 %v6752_v16, %v4827_v15  ;;  %1764 = vmatpush.bf16.msra.mxu2 %v5372_v14  ;;  %v6849_v13 = vld [vmem:[#allocation8 + $0x364] sm:$0xf0]  ;;  %v5216_v14 = vor.u32 %v6844_v3, %v5213_v4  ;;  %v4964_v18 = vor.u32 %v6785_v9, %v4963_v8  ;;  %v5085_v56 = vld [vmem:[#allocation8 + $0x260] sm:$0xf0] }
  0x96   : > { %v6816_v19 = vld [vmem:[#allocation8 + $0x25c] sm:$0xf0]  ;;  %v5220_v22 = vor.u32 %v6849_v13, %v5219_v12  ;;  %v6876_v57 = vld [vmem:[#allocation8 + $0x444] sm:$0xf]  ;;  %v4803_v8 = vld [vmem:[#allocation8 + $0x8] sm:$0xf] }
  0x97   : > { %v5339_v20 = vld [vmem:[#allocation8 + $0x440] sm:$0xf]  ;;  %v5084_v27 = vor.u32 %v6816_v19, %v5083_v17  ;;  %1739 = vmatpush.bf16.msra.mxu0 %v4828_v24  ;;  %v5472_v17 = vor.u32 %v6908_v5, %v5469_v7  ;;  %v6836_v19 = vld [vmem:[#allocation8 + $0x304] sm:$0xf]  ;;  %1825 = vmatpush.bf16.msrb.mxu3 %v5252_v6  ;;  %v4931_v24 = vld [vmem:[#allocation8 + $0x108] sm:$0xf]  ;;  %v5344_v4 = vor.u32 %v6876_v57, %v5341_v59 }
  0x98   : > { %v6880_v21 = vld [vmem:[#allocation8 + $0x45c] sm:$0xf0]  ;;  %v5053_v3 = vld [vmem:[#allocation8 + $0x220] sm:$0xf0]  ;;  %v6809_v12 = vld [vmem:[#allocation8 + $0x224] sm:$0xf0] }
  0x99   : > { %v4795_v25 = vld [vmem:[#allocation8] sm:$0xf]  ;;  %v5340_v28 = vor.u32 %v6880_v21, %v5339_v20  ;;  %1752 = vmatpush.bf16.msra.mxu1 %v5084_v27  ;;  %v5181_v20 = vld [vmem:[#allocation8 + $0x320] sm:$0xf0]  ;;  %v6841_v27 = vld [vmem:[#allocation8 + $0x324] sm:$0xf0] }
  0x9a   : > { %v6744_v26 = vld [vmem:[#allocation8 + $0x1c] sm:$0xf0]  ;;  %v6900_v21 = vld [vmem:[#allocation8 + $0x504] sm:$0xf]  ;;  %v5539_v13 = vld [vmem:[#allocation8 + $0x5c8] sm:$0xf] }
  0x9b   : > { %v5051_v29 = vld [vmem:[#allocation8 + $0x200] sm:$0xf]  ;;  %v4796_v39 = vor.u32 %v6744_v26, %v4795_v25  ;;  %1765 = vmatpush.bf16.msra.mxu2 %v5340_v28  ;;  %v6777_v25 = vld [vmem:[#allocation8 + $0x124] sm:$0xf0]  ;;  %v5184_v28 = vor.u32 %v6836_v19, %v5181_v20  ;;  %1826 = vmatpush.bf16.msrb.mxu3 %v5220_v22  ;;  %v6868_v6 = vld [vmem:[#allocation8 + $0x404] sm:$0xf] }
  0x9c   : > { %v6808_v30 = vld [vmem:[#allocation8 + $0x21c] sm:$0xf0]  ;;  %v5187_v26 = vld [vmem:[#allocation8 + $0x308] sm:$0xf]  ;;  %v5309_v7 = vld [vmem:[#allocation8 + $0x420] sm:$0xf0] }
  0x9d   : > { %v5307_v31 = vld [vmem:[#allocation8 + $0x400] sm:$0xf]  ;;  %v5052_v43 = vor.u32 %v6808_v30, %v5051_v29  ;;  %1740 = vmatpush.bf16.msra.mxu0 %v4796_v39  ;;  %v5440_v29 = vor.u32 %v6900_v21, %v5437_v23  ;;  %v4932_v30 = vor.u32 %v6777_v25, %v4931_v24  ;;  %v5188_v34 = vor.u32 %v6841_v27, %v5187_v26  ;;  %v6833_v39 = vld [vmem:[#allocation8 + $0x2e4] sm:$0xf0]  ;;  %v5029_v19 = vld [vmem:[#allocation8 + $0x1e8] sm:$0xf0] }
  0x9e   : > { %v6872_v33 = vld [vmem:[#allocation8 + $0x41c] sm:$0xf0]  ;;  %v5156_v46 = vor.u32 %v6833_v39, %v5155_v38  ;;  %v6861_v20 = vld [vmem:[#allocation8 + $0x3cc] sm:$0xf]  ;;  %v5312_v22 = vor.u32 %v6868_v6, %v5309_v7 }
  0x9f   : > { %v5308_v44 = vor.u32 %v6872_v33, %v5307_v31  ;;  %1753 = vmatpush.bf16.msra.mxu1 %v5052_v43  ;;  %v8085_v60 = vld [vmem:[%s8074_s6] sm:$0xf]  ;;  %v6828_v31 = vld [vmem:[#allocation8 + $0x2c4] sm:$0xf]  ;;  %1827 = vmatpush.bf16.msrb.mxu3 %v5188_v34  ;;  %v5285_v21 = vld [vmem:[#allocation8 + $0x3e8] sm:$0xf0] }
  0xa0   : > { %v545_v61 = vld [vmem:[#allocation13] sm:$0xff]  ;;  %1741 = vmatmul.bf16.vlgmr.msra.gmra.mxu0 %v8085_v60  ;;  %1780 = vmatmul.bf16.vlgmr.msra.gmra.mxu3 %v8085_v60  ;;  %v5152_v40 = vor.u32 %v6828_v31, %v5149_v32  ;;  %v6925_v24 = vld [vmem:[#allocation8 + $0x5cc] sm:$0xf]  ;;  %v6921_v31 = vld [vmem:[#allocation8 + $0x5a4] sm:$0xf0] }
  0xa1   : > { %1766 = vmatpush.bf16.msra.mxu2 %v5308_v44  ;;  %1785 = vmatpush.bf16.msrb.mxu0 %v5280_v48  ;;  %v555_v0 = vpack.c.bf16 %v546_v62, %v545_v61  ;;  %v6892_v33 = vld [vmem:[#allocation8 + $0x4c4] sm:$0xf]  ;;  %v4867_v48 = vld [vmem:[#allocation8 + $0x88] sm:$0xf]  ;;  %v5541_v25 = vld [vmem:[#allocation8 + $0x5e8] sm:$0xf0] }
  0xa2   : > { %v5408_v41 = vor.u32 %v6892_v33, %v5405_v35  ;;  %v6820_v43 = vld [vmem:[#allocation8 + $0x284] sm:$0xf]  ;;  %v4868_v54 = vor.u32 %v6761_v49, %v4867_v48  ;;  %v4835_v61 = vld [vmem:[#allocation8 + $0x48] sm:$0xf]  ;;  %v6789_v32 = vld [vmem:[#allocation8 + $0x18c] sm:$0xf]  ;;  %v5544_v33 = vor.u32 %v6925_v24, %v5541_v25 }
  0xa3   : > { %1798 = vmatpush.bf16.msrb.mxu1 %v5536_v51  ;;  %v558_v10 = vunpack.c.h.b16 %v555_v0  ;;  %v557_v11 = vunpack.c.l.b16 %v555_v0  ;;  %v5117_v44 = vld [vmem:[#allocation8 + $0x2a0] sm:$0xf0]  ;;  %v6825_v51 = vld [vmem:[#allocation8 + $0x2a4] sm:$0xf0]  ;;  %1828 = vmatpush.bf16.msrb.mxu3 %v5156_v46  ;;  %v4997_v34 = vld [vmem:[#allocation8 + $0x1a8] sm:$0xf0] }
  0xa4   : > { %v5124_v58 = vor.u32 %v6825_v51, %v5123_v50  ;;  %v6753_v62 = vld [vmem:[#allocation8 + $0x64] sm:$0xf0]  ;;  %v6853_v35 = vld [vmem:[#allocation8 + $0x38c] sm:$0xf] }
  0xa5   : > { %1811 = vmatpush.bf16.msrb.mxu2 %v5028_v52  ;;  %1786 = vmatpush.bf16.msrb.mxu0 %v5248_v63  ;;  %v8089_v15 = vpack.c.b16 %v558_v10, %v558_v10  ;;  %v8091_v16 = vpack.c.b16 %v557_v11, %v557_v11  ;;  %v5120_v52 = vor.u32 %v6820_v43, %v5117_v44  ;;  %v5091_v63 = vld [vmem:[#allocation8 + $0x248] sm:$0xf]  ;;  %v5509_v38 = vld [vmem:[#allocation8 + $0x5a8] sm:$0xf0] }
  0xa6   : > { %v6817_v0 = vld [vmem:[#allocation8 + $0x264] sm:$0xf0]  ;;  %v4836_v5 = vor.u32 %v6753_v62, %v4835_v61  ;;  %v6781_v44 = vld [vmem:[#allocation8 + $0x14c] sm:$0xf]  ;;  %v5512_v45 = vor.u32 %v6917_v37, %v5509_v38 }
  0xa7   : > { %1799 = vmatpush.bf16.msrb.mxu1 %v5504_v1  ;;  %1767 = vmatmul.bf16.vlgmr.msra.gmra.mxu2 %v8089_v15  ;;  %v5088_v1 = vor.u32 %v6812_v55, %v5085_v56  ;;  %v5092_v9 = vor.u32 %v6817_v0, %v5091_v63  ;;  %v6745_v10 = vld [vmem:[#allocation8 + $0x24] sm:$0xf0]  ;;  %v4965_v46 = vld [vmem:[#allocation8 + $0x168] sm:$0xf0] }
  0xa8   : > { %1754 = vmatmul.bf16.vlgmr.msra.gmra.mxu1 %v8091_v16  ;;  %1829 = vmatpush.bf16.msrb.mxu3 %v5124_v58  ;;  %v5059_v11 = vld [vmem:[#allocation8 + $0x208] sm:$0xf]  ;;  %v4804_v23 = vor.u32 %v6745_v10, %v4803_v8  ;;  %v6845_v47 = vld [vmem:[#allocation8 + $0x34c] sm:$0xf] }
  0xa9   : > { %1812 = vmatpush.bf16.msrb.mxu2 %v4996_v2  ;;  %1787 = vmatpush.bf16.msrb.mxu0 %v5216_v14  ;;  %v6804_v2 = vld [vmem:[#allocation8 + $0x204] sm:$0xf]  ;;  %v6929_v14 = vld [vmem:[#allocation8 + $0x5e4] sm:$0xf0]  ;;  %v5060_v26 = vor.u32 %v6809_v12, %v5059_v11  ;;  %v5221_v48 = vld [vmem:[#allocation8 + $0x368] sm:$0xf0] }
  0xaa   : > { %v5540_v27 = vor.u32 %v6929_v14, %v5539_v13  ;;  %v6913_v43 = vld [vmem:[#allocation8 + $0x564] sm:$0xf0]  ;;  %v6909_v49 = vld [vmem:[#allocation8 + $0x54c] sm:$0xf] }
  0xab   : > { %1800 = vmatpush.bf16.msrb.mxu1 %v5472_v17  ;;  %v6797_v17 = vld [vmem:[#allocation8 + $0x1cc] sm:$0xf]  ;;  %v6905_v55 = vld [vmem:[#allocation8 + $0x524] sm:$0xf0] }
  0xac   : > { %1830 = vmatpush.bf16.msrb.mxu3 %v5092_v9  ;;  %v5477_v50 = vld [vmem:[#allocation8 + $0x568] sm:$0xf0] }
  0xad   : > { %1813 = vmatpush.bf16.msrb.mxu2 %v4964_v18  ;;  %1788 = vmatpush.bf16.msrb.mxu0 %v5184_v28  ;;  %v5056_v18 = vor.u32 %v6804_v2, %v5053_v3  ;;  %v5032_v28 = vor.u32 %v6797_v17, %v5029_v19  ;;  %v6773_v56 = vld [vmem:[#allocation8 + $0x10c] sm:$0xf]  ;;  %v5480_v57 = vor.u32 %v6909_v49, %v5477_v50  ;;  %v5411_v3 = vld [vmem:[#allocation8 + $0x4c8] sm:$0xf]  ;;  %v5035_v50 = vld [vmem:[#allocation8 + $0x1d0] sm:$0xf] }
  0xae   : > { %v4933_v58 = vld [vmem:[#allocation8 + $0x128] sm:$0xf0]  ;;  %v5379_v17 = vld [vmem:[#allocation8 + $0x488] sm:$0xf] }
  0xaf   : > { %1801 = vmatpush.bf16.msrb.mxu1 %v5440_v29  ;;  %v5288_v29 = vor.u32 %v6861_v20, %v5285_v21  ;;  %v6837_v59 = vld [vmem:[#allocation8 + $0x30c] sm:$0xf] }
  0xb0   : > { %1831 = vmatpush.bf16.msrb.mxu3 %v5060_v26  ;;  %v5189_v61 = vld [vmem:[#allocation8 + $0x328] sm:$0xf0] }
  0xb1   : > { %1814 = vmatpush.bf16.msrb.mxu2 %v4932_v30  ;;  %1789 = vmatpush.bf16.msrb.mxu0 %v5152_v40  ;;  %v5507_v30 = vld [vmem:[#allocation8 + $0x588] sm:$0xf]  ;;  %v5000_v40 = vor.u32 %v6789_v32, %v4997_v34  ;;  %v6901_v62 = vld [vmem:[#allocation8 + $0x50c] sm:$0xf]  ;;  %v5192_v2 = vor.u32 %v6837_v59, %v5189_v61  ;;  %v6798_v59 = vld [vmem:[#allocation8 + $0x1d4] sm:$0xf] }
  0xb2   : > { %v5508_v39 = vor.u32 %v6921_v31, %v5507_v30  ;;  %v5445_v63 = vld [vmem:[#allocation8 + $0x528] sm:$0xf0]  ;;  %v6881_v30 = vld [vmem:[#allocation8 + $0x464] sm:$0xf0]  ;;  %v5037_v61 = vld [vmem:[#allocation8 + $0x1f0] sm:$0xf0] }
  0xb3   : > { %1802 = vmatpush.bf16.msrb.mxu1 %v5408_v41  ;;  %v5256_v41 = vor.u32 %v6853_v35, %v5253_v36  ;;  %1832 = vmatmul.bf16.vlgmr.msrb.gmra.mxu3 %v8091_v16  ;;  %v5448_v6 = vor.u32 %v6901_v62, %v5445_v63  ;;  %v4901_v7 = vld [vmem:[#allocation8 + $0xe8] sm:$0xf0] }
  0xb4   : > { %1876 = vmatpush.bf16.msra.mxu3 %v5544_v33  ;;  %v6829_v8 = vld [vmem:[#allocation8 + $0x2cc] sm:$0xf] }
  0xb5   : > { %1815 = vmatpush.bf16.msrb.mxu2 %v4900_v42  ;;  %1790 = vmatpush.bf16.msrb.mxu0 %v5120_v52  ;;  %v5475_v42 = vld [vmem:[#allocation8 + $0x548] sm:$0xf]  ;;  %v4968_v52 = vor.u32 %v6781_v44, %v4965_v46  ;;  %v5157_v9 = vld [vmem:[#allocation8 + $0x2e8] sm:$0xf0] }
  0xb6   : > { %v5476_v51 = vor.u32 %v6913_v43, %v5475_v42  ;;  %v6893_v10 = vld [vmem:[#allocation8 + $0x4cc] sm:$0xf]  ;;  %v5160_v14 = vor.u32 %v6829_v8, %v5157_v9  ;;  %v6922_v8 = vld [vmem:[#allocation8 + $0x5ac] sm:$0xf0]  ;;  %v6790_v9 = vld [vmem:[#allocation8 + $0x194] sm:$0xf] }
  0xb7   : > { %1803 = vmatpush.bf16.msrb.mxu1 %v5376_v53  ;;  %v5224_v53 = vor.u32 %v6845_v47, %v5221_v48  ;;  %v5413_v11 = vld [vmem:[#allocation8 + $0x4e8] sm:$0xf0] }
  0xb8   : > { %1877 = vmatpush.bf16.msra.mxu3 %v5512_v45  ;;  %v6757_v19 = vld [vmem:[#allocation8 + $0x8c] sm:$0xf]  ;;  %v5416_v20 = vor.u32 %v6893_v10, %v5413_v11  ;;  %v5005_v10 = vld [vmem:[#allocation8 + $0x1b0] sm:$0xf0] }
  0xb9   : > { %1816 = vmatpush.bf16.msrb.mxu2 %v4868_v54  ;;  %1791 = vmatpush.bf16.msrb.mxu0 %v5088_v1  ;;  %v5443_v54 = vld [vmem:[#allocation8 + $0x508] sm:$0xf]  ;;  %v4936_v1 = vor.u32 %v6773_v56, %v4933_v58  ;;  %v4869_v21 = vld [vmem:[#allocation8 + $0xa8] sm:$0xf0]  ;;  %v6930_v56 = vld [vmem:[#allocation8 + $0x5ec] sm:$0xf0] }
  0xba   : > { %v5444_v0 = vor.u32 %v6905_v55, %v5443_v54  ;;  %v6885_v24 = vld [vmem:[#allocation8 + $0x48c] sm:$0xf]  ;;  %v6866_v54 = vld [vmem:[#allocation8 + $0x3ec] sm:$0xf0] }
  0xbb   : > { %1804 = vmatpush.bf16.msrb.mxu1 %v5344_v4  ;;  %v6897_v4 = vld [vmem:[#allocation8 + $0x4e4] sm:$0xf0]  ;;  %v5381_v25 = vld [vmem:[#allocation8 + $0x4a8] sm:$0xf0]  ;;  %v5547_v55 = vld [vmem:[#allocation8 + $0x5d0] sm:$0xf] }
  0xbc   : > { %1878 = vmatpush.bf16.msra.mxu3 %v5480_v57  ;;  %v5412_v12 = vor.u32 %v6897_v4, %v5411_v3  ;;  %v6749_v31 = vld [vmem:[#allocation8 + $0x4c] sm:$0xf]  ;;  %v5384_v32 = vor.u32 %v6885_v24, %v5381_v25  ;;  %v6794_v3 = vld [vmem:[#allocation8 + $0x1ac] sm:$0xf0]  ;;  %v4973_v24 = vld [vmem:[#allocation8 + $0x170] sm:$0xf0] }
  0xbd   : > { %1817 = vmatpush.bf16.msrb.mxu2 %v4836_v5  ;;  %1792 = vmatpush.bf16.msrb.mxu0 %v5056_v18  ;;  %v6765_v5 = vld [vmem:[#allocation8 + $0xcc] sm:$0xf]  ;;  %v6889_v18 = vld [vmem:[#allocation8 + $0x4a4] sm:$0xf0]  ;;  %v5259_v4 = vld [vmem:[#allocation8 + $0x390] sm:$0xf] }
  0xbe   : > { %v4904_v13 = vor.u32 %v6765_v5, %v4901_v7  ;;  %v5380_v26 = vor.u32 %v6889_v18, %v5379_v17  ;;  %v4837_v33 = vld [vmem:[#allocation8 + $0x68] sm:$0xf0]  ;;  %v5040_v5 = vor.u32 %v6798_v59, %v5037_v61  ;;  %v5515_v7 = vld [vmem:[#allocation8 + $0x590] sm:$0xf]  ;;  %v6758_v59 = vld [vmem:[#allocation8 + $0x94] sm:$0xf] }
  0xbf   : > { %1805 = vmatpush.bf16.msrb.mxu1 %v5312_v22  ;;  %v6821_v22 = vld [vmem:[#allocation8 + $0x28c] sm:$0xf]  ;;  %v6786_v17 = vld [vmem:[#allocation8 + $0x16c] sm:$0xf0]  ;;  %v4877_v61 = vld [vmem:[#allocation8 + $0xb0] sm:$0xf0] }
  0xc0   : > { %1793 = vmatmul.bf16.vlgmr.msrb.gmra.mxu0 %v8091_v16  ;;  %1879 = vmatpush.bf16.msra.mxu3 %v5448_v6  ;;  %v6813_v34 = vld [vmem:[#allocation8 + $0x24c] sm:$0xf]  ;;  %v6858_v6 = vld [vmem:[#allocation8 + $0x3ac] sm:$0xf0] }
  0xc1   : > { %1818 = vmatpush.bf16.msrb.mxu2 %v4804_v23  ;;  %1837 = vmatpush.bf16.msra.mxu0 %v5540_v27  ;;  %v5125_v23 = vld [vmem:[#allocation8 + $0x2a8] sm:$0xf0]  ;;  %v4872_v27 = vor.u32 %v6757_v19, %v4869_v21  ;;  %v5227_v18 = vld [vmem:[#allocation8 + $0x350] sm:$0xf]  ;;  %v5008_v19 = vor.u32 %v6790_v9, %v5005_v10  ;;  %v4845_v9 = vld [vmem:[#allocation8 + $0x70] sm:$0xf0] }
  0xc2   : > { %1806 = vmatmul.bf16.vlgmr.msrb.gmra.mxu1 %v8089_v15  ;;  %v5093_v35 = vld [vmem:[#allocation8 + $0x268] sm:$0xf0]  ;;  %v5483_v21 = vld [vmem:[#allocation8 + $0x550] sm:$0xf] }
  0xc3   : > { %1850 = vmatpush.bf16.msra.mxu1 %v5032_v28  ;;  %v5128_v28 = vor.u32 %v6821_v22, %v5125_v23  ;;  %v6877_v36 = vld [vmem:[#allocation8 + $0x44c] sm:$0xf]  ;;  %v5096_v42 = vor.u32 %v6813_v34, %v5093_v35  ;;  %v6914_v22 = vld [vmem:[#allocation8 + $0x56c] sm:$0xf0]  ;;  %v6782_v23 = vld [vmem:[#allocation8 + $0x154] sm:$0xf] }
  0xc4   : > { %1819 = vmatmul.bf16.vlgmr.msrb.gmra.mxu2 %v8085_v60  ;;  %1880 = vmatpush.bf16.msra.mxu3 %v5416_v20  ;;  %v5349_v37 = vld [vmem:[#allocation8 + $0x468] sm:$0xf0]  ;;  %v6850_v20 = vld [vmem:[#allocation8 + $0x36c] sm:$0xf0]  ;;  %v6774_v35 = vld [vmem:[#allocation8 + $0x114] sm:$0xf] }
  0xc5   : > { %1863 = vmatpush.bf16.msra.mxu2 %v5288_v29  ;;  %1838 = vmatpush.bf16.msra.mxu0 %v5508_v39  ;;  %v5347_v29 = vld [vmem:[#allocation8 + $0x448] sm:$0xf]  ;;  %v6741_v43 = vld [vmem:[#allocation8 + $0xc] sm:$0xf]  ;;  %v5352_v46 = vor.u32 %v6877_v36, %v5349_v37  ;;  %v6906_v34 = vld [vmem:[#allocation8 + $0x52c] sm:$0xf0] }
  0xc6   : > { %v5348_v38 = vor.u32 %v6881_v30, %v5347_v29  ;;  %v5315_v39 = vld [vmem:[#allocation8 + $0x408] sm:$0xf]  ;;  %v4805_v44 = vld [vmem:[#allocation8 + $0x28] sm:$0xf0]  ;;  %v6778_v29 = vld [vmem:[#allocation8 + $0x12c] sm:$0xf0] }
  0xc7   : > { %1851 = vmatpush.bf16.msra.mxu1 %v5000_v40  ;;  %v6873_v40 = vld [vmem:[#allocation8 + $0x424] sm:$0xf0]  ;;  %v6805_v45 = vld [vmem:[#allocation8 + $0x20c] sm:$0xf]  ;;  %v4808_v57 = vor.u32 %v6741_v43, %v4805_v44  ;;  %v5195_v30 = vld [vmem:[#allocation8 + $0x310] sm:$0xf] }
  0xc8   : > { %1881 = vmatpush.bf16.msra.mxu3 %v5384_v32  ;;  %v5061_v47 = vld [vmem:[#allocation8 + $0x228] sm:$0xf0]  ;;  %v6842_v32 = vld [vmem:[#allocation8 + $0x32c] sm:$0xf0]  ;;  %v4941_v36 = vld [vmem:[#allocation8 + $0x130] sm:$0xf0] }
  0xc9   : > { %1864 = vmatpush.bf16.msra.mxu2 %v5256_v41  ;;  %1839 = vmatpush.bf16.msra.mxu0 %v5476_v51  ;;  %v4840_v41 = vor.u32 %v6749_v31, %v4837_v33  ;;  %v6869_v48 = vld [vmem:[#allocation8 + $0x40c] sm:$0xf]  ;;  %v6802_v51 = vld [vmem:[#allocation8 + $0x1ec] sm:$0xf0]  ;;  %v5064_v58 = vor.u32 %v6805_v45, %v5061_v47  ;;  %v4976_v31 = vor.u32 %v6782_v23, %v4973_v24  ;;  %v6766_v47 = vld [vmem:[#allocation8 + $0xd4] sm:$0xf] }
  0xca   : > { %v5317_v49 = vld [vmem:[#allocation8 + $0x428] sm:$0xf0]  ;;  %v5036_v63 = vor.u32 %v6802_v51, %v5035_v50  ;;  %v5451_v33 = vld [vmem:[#allocation8 + $0x510] sm:$0xf]  ;;  %v4944_v43 = vor.u32 %v6774_v35, %v4941_v36  ;;  %v4813_v23 = vld [vmem:[#allocation8 + $0x30] sm:$0xf0] }
  0xcb   : > { %1852 = vmatpush.bf16.msra.mxu1 %v4968_v52  ;;  %v5291_v52 = vld [vmem:[#allocation8 + $0x3d0] sm:$0xf]  ;;  %v5320_v62 = vor.u32 %v6869_v48, %v5317_v49  ;;  %v4909_v48 = vld [vmem:[#allocation8 + $0xf0] sm:$0xf0] }
  0xcc   : > { %1882 = vmatpush.bf16.msra.mxu3 %v5352_v46  ;;  %v6834_v44 = vld [vmem:[#allocation8 + $0x2ec] sm:$0xf0]  ;;  %v6862_v24 = vld [vmem:[#allocation8 + $0x3d4] sm:$0xf] }
  0xcd   : > { %1865 = vmatpush.bf16.msra.mxu2 %v5224_v53  ;;  %1840 = vmatpush.bf16.msra.mxu0 %v5444_v0  ;;  %v5316_v53 = vor.u32 %v6873_v40, %v5315_v39  ;;  %v5292_v0 = vor.u32 %v6866_v54, %v5291_v52  ;;  %v5452_v39 = vor.u32 %v6906_v34, %v5451_v33  ;;  %v4907_v40 = vld [vmem:[#allocation8 + $0xd0] sm:$0xf]  ;;  %v5299_v33 = vld [vmem:[#allocation8 + $0x3d8] sm:$0xf] }
  0xce   : > { %v5419_v45 = vld [vmem:[#allocation8 + $0x4d0] sm:$0xf]  ;;  %v6867_v34 = vld [vmem:[#allocation8 + $0x3f4] sm:$0xf0] }
  0xcf   : > { %1853 = vmatpush.bf16.msra.mxu1 %v4936_v1  ;;  %v5548_v1 = vor.u32 %v6930_v56, %v5547_v55  ;;  %v6898_v46 = vld [vmem:[#allocation8 + $0x4ec] sm:$0xf0]  ;;  %v4912_v55 = vor.u32 %v6766_v47, %v4909_v48  ;;  %v6859_v47 = vld [vmem:[#allocation8 + $0x3b4] sm:$0xf0] }
  0xd0   : > { %1883 = vmatpush.bf16.msra.mxu3 %v5320_v62  ;;  %v5420_v51 = vor.u32 %v6898_v46, %v5419_v45  ;;  %v4875_v52 = vld [vmem:[#allocation8 + $0x90] sm:$0xf]  ;;  %v6795_v45 = vld [vmem:[#allocation8 + $0x1b4] sm:$0xf0] }
  0xd1   : > { %1866 = vmatpush.bf16.msra.mxu2 %v5192_v2  ;;  %1841 = vmatpush.bf16.msra.mxu0 %v5412_v12  ;;  %v5003_v2 = vld [vmem:[#allocation8 + $0x190] sm:$0xf]  ;;  %v5260_v12 = vor.u32 %v6858_v6, %v5259_v4  ;;  %v4880_v4 = vor.u32 %v6758_v59, %v4877_v61  ;;  %v5267_v46 = vld [vmem:[#allocation8 + $0x398] sm:$0xf] }
  0xd2   : > { %v5004_v11 = vor.u32 %v6794_v3, %v5003_v2  ;;  %v5131_v54 = vld [vmem:[#allocation8 + $0x290] sm:$0xf]  ;;  %v6851_v59 = vld [vmem:[#allocation8 + $0x374] sm:$0xf0] }
  0xd3   : > { %1854 = vmatpush.bf16.msra.mxu1 %v4904_v13  ;;  %v5516_v13 = vor.u32 %v6922_v8, %v5515_v7  ;;  %1884 = vmatmul.bf16.vlgmr.msra.gmra.mxu3 %v8089_v15  ;;  %v6826_v56 = vld [vmem:[#allocation8 + $0x2ac] sm:$0xf0]  ;;  %v6750_v8 = vld [vmem:[#allocation8 + $0x54] sm:$0xf] }
  0xd4   : > { %1928 = vmatpush.bf16.msrb.mxu3 %v5040_v5  ;;  %v6754_v2 = vld [vmem:[#allocation8 + $0x6c] sm:$0xf0] }
  0xd5   : > { %1867 = vmatpush.bf16.msra.mxu2 %v5160_v14  ;;  %1842 = vmatpush.bf16.msra.mxu0 %v5380_v26  ;;  %v4971_v14 = vld [vmem:[#allocation8 + $0x150] sm:$0xf]  ;;  %v5228_v26 = vor.u32 %v6850_v20, %v5227_v18  ;;  %v4848_v20 = vor.u32 %v6750_v8, %v4845_v9  ;;  %v6843_v8 = vld [vmem:[#allocation8 + $0x334] sm:$0xf0] }
  0xd6   : > { %v4972_v25 = vor.u32 %v6786_v17, %v4971_v14  ;;  %v5099_v3 = vld [vmem:[#allocation8 + $0x250] sm:$0xf] }
  0xd7   : > { %1855 = vmatpush.bf16.msra.mxu1 %v4872_v27  ;;  %v5484_v27 = vor.u32 %v6914_v22, %v5483_v21  ;;  %v6818_v5 = vld [vmem:[#allocation8 + $0x26c] sm:$0xf0]  ;;  %v6742_v22 = vld [vmem:[#allocation8 + $0x14] sm:$0xf] }
  0xd8   : > { %1929 = vmatpush.bf16.msrb.mxu3 %v5008_v19  ;;  %v5355_v6 = vld [vmem:[#allocation8 + $0x450] sm:$0xf]  ;;  %v4816_v35 = vor.u32 %v6742_v22, %v4813_v23 }
  0xd9   : > { %1868 = vmatpush.bf16.msra.mxu2 %v5128_v28  ;;  %1843 = vmatpush.bf16.msra.mxu0 %v5348_v38  ;;  %v4939_v28 = vld [vmem:[#allocation8 + $0x110] sm:$0xf]  ;;  %v5196_v38 = vor.u32 %v6842_v32, %v5195_v30  ;;  %v6803_v30 = vld [vmem:[#allocation8 + $0x1f4] sm:$0xf0] }
  0xda   : > { %v4940_v37 = vor.u32 %v6778_v29, %v4939_v28  ;;  %v6882_v7 = vld [vmem:[#allocation8 + $0x46c] sm:$0xf0]  ;;  %v5549_v28 = vld [vmem:[#allocation8 + $0x5f0] sm:$0xf0]  ;;  %v5043_v29 = vld [vmem:[#allocation8 + $0x1d8] sm:$0xf] }
  0xdb   : > { %1856 = vmatpush.bf16.msra.mxu1 %v4840_v41  ;;  %v6770_v41 = vld [vmem:[#allocation8 + $0xec] sm:$0xf0]  ;;  %v5356_v14 = vor.u32 %v6882_v7, %v5355_v6  ;;  %v6779_v6 = vld [vmem:[#allocation8 + $0x134] sm:$0xf0] }
  0xdc   : > { %1930 = vmatpush.bf16.msrb.mxu3 %v4976_v31  ;;  %v4908_v49 = vor.u32 %v6770_v41, %v4907_v40  ;;  %v5067_v17 = vld [vmem:[#allocation8 + $0x210] sm:$0xf]  ;;  %v5261_v40 = vld [vmem:[#allocation8 + $0x3b0] sm:$0xf0]  ;;  %v5203_v7 = vld [vmem:[#allocation8 + $0x318] sm:$0xf] }
  0xdd   : > { %1869 = vmatpush.bf16.msra.mxu2 %v5096_v42  ;;  %1844 = vmatpush.bf16.msra.mxu0 %v5316_v53  ;;  %v5163_v42 = vld [vmem:[#allocation8 + $0x2d0] sm:$0xf]  ;;  %v6918_v41 = vld [vmem:[#allocation8 + $0x594] sm:$0xf] }
  0xde   : > { %v5164_v50 = vor.u32 %v6834_v44, %v5163_v42  ;;  %v6762_v53 = vld [vmem:[#allocation8 + $0xac] sm:$0xf0]  ;;  %v5300_v42 = vor.u32 %v6867_v34, %v5299_v33  ;;  %v5011_v44 = vld [vmem:[#allocation8 + $0x198] sm:$0xf] }
  0xdf   : > { %1857 = vmatpush.bf16.msra.mxu1 %v4808_v57  ;;  %v5387_v57 = vld [vmem:[#allocation8 + $0x490] sm:$0xf]  ;;  %v4876_v62 = vor.u32 %v6762_v53, %v4875_v52  ;;  %v5229_v52 = vld [vmem:[#allocation8 + $0x370] sm:$0xf0]  ;;  %v6827_v33 = vld [vmem:[#allocation8 + $0x2b4] sm:$0xf0] }
  0xe0   : > { %1845 = vmatmul.bf16.vlgmr.msra.gmra.mxu0 %v8089_v15  ;;  %1931 = vmatpush.bf16.msrb.mxu3 %v4944_v43  ;;  %v6810_v18 = vld [vmem:[#allocation8 + $0x22c] sm:$0xf0]  ;;  %v5517_v43 = vld [vmem:[#allocation8 + $0x5b0] sm:$0xf0] }
  0xe1   : > { %1870 = vmatpush.bf16.msra.mxu2 %v5064_v58  ;;  %1889 = vmatpush.bf16.msrb.mxu0 %v5036_v63  ;;  %v6890_v58 = vld [vmem:[#allocation8 + $0x4ac] sm:$0xf0]  ;;  %v5132_v63 = vor.u32 %v6826_v56, %v5131_v54  ;;  %v5068_v31 = vor.u32 %v6810_v18, %v5067_v17  ;;  %v6910_v53 = vld [vmem:[#allocation8 + $0x554] sm:$0xf]  ;;  %v5268_v54 = vor.u32 %v6859_v47, %v5267_v46  ;;  %v4979_v56 = vld [vmem:[#allocation8 + $0x158] sm:$0xf] }
  0xe2   : > { %1858 = vmatmul.bf16.vlgmr.msra.gmra.mxu1 %v8085_v60  ;;  %v5323_v19 = vld [vmem:[#allocation8 + $0x410] sm:$0xf]  ;;  %v5421_v17 = vld [vmem:[#allocation8 + $0x4f0] sm:$0xf0]  ;;  %v4915_v18 = vld [vmem:[#allocation8 + $0xd8] sm:$0xf] }
  0xe3   : > { %1902 = vmatpush.bf16.msrb.mxu1 %v5292_v0  ;;  %v5388_v0 = vor.u32 %v6890_v58, %v5387_v57  ;;  %v6874_v21 = vld [vmem:[#allocation8 + $0x42c] sm:$0xf0]  ;;  %v6787_v57 = vld [vmem:[#allocation8 + $0x174] sm:$0xf0]  ;;  %v6806_v47 = vld [vmem:[#allocation8 + $0x214] sm:$0xf] }
  0xe4   : > { %1871 = vmatmul.bf16.vlgmr.msra.gmra.mxu2 %v8091_v16  ;;  %1932 = vmatpush.bf16.msrb.mxu3 %v4912_v55  ;;  %v5324_v32 = vor.u32 %v6874_v21, %v5323_v19  ;;  %v5485_v55 = vld [vmem:[#allocation8 + $0x570] sm:$0xf0]  ;;  %v5235_v58 = vld [vmem:[#allocation8 + $0x358] sm:$0xf] }
  0xe5   : > { %1915 = vmatpush.bf16.msrb.mxu2 %v5548_v1  ;;  %1890 = vmatpush.bf16.msrb.mxu0 %v5004_v11  ;;  %v4843_v1 = vld [vmem:[#allocation8 + $0x50] sm:$0xf]  ;;  %v6771_v19 = vld [vmem:[#allocation8 + $0xf4] sm:$0xf0] }
  0xe6   : > { %v4844_v10 = vor.u32 %v6754_v2, %v4843_v1  ;;  %v4811_v11 = vld [vmem:[#allocation8 + $0x10] sm:$0xf]  ;;  %v5197_v1 = vld [vmem:[#allocation8 + $0x330] sm:$0xf0]  ;;  %v6835_v21 = vld [vmem:[#allocation8 + $0x2f4] sm:$0xf0] }
  0xe7   : > { %1903 = vmatpush.bf16.msrb.mxu1 %v5260_v12  ;;  %v6746_v12 = vld [vmem:[#allocation8 + $0x2c] sm:$0xf0]  ;;  %v6902_v2 = vld [vmem:[#allocation8 + $0x514] sm:$0xf] }
  0xe8   : > { %1933 = vmatpush.bf16.msrb.mxu3 %v4880_v4  ;;  %v5453_v4 = vld [vmem:[#allocation8 + $0x530] sm:$0xf0] }
  0xe9   : > { %1916 = vmatpush.bf16.msrb.mxu2 %v5516_v13  ;;  %1891 = vmatpush.bf16.msrb.mxu0 %v4972_v25  ;;  %v5100_v13 = vor.u32 %v6818_v5, %v5099_v3  ;;  %v5293_v25 = vld [vmem:[#allocation8 + $0x3f0] sm:$0xf0]  ;;  %v5236_v3 = vor.u32 %v6851_v59, %v5235_v58  ;;  %v4947_v5 = vld [vmem:[#allocation8 + $0x118] sm:$0xf] }
  0xea   : > { %v5296_v36 = vor.u32 %v6862_v24, %v5293_v25  ;;  %v4916_v24 = vor.u32 %v6771_v19, %v4915_v18  ;;  %v6822_v25 = vld [vmem:[#allocation8 + $0x294] sm:$0xf]  ;;  %v5555_v58 = vld [vmem:[#allocation8 + $0x5d8] sm:$0xf]  ;;  %v6919_v18 = vld [vmem:[#allocation8 + $0x59c] sm:$0xf] }
  0xeb   : > { %1904 = vmatpush.bf16.msrb.mxu1 %v5228_v26  ;;  %v6926_v26 = vld [vmem:[#allocation8 + $0x5d4] sm:$0xf]  ;;  %v6931_v59 = vld [vmem:[#allocation8 + $0x5f4] sm:$0xf0]  ;;  %v5525_v19 = vld [vmem:[#allocation8 + $0x5b8] sm:$0xf0] }
  0xec   : > { %1934 = vmatpush.bf16.msrb.mxu3 %v4848_v20  ;;  %v5171_v20 = vld [vmem:[#allocation8 + $0x2d8] sm:$0xf] }
  0xed   : > { %1917 = vmatpush.bf16.msrb.mxu2 %v5484_v27  ;;  %1892 = vmatpush.bf16.msrb.mxu0 %v4940_v37  ;;  %v4812_v27 = vor.u32 %v6746_v12, %v4811_v11  ;;  %v5552_v37 = vor.u32 %v6926_v26, %v5549_v28  ;;  %v6830_v11 = vld [vmem:[#allocation8 + $0x2d4] sm:$0xf]  ;;  %v5172_v28 = vor.u32 %v6835_v21, %v5171_v20  ;;  %v5491_v21 = vld [vmem:[#allocation8 + $0x558] sm:$0xf] }
  0xee   : > { %v5165_v12 = vld [vmem:[#allocation8 + $0x2f0] sm:$0xf0] }
  0xef   : > { %1905 = vmatpush.bf16.msrb.mxu1 %v5196_v38  ;;  %v5044_v38 = vor.u32 %v6803_v30, %v5043_v29  ;;  %v5168_v22 = vor.u32 %v6830_v11, %v5165_v12  ;;  %v5133_v26 = vld [vmem:[#allocation8 + $0x2b0] sm:$0xf0]  ;;  %v4883_v30 = vld [vmem:[#allocation8 + $0x98] sm:$0xf]  ;;  %v6791_v11 = vld [vmem:[#allocation8 + $0x19c] sm:$0xf] }
  0xf0   : > { %1935 = vmatpush.bf16.msrb.mxu3 %v4816_v35  ;;  %v5389_v29 = vld [vmem:[#allocation8 + $0x4b0] sm:$0xf0]  ;;  %v5136_v34 = vor.u32 %v6822_v25, %v5133_v26  ;;  %v6783_v25 = vld [vmem:[#allocation8 + $0x15c] sm:$0xf] }
  0xf1   : > { %1918 = vmatpush.bf16.msrb.mxu2 %v5452_v39  ;;  %1893 = vmatpush.bf16.msrb.mxu0 %v4908_v49  ;;  %v6854_v39 = vld [vmem:[#allocation8 + $0x394] sm:$0xf]  ;;  %v5520_v49 = vor.u32 %v6918_v41, %v5517_v43  ;;  %v6755_v43 = vld [vmem:[#allocation8 + $0x74] sm:$0xf0]  ;;  %v4981_v26 = vld [vmem:[#allocation8 + $0x178] sm:$0xf0] }
  0xf2   : > { %v5264_v48 = vor.u32 %v6854_v39, %v5261_v40  ;;  %v6878_v39 = vld [vmem:[#allocation8 + $0x454] sm:$0xf] }
  0xf3   : > { %1906 = vmatpush.bf16.msrb.mxu1 %v5164_v50  ;;  %v5012_v50 = vor.u32 %v6795_v45, %v5011_v44  ;;  %1936 = vmatmul.bf16.vlgmr.msrb.gmra.mxu3 %v8085_v60  ;;  %v5357_v41 = vld [vmem:[#allocation8 + $0x470] sm:$0xf0]  ;;  %v5107_v44 = vld [vmem:[#allocation8 + $0x258] sm:$0xf] }
  0xf4   : > { %1980 = vmatpush.bf16.msra.mxu3 %v5300_v42  ;;  %v4851_v42 = vld [vmem:[#allocation8 + $0x58] sm:$0xf] }
  0xf5   : > { %1919 = vmatpush.bf16.msrb.mxu2 %v5420_v51  ;;  %1894 = vmatpush.bf16.msrb.mxu0 %v4876_v62  ;;  %v6846_v51 = vld [vmem:[#allocation8 + $0x354] sm:$0xf]  ;;  %v5488_v62 = vor.u32 %v6910_v53, %v5485_v55  ;;  %v6819_v45 = vld [vmem:[#allocation8 + $0x274] sm:$0xf0] }
  0xf6   : > { %v5232_v61 = vor.u32 %v6846_v51, %v5229_v52  ;;  %v6870_v51 = vld [vmem:[#allocation8 + $0x414] sm:$0xf]  ;;  %v4819_v53 = vld [vmem:[#allocation8 + $0x18] sm:$0xf] }
  0xf7   : > { %1907 = vmatpush.bf16.msrb.mxu1 %v5132_v63  ;;  %v4980_v63 = vor.u32 %v6787_v57, %v4979_v56  ;;  %v5325_v52 = vld [vmem:[#allocation8 + $0x430] sm:$0xf0]  ;;  %v6747_v55 = vld [vmem:[#allocation8 + $0x34] sm:$0xf0] }
  0xf8   : > { %1981 = vmatpush.bf16.msra.mxu3 %v5268_v54  ;;  %v5108_v54 = vor.u32 %v6819_v45, %v5107_v44  ;;  %v5075_v56 = vld [vmem:[#allocation8 + $0x218] sm:$0xf]  ;;  %v5205_v44 = vld [vmem:[#allocation8 + $0x338] sm:$0xf0] }
  0xf9   : > { %1920 = vmatpush.bf16.msrb.mxu2 %v5388_v0  ;;  %1895 = vmatpush.bf16.msrb.mxu0 %v4844_v10  ;;  %v6838_v0 = vld [vmem:[#allocation8 + $0x314] sm:$0xf]  ;;  %v5456_v10 = vor.u32 %v6902_v2, %v5453_v4  ;;  %v6811_v57 = vld [vmem:[#allocation8 + $0x234] sm:$0xf0]  ;;  %v5328_v2 = vor.u32 %v6870_v51, %v5325_v52  ;;  %v6927_v4 = vld [vmem:[#allocation8 + $0x5dc] sm:$0xf] }
  0xfa   : > { %v5200_v9 = vor.u32 %v6838_v0, %v5197_v1  ;;  %v6863_v0 = vld [vmem:[#allocation8 + $0x3dc] sm:$0xf]  ;;  %v5427_v51 = vld [vmem:[#allocation8 + $0x4d8] sm:$0xf] }
  0xfb   : > { %1908 = vmatpush.bf16.msrb.mxu1 %v5100_v13  ;;  %v6894_v13 = vld [vmem:[#allocation8 + $0x4d4] sm:$0xf]  ;;  %v5301_v1 = vld [vmem:[#allocation8 + $0x3f8] sm:$0xf0]  ;;  %v6899_v52 = vld [vmem:[#allocation8 + $0x4f4] sm:$0xf0] }
  0xfc   : > { %1982 = vmatpush.bf16.msra.mxu3 %v5236_v3  ;;  %v5424_v23 = vor.u32 %v6894_v13, %v5421_v17  ;;  %v4820_v3 = vor.u32 %v6747_v55, %v4819_v53  ;;  %v5013_v13 = vld [vmem:[#allocation8 + $0x1b8] sm:$0xf0] }
  0xfd   : > { %1921 = vmatpush.bf16.msrb.mxu2 %v5356_v14  ;;  %1896 = vmatpush.bf16.msrb.mxu0 %v4812_v27  ;;  %v5204_v14 = vor.u32 %v6843_v8, %v5203_v7  ;;  %v6886_v27 = vld [vmem:[#allocation8 + $0x494] sm:$0xf]  ;;  %v5556_v7 = vor.u32 %v6931_v59, %v5555_v58  ;;  %v5269_v17 = vld [vmem:[#allocation8 + $0x3b8] sm:$0xf0] }
  0xfe   : > { %v5392_v35 = vor.u32 %v6886_v27, %v5389_v29  ;;  %v5528_v27 = vor.u32 %v6919_v18, %v5525_v19  ;;  %v5237_v29 = vld [vmem:[#allocation8 + $0x378] sm:$0xf0]  ;;  %v5363_v18 = vld [vmem:[#allocation8 + $0x458] sm:$0xf] }
  0xff   : > { %1909 = vmatpush.bf16.msrb.mxu1 %v5068_v31  ;;  %v6763_v31 = vld [vmem:[#allocation8 + $0xb4] sm:$0xf0]  ;;  %v6903_v45 = vld [vmem:[#allocation8 + $0x51c] sm:$0xf] }
 0x100   : > { %1897 = vmatmul.bf16.vlgmr.msrb.gmra.mxu0 %v8085_v60  ;;  %v4948_v60 = vor.u32 %v6779_v6, %v4947_v5  ;;  %1983 = vmatpush.bf16.msra.mxu3 %v5204_v14  ;;  %v5557_v5 = vld [vmem:[#allocation8 + $0x5f8] sm:$0xf0]  ;;  %v5076_v6 = vor.u32 %v6811_v57, %v5075_v56  ;;  %v6883_v19 = vld [vmem:[#allocation8 + $0x474] sm:$0xf0] }
 0x101   : > { %1922 = vmatpush.bf16.msrb.mxu2 %v5324_v32  ;;  %1941 = vmatpush.bf16.msra.mxu0 %v5296_v36  ;;  %v5139_v32 = vld [vmem:[#allocation8 + $0x298] sm:$0xf]  ;;  %v4884_v36 = vor.u32 %v6763_v31, %v4883_v30  ;;  %v5560_v12 = vor.u32 %v6927_v4, %v5557_v5  ;;  %v6855_v14 = vld [vmem:[#allocation8 + $0x39c] sm:$0xf]  ;;  %v8111_v30 = vld [vmem:[%s8553_s9] sm:$0xff] }
 0x102   : > { %1910 = vmatmul.bf16.vlgmr.msrb.gmra.mxu1 %v8091_v16  ;;  %v5140_v40 = vor.u32 %v6827_v33, %v5139_v32  ;;  %v8115_v31 = vld [vmem:[%s8074_s6] sm:$0xf]  ;;  %v6911_v32 = vld [vmem:[#allocation8 + $0x55c] sm:$0xf] }
 0x103   : > { %1954 = vmatpush.bf16.msra.mxu1 %v5552_v37  ;;  %v6814_v37 = vld [vmem:[#allocation8 + $0x254] sm:$0xf]  ;;  %v5493_v33 = vld [vmem:[#allocation8 + $0x578] sm:$0xf0] }
 0x104   : > { %1923 = vmatmul.bf16.vlgmr.msrb.gmra.mxu2 %v8089_v15  ;;  %1984 = vmatpush.bf16.msra.mxu3 %v5172_v28  ;;  %v6847_v28 = vld [vmem:[#allocation8 + $0x35c] sm:$0xf] }
 0x105   : > { %1967 = vmatpush.bf16.msra.mxu2 %v5044_v38  ;;  %1942 = vmatpush.bf16.msra.mxu0 %v5264_v48  ;;  %v5101_v38 = vld [vmem:[#allocation8 + $0x270] sm:$0xf0]  ;;  %v6767_v53 = vld [vmem:[#allocation8 + $0xdc] sm:$0xf] }
 0x106   : > { %v5104_v46 = vor.u32 %v6814_v37, %v5101_v38  ;;  %v5069_v48 = vld [vmem:[#allocation8 + $0x230] sm:$0xf0]  ;;  %v5240_v37 = vor.u32 %v6847_v28, %v5237_v29  ;;  %v6907_v38 = vld [vmem:[#allocation8 + $0x534] sm:$0xf0]  ;;  %v4917_v56 = vld [vmem:[#allocation8 + $0xf8] sm:$0xf0]  ;;  %v5364_v29 = vor.u32 %v6883_v19, %v5363_v18 }
 0x107   : > { %1955 = vmatpush.bf16.msra.mxu1 %v5520_v49  ;;  %v5360_v49 = vor.u32 %v6878_v39, %v5357_v41  ;;  %v6775_v39 = vld [vmem:[#allocation8 + $0x11c] sm:$0xf]  ;;  %v5496_v41 = vor.u32 %v6911_v32, %v5493_v33 }
 0x108   : > { %1985 = vmatpush.bf16.msra.mxu3 %v5140_v40  ;;  %v757_v40 = vperm.slane %v8111_v30, 0  ;;  %v6831_v57 = vld [vmem:[#allocation8 + $0x2dc] sm:$0xf] }
 0x109   : > { %1968 = vmatpush.bf16.msra.mxu2 %v5012_v50  ;;  %1943 = vmatpush.bf16.msra.mxu0 %v5232_v61  ;;  %v4852_v50 = vor.u32 %v6755_v43, %v4851_v42  ;;  %v6799_v61 = vld [vmem:[#allocation8 + $0x1dc] sm:$0xf] }
 0x10a   : > { %v4949_v42 = vld [vmem:[#allocation8 + $0x138] sm:$0xf0] }
 0x10b   : > { %1956 = vmatpush.bf16.msra.mxu1 %v5488_v62  ;;  %v5072_v62 = vor.u32 %v6806_v47, %v5069_v48  ;;  %v6839_v43 = vld [vmem:[#allocation8 + $0x31c] sm:$0xf] }
 0x10c   : > { %1986 = vmatpush.bf16.msra.mxu3 %v5108_v54  ;;  %v5173_v58 = vld [vmem:[#allocation8 + $0x2f8] sm:$0xf0] }
 0x10d   : > { %1969 = vmatpush.bf16.msra.mxu2 %v4980_v63  ;;  %1944 = vmatpush.bf16.msra.mxu0 %v5200_v9  ;;  %v5045_v63 = vld [vmem:[#allocation8 + $0x1f8] sm:$0xf0]  ;;  %v5304_v9 = vor.u32 %v6863_v0, %v5301_v1  ;;  %v4920_v0 = vor.u32 %v6767_v53, %v4917_v56  ;;  %v5176_v1 = vor.u32 %v6831_v57, %v5173_v58 }
 0x10e   : > { %v5048_v8 = vor.u32 %v6799_v61, %v5045_v63  ;;  %v6895_v59 = vld [vmem:[#allocation8 + $0x4dc] sm:$0xf] }
 0x10f   : > { %1957 = vmatpush.bf16.msra.mxu1 %v5456_v10  ;;  %v5523_v10 = vld [vmem:[#allocation8 + $0x598] sm:$0xf]  ;;  %v5429_v61 = vld [vmem:[#allocation8 + $0x4f8] sm:$0xf0] }
 0x110   : > { %1987 = vmatpush.bf16.msra.mxu3 %v5076_v6  ;;  %v6759_v4 = vld [vmem:[#allocation8 + $0x9c] sm:$0xf]  ;;  %v5432_v6 = vor.u32 %v6895_v59, %v5429_v61 }
 0x111   : > { %1970 = vmatpush.bf16.msra.mxu2 %v4948_v60  ;;  %1945 = vmatpush.bf16.msra.mxu0 %v5168_v22  ;;  %v6923_v60 = vld [vmem:[#allocation8 + $0x5b4] sm:$0xf0]  ;;  %v5016_v22 = vor.u32 %v6791_v11, %v5013_v13  ;;  %v5397_v11 = vld [vmem:[#allocation8 + $0x4b8] sm:$0xf0] }
 0x112   : > { %v5524_v20 = vor.u32 %v6923_v60, %v5523_v10  ;;  %v6887_v60 = vld [vmem:[#allocation8 + $0x49c] sm:$0xf] }
 0x113   : > { %1958 = vmatpush.bf16.msra.mxu1 %v5424_v23  ;;  %v5272_v23 = vor.u32 %v6855_v14, %v5269_v17  ;;  %1988 = vmatmul.bf16.vlgmr.msra.gmra.mxu3 %v8091_v16  ;;  %v5365_v28 = vld [vmem:[#allocation8 + $0x478] sm:$0xf0] }
 0x114   : > { %2032 = vmatpush.bf16.msrb.mxu3 %v5560_v12 }
 0x115   : > { %1971 = vmatpush.bf16.msra.mxu2 %v4916_v24  ;;  %1946 = vmatpush.bf16.msra.mxu0 %v5136_v34  ;;  %v6915_v24 = vld [vmem:[#allocation8 + $0x574] sm:$0xf0] }
 0x116   : > { %v5492_v34 = vor.u32 %v6915_v24, %v5491_v21  ;;  %v6815_v24 = vld [vmem:[#allocation8 + $0x25c] sm:$0xf] }
 0x117   : > { %1959 = vmatpush.bf16.msra.mxu1 %v5392_v35  ;;  %v5459_v35 = vld [vmem:[#allocation8 + $0x518] sm:$0xf] }
 0x118   : > { %2033 = vmatpush.bf16.msrb.mxu3 %v5528_v27  ;;  %v5460_v48 = vor.u32 %v6907_v38, %v5459_v35  ;;  %v6879_v27 = vld [vmem:[#allocation8 + $0x45c] sm:$0xf]  ;;  %v5331_v35 = vld [vmem:[#allocation8 + $0x418] sm:$0xf] }
 0x119   : > { %1972 = vmatpush.bf16.msra.mxu2 %v4884_v36  ;;  %1947 = vmatpush.bf16.msra.mxu0 %v5104_v46  ;;  %v4984_v36 = vor.u32 %v6783_v25, %v4981_v26  ;;  %v5461_v46 = vld [vmem:[#allocation8 + $0x538] sm:$0xf0]  ;;  %v5368_v38 = vor.u32 %v6879_v27, %v5365_v28 }
 0x11a   : > { %v5464_v55 = vor.u32 %v6903_v45, %v5461_v46  ;;  %v5109_v25 = vld [vmem:[#allocation8 + $0x278] sm:$0xf0] }
 0x11b   : > { %1960 = vmatpush.bf16.msra.mxu1 %v5360_v49  ;;  %v4952_v49 = vor.u32 %v6775_v39, %v4949_v42  ;;  %v4821_v39 = vld [vmem:[#allocation8 + $0x38] sm:$0xf0] }
 0x11c   : > { %2034 = vmatpush.bf16.msrb.mxu3 %v5496_v41  ;;  %v5077_v41 = vld [vmem:[#allocation8 + $0x238] sm:$0xf0] }
 0x11d   : > { %1973 = vmatpush.bf16.msra.mxu2 %v4852_v50  ;;  %1948 = vmatpush.bf16.msra.mxu0 %v5072_v62  ;;  %v1742_v47 = vpop.f32.mrf.mxu0  ;;  %v5208_v50 = vor.u32 %v6839_v43, %v5205_v44  ;;  %v5428_v62 = vor.u32 %v6899_v52, %v5427_v51  ;;  %v6871_v43 = vld [vmem:[#allocation8 + $0x41c] sm:$0xf] }
 0x11e   : > { %v1743_v54 = vadd.f32 %v1742_v47, %v757_v40  ;;  %v6807_v40 = vld [vmem:[#allocation8 + $0x21c] sm:$0xf] }
 0x11f   : > { %1961 = vmatpush.bf16.msra.mxu1 %v5328_v2  ;;  %v5395_v2 = vld [vmem:[#allocation8 + $0x498] sm:$0xf]  ;;  %v5333_v44 = vld [vmem:[#allocation8 + $0x438] sm:$0xf0]  ;;  %v5080_v47 = vor.u32 %v6807_v40, %v5077_v41  ;;  %v6305_v40 = vld [vmem:[#allocation9 + $0x5c0] sm:$0xf] }
 0x120   : > { %1949 = vmatmul.bf16.vlgmr.msra.gmra.mxu0 %v8091_v16  ;;  %2035 = vmatpush.bf16.msrb.mxu3 %v5464_v55  ;;  %v7120_v41 = vld [vmem:[#allocation9 + $0x5dc] sm:$0xf0] }
 0x121   : > { %1974 = vmatpush.bf16.msra.mxu2 %v4820_v3  ;;  %1993 = vmatpush.bf16.msrb.mxu0 %v5556_v7  ;;  %v6891_v3 = vld [vmem:[#allocation8 + $0x4b4] sm:$0xf0]  ;;  %v4885_v7 = vld [vmem:[#allocation8 + $0xb8] sm:$0xf0] }
 0x122   : > { %1962 = vmatmul.bf16.vlgmr.msra.gmra.mxu1 %v8089_v15  ;;  %v5396_v13 = vor.u32 %v6891_v3, %v5395_v2  ;;  %v4888_v14 = vor.u32 %v6759_v4, %v4885_v7 }
 0x123   : > { %2006 = vmatpush.bf16.msrb.mxu1 %v5048_v8  ;;  %v6823_v8 = vld [vmem:[#allocation8 + $0x29c] sm:$0xf]  ;;  %v1781_v10 = vpop.f32.mrf.mxu3 }
 0x124   : > { %1975 = vmatmul.bf16.vlgmr.msra.gmra.mxu2 %v8115_v31  ;;  %2036 = vmatpush.bf16.msrb.mxu3 %v5432_v6  ;;  %v760_v6 = vperm.slane %v8111_v30, 3 }
 0x125   : > { %2019 = vmatpush.bf16.msrb.mxu2 %v5304_v9  ;;  %1994 = vmatpush.bf16.msrb.mxu0 %v5524_v20  ;;  %v1755_v63 = vpop.f32.mrf.mxu1  ;;  %v5141_v9 = vld [vmem:[#allocation8 + $0x2b8] sm:$0xf0]  ;;  %v1744_v12 = vpop.f32.mrf.mxu0 }
 0x126   : > { %v1756_v5 = vadd.f32 %v1755_v63, %v1743_v54  ;;  %v5144_v17 = vor.u32 %v6823_v8, %v5141_v9  ;;  %v6751_v20 = vld [vmem:[#allocation8 + $0x5c] sm:$0xf]  ;;  %v759_v63 = vperm.slane %v8111_v30, 2 }
 0x127   : > { %2007 = vmatpush.bf16.msrb.mxu1 %v5016_v22  ;;  %v5400_v22 = vor.u32 %v6887_v60, %v5397_v11 }
 0x129   : > { %2020 = vmatpush.bf16.msrb.mxu2 %v5272_v23  ;;  %1995 = vmatpush.bf16.msrb.mxu0 %v5492_v34  ;;  %v4853_v23 = vld [vmem:[#allocation8 + $0x78] sm:$0xf0]  ;;  %v5112_v34 = vor.u32 %v6815_v24, %v5109_v25 }
 0x12a   : > { %v1768_v21 = vpop.f32.mrf.mxu2  ;;  %v4856_v33 = vor.u32 %v6751_v20, %v4853_v23  ;;  %2037 = vmatpush.bf16.msrb.mxu3 %v5400_v22 }
 0x12b   : > { %2008 = vmatpush.bf16.msrb.mxu1 %v4984_v36  ;;  %v1769_v26 = vadd.f32 %v1768_v21, %v1756_v5  ;;  %v6875_v36 = vld [vmem:[#allocation8 + $0x434] sm:$0xf0]  ;;  %v1783_v42 = vpop.f32.mrf.mxu3 }
 0x12c   : > { %v5332_v45 = vor.u32 %v6875_v36, %v5331_v35 }
 0x12d   : > { %2021 = vmatpush.bf16.msrb.mxu2 %v5240_v37  ;;  %1996 = vmatpush.bf16.msrb.mxu0 %v5460_v48  ;;  %v1757_v32 = vpop.f32.mrf.mxu1  ;;  %v6743_v37 = vld [vmem:[#allocation8 + $0x1c] sm:$0xf] }
 0x12e   : > { %v4824_v46 = vor.u32 %v6743_v37, %v4821_v39  ;;  %2038 = vmatpush.bf16.msrb.mxu3 %v5368_v38 }
 0x12f   : > { %2009 = vmatpush.bf16.msrb.mxu1 %v4952_v49  ;;  %v5336_v49 = vor.u32 %v6871_v43, %v5333_v44  ;;  %v6306_v44 = vor.u32 %v7120_v41, %v6305_v40 }
 0x131   : > { %2022 = vmatpush.bf16.msrb.mxu2 %v5208_v50  ;;  %1997 = vmatpush.bf16.msrb.mxu0 %v5428_v62  ;;  %v758_v50 = vperm.slane %v8111_v30, 1 }
 0x132   : > { %v1770_v48 = vpop.f32.mrf.mxu2  ;;  %2039 = vmatpush.bf16.msrb.mxu3 %v5336_v49  ;;  %v7184_v49 = vld [vmem:[#allocation9 + $0x7dc] sm:$0xf0] }
 0x133   : > { %2010 = vmatpush.bf16.msrb.mxu1 %v4920_v0  ;;  %v1782_v51 = vadd.f32 %v1781_v10, %v758_v50  ;;  %v6561_v48 = vld [vmem:[#allocation9 + $0x7c0] sm:$0xf] }
 0x135   : > { %2023 = vmatpush.bf16.msrb.mxu2 %v5176_v1  ;;  %1998 = vmatpush.bf16.msrb.mxu0 %v5396_v13 }
 0x136   : > { %2040 = vmatmul.bf16.vlgmr.msrb.gmra.mxu3 %v8089_v15  ;;  %v1833_v58 = vpop.f32.mrf.mxu3 }
 0x137   : > { %2011 = vmatpush.bf16.msrb.mxu1 %v4888_v14 }
 0x139   : > { %2024 = vmatpush.bf16.msrb.mxu2 %v5144_v17  ;;  %1999 = vmatpush.bf16.msrb.mxu0 %v5364_v29 }
 0x13b   : > { %2012 = vmatpush.bf16.msrb.mxu1 %v4856_v33 }
 0x13d   : > { %2025 = vmatpush.bf16.msrb.mxu2 %v5112_v34  ;;  %2000 = vmatpush.bf16.msrb.mxu0 %v5332_v45  ;;  %v1794_v52 = vpop.f32.mrf.mxu0 }
 0x13e   : > { %v1795_v53 = vadd.f32 %v1794_v52, %v1782_v51  ;;  %v1835_v62 = vpop.f32.mrf.mxu3 }
 0x13f   : > { %2013 = vmatpush.bf16.msrb.mxu1 %v4824_v46  ;;  %v1807_v54 = vpop.f32.mrf.mxu1 }
 0x140   : > { %2001 = vmatmul.bf16.vlgmr.msrb.gmra.mxu0 %v8089_v15  ;;  %v1808_v55 = vadd.f32 %v1807_v54, %v1795_v53 }
 0x141   : > { %2026 = vmatpush.bf16.msrb.mxu2 %v5080_v47 }
 0x142   : > { %2014 = vmatmul.bf16.vlgmr.msrb.gmra.mxu1 %v8115_v31  ;;  %v5561_v31 = vmul.f32 -1.442695, %v1769_v26  ;;  %v5562_v20 = vmul.f32 -1.442695, %v1808_v55  ;;  %v761_v26 = vperm.slane %v8111_v30, 4  ;;  %v6562_v55 = vor.u32 %v7184_v49, %v6561_v48 }
 0x143   : > { %v6976_v49 = vld [vmem:[#allocation9 + $0x15c] sm:$0xf0] }
 0x144   : > { %2027 = vmatmul.bf16.vlgmr.msrb.gmra.mxu2 %v8091_v16  ;;  %7387 = vpow2.f32 %v5561_v31  ;;  %3780 = vmatpush.bf16.msra.mxu3 %v6562_v55  ;;  %v6529_v31 = vld [vmem:[#allocation9 + $0x780] sm:$0xf] }
 0x145   : > { %v1796_v57 = vpop.f32.mrf.mxu0  ;;  %3767 = vmatpush.bf16.msra.mxu2 %v6306_v44  ;;  %v5729_v44 = vld [vmem:[#allocation9 + $0x140] sm:$0xf] }
 0x146   : > { %v5730_v51 = vor.u32 %v6976_v49, %v5729_v44  ;;  %v7152_v55 = vld [vmem:[#allocation9 + $0x6dc] sm:$0xf0]  ;;  %v6307_v44 = vld [vmem:[#allocation9 + $0x5e0] sm:$0xf0] }
 0x147   : > { %v1820_v56 = vpop.f32.mrf.mxu2  ;;  %v1809_v59 = vpop.f32.mrf.mxu1  ;;  %v5889_v49 = vld [vmem:[#allocation9 + $0x280] sm:$0xf] }
 0x148   : > { %v1821_v0 = vadd.f32 %v1820_v56, %v759_v63  ;;  %v6273_v59 = vld [vmem:[#allocation9 + $0x580] sm:$0xf] }
 0x14a   : > { %v1834_v1 = vadd.f32 %v1833_v58, %v1821_v0  ;;  %v7388_v8 = vpop.eup %7387 }
 0x14b   : > { %v8129_v12 = vadd.f32 1.0, %v7388_v8 }
 0x14d   : > { %vm2058_vm0 = vweird.f32 %v8129_v12  ;;  %v2064_v39 = vand.u32 2147483648, %v8129_v12  ;;  %v2062_v52 = vand.u32 2147483647, %v8129_v12 }
 0x14f   : > { %v1822_v61 = vpop.f32.mrf.mxu2  ;;  %vm2063_vm6 = vcmp.eq.f32.partialorder %v2062_v52, 8.507059e+37  ;;  %v7040_v52 = vld [vmem:[#allocation9 + $0x35c] sm:$0xf0] }
 0x150   : > { %v7112_v61 = vld [vmem:[#allocation9 + $0x59c] sm:$0xf0] }
 0x151   : > { %v6274_v63 = vor.u32 %v7112_v61, %v6273_v59  ;;  %v762_v59 = vperm.slane %v8111_v30, 5 }
 0x153   : > { %3768 = vmatpush.bf16.msra.mxu2 %v6274_v63 }
 0x156   : > { %v1885_v5 = vpop.f32.mrf.mxu3 }
 0x15d   : > { %v1846_v2 = vpop.f32.mrf.mxu0 }
 0x15e   : > { %v1847_v16 = vadd.f32 %v1846_v2, %v1834_v1  ;;  %v1887_v14 = vpop.f32.mrf.mxu3  ;;  %v2065_v1 = vor.u32 1.1754944e-38, %v2064_v39  ;;  %v7176_v2 = vld [vmem:[#allocation9 + $0x79c] sm:$0xf0] }
 0x15f   : > { %v1859_v3 = vpop.f32.mrf.mxu1  ;;  %v7056_v14 = vld [vmem:[#allocation9 + $0x3dc] sm:$0xf0] }
 0x160   : > { %v5563_v15 = vmul.f32 -1.442695, %v1847_v16  ;;  %v1860_v11 = vadd.f32 %v1859_v3, %v760_v6  ;;  %v6530_v3 = vor.u32 %v7176_v2, %v6529_v31  ;;  %v7104_v6 = vld [vmem:[#allocation9 + $0x55c] sm:$0xf0] }
 0x161   : > { %v7160_v39 = vld [vmem:[#allocation9 + $0x71c] sm:$0xf0] }
 0x162   : > { %7389 = vpow2.f32 %v5563_v15  ;;  %v547_v15 = vld [vmem:[#allocation15] sm:$0xff]  ;;  %3781 = vmatpush.bf16.msra.mxu3 %v6530_v3 }
 0x163   : > { %v5697_v31 = vld [vmem:[#allocation9 + $0x100] sm:$0xf] }
 0x164   : > { %v6968_v2 = vld [vmem:[#allocation9 + $0x11c] sm:$0xf0] }
 0x165   : > { %v1848_v7 = vpop.f32.mrf.mxu0 }
 0x167   : > { %v1872_v4 = vpop.f32.mrf.mxu2  ;;  %v1861_v9 = vpop.f32.mrf.mxu1 }
 0x168   : > { %v7390_v10 = vpop.eup %7389  ;;  %v1873_v17 = vadd.f32 %v1872_v4, %v1860_v11  ;;  %v5793_v9 = vld [vmem:[#allocation9 + $0x1c0] sm:$0xf] }
 0x169   : > { %v8127_v60 = vadd.f32 1.0, %v7390_v10  ;;  %v6992_v10 = vld [vmem:[#allocation9 + $0x1dc] sm:$0xf0] }
 0x16a   : > { %v1886_v18 = vadd.f32 %v1885_v5, %v1873_v17  ;;  %v6241_v5 = vld [vmem:[#allocation9 + $0x540] sm:$0xf] }
 0x16b   : > { %7391 = vrcp.f32 %v8127_v60  ;;  %vm2096_vm2 = vweird.f32 %v8127_v60  ;;  %v2102_v45 = vand.u32 2147483648, %v8127_v60  ;;  %v2100_v53 = vand.u32 2147483647, %v8127_v60  ;;  %v6497_v17 = vld [vmem:[#allocation9 + $0x740] sm:$0xf] }
 0x16c   : > { %7393 = vrcp.f32 %v8129_v12  ;;  %v5564_v23 = vmul.f32 -1.442695, %v1886_v18  ;;  %v6242_v8 = vor.u32 %v7104_v6, %v6241_v5  ;;  %v7032_v5 = vld [vmem:[#allocation9 + $0x31c] sm:$0xf0] }
 0x16d   : > { %7395 = vpow2.f32 %v5562_v20  ;;  %v2103_v0 = vor.u32 1.1754944e-38, %v2102_v45  ;;  %vm2101_vm7 = vcmp.eq.f32.partialorder %v2100_v53, 8.507059e+37  ;;  %v6433_v53 = vld [vmem:[#allocation9 + $0x6c0] sm:$0xf] }
 0x16e   : > { %7397 = vpow2.f32 %v5564_v23  ;;  %3769 = vmatpush.bf16.msra.mxu2 %v6242_v8  ;;  %v7168_v23 = vld [vmem:[#allocation9 + $0x75c] sm:$0xf0]  ;;  %v6434_v61 = vor.u32 %v7152_v55, %v6433_v53 }
 0x16f   : > { %v1874_v13 = vpop.f32.mrf.mxu2  ;;  %v6401_v6 = vld [vmem:[#allocation9 + $0x680] sm:$0xf] }
 0x170   : > { %v6049_v13 = vld [vmem:[#allocation9 + $0x3c0] sm:$0xf] }
 0x171   : > { %v8133_v19 = vpop.eup %7391  ;;  %v6337_v53 = vld [vmem:[#allocation9 + $0x600] sm:$0xf] }
 0x172   : > { %v8135_v21 = vpop.eup %7393  ;;  %v2092_v22 = vmul.f32 %v8133_v19, %v8127_v60  ;;  %vm2097_vm3 = vweird.f32 %v8133_v19  ;;  %v7128_v55 = vld [vmem:[#allocation9 + $0x61c] sm:$0xf0] }
 0x173   : > { %v2054_v24 = vmul.f32 %v8135_v21, %v8129_v12  ;;  %v7396_v32 = vpop.eup %7395  ;;  %vm2059_vm1 = vweird.f32 %v8135_v21  ;;  %vm8172_vm5 = vmor %vm2096_vm2, %vm2097_vm3  ;;  %v5794_v12 = vor.u32 %v6992_v10, %v5793_v9  ;;  %v7072_v10 = vld [vmem:[#allocation9 + $0x45c] sm:$0xf0] }
 0x174   : > { %v2093_v25 = vsub.f32 1.0, %v2092_v22  ;;  %v7398_v35 = vpop.eup %7397  ;;  %v8144_v38 = vadd.f32 1.0, %v7396_v32  ;;  %vm8160_vm4 = vmor %vm2058_vm0, %vm2059_vm1  ;;  %v6050_v22 = vor.u32 %v7056_v14, %v6049_v13  ;;  %v6984_v32 = vld [vmem:[#allocation9 + $0x19c] sm:$0xf0] }
 0x175   : > { %v2055_v27 = vsub.f32 1.0, %v2054_v24  ;;  %v8153_v46 = vadd.f32 1.0, %v7398_v35  ;;  %v6209_v24 = vld [vmem:[#allocation9 + $0x500] sm:$0xf]  ;;  %3741 = vmatpush.bf16.msra.mxu0 %v5794_v12 }
 0x176   : > { %v2094_v33 = vmul.f32 %v8133_v19, %v2093_v25  ;;  %v8166_v54 = vpop.f32.mrf.mxu3  ;;  %v7096_v25 = vld [vmem:[#allocation9 + $0x51c] sm:$0xf0]  ;;  %3754 = vmatpush.bf16.msra.mxu1 %v6050_v22  ;;  %v2077_v12 = vand.u32 2147483647, %v8144_v38  ;;  %vm2073_vm11 = vweird.f32 %v8144_v38 }
 0x177   : > { %v2056_v37 = vmul.f32 %v8135_v21, %v2055_v27  ;;  %v6498_v27 = vor.u32 %v7168_v23, %v6497_v17  ;;  %vm2111_vm8 = vweird.f32 %v8153_v46  ;;  %v2115_v13 = vand.u32 2147483647, %v8153_v46  ;;  %v5921_v22 = vld [vmem:[#allocation9 + $0x2c0] sm:$0xf] }
 0x178   : > { %v2095_v43 = vadd.f32 %v8133_v19, %v2094_v33  ;;  %v6017_v33 = vld [vmem:[#allocation9 + $0x380] sm:$0xf]  ;;  %vm8232_vm15 = vcmp.eq.f32.partialorder %v2077_v12, 8.507059e+37 }
 0x179   : > { %v2057_v50 = vadd.f32 %v8135_v21, %v2056_v37  ;;  %v6465_v37 = vld [vmem:[#allocation9 + $0x700] sm:$0xf]  ;;  %3782 = vmatpush.bf16.msra.mxu3 %v6498_v27  ;;  %vm8217_vm13 = vcmp.eq.f32.partialorder %v2115_v13, 8.507059e+37 }
 0x17a   : > { %v2099_v62 = vsel %vm8172_vm5, %v8133_v19, %v2095_v43  ;;  %v6466_v41 = vor.u32 %v7160_v39, %v6465_v37  ;;  %v7088_v43 = vld [vmem:[#allocation9 + $0x4dc] sm:$0xf0] }
 0x17b   : > { %v2061_v16 = vsel %vm8160_vm4, %v8135_v21, %v2057_v50  ;;  %v2104_v4 = vsel %vm2101_vm7, %v2103_v0, %v2099_v62  ;;  %v5985_v50 = vld [vmem:[#allocation9 + $0x340] sm:$0xf] }
 0x17c   : > { %v2066_v11 = vsel %vm2063_vm6, %v2065_v1, %v2061_v16  ;;  %v2161_v19 = vmul.f32 %v2104_v4, %v547_v15  ;;  %v5986_v56 = vor.u32 %v7040_v52, %v5985_v50  ;;  %v1938_v1 = vadd.f32 %v8166_v54, %v762_v59  ;;  %v5953_v16 = vld [vmem:[#allocation9 + $0x300] sm:$0xf] }
 0x17d   : > { %v1898_v28 = vpop.f32.mrf.mxu0  ;;  %3783 = vmatpush.bf16.msra.mxu3 %v6466_v41  ;;  %v5698_v4 = vor.u32 %v6968_v2, %v5697_v31  ;;  %v5954_v8 = vor.u32 %v7032_v5, %v5953_v16  ;;  %v6113_v54 = vld [vmem:[#allocation9 + $0x440] sm:$0xf]  ;;  %v6338_v59 = vor.u32 %v7128_v55, %v6337_v53  ;;  %v7108_v16 = vld [vmem:[#allocation9 + $0x584] sm:$0xf] }
 0x17e   : > { %v1899_v34 = vadd.f32 %v1898_v28, %v761_v26  ;;  %v1939_v21 = vpop.f32.mrf.mxu3  ;;  %v6210_v28 = vor.u32 %v7096_v25, %v6209_v24  ;;  %v6114_v14 = vor.u32 %v7072_v10, %v6113_v54  ;;  %v2079_v24 = vand.u32 2147483648, %v8144_v38  ;;  %v7064_v37 = vld [vmem:[#allocation9 + $0x41c] sm:$0xf0]  ;;  %v7172_v54 = vld [vmem:[#allocation9 + $0x784] sm:$0xf] }
 0x17f   : > { %v1911_v29 = vpop.f32.mrf.mxu1  ;;  %v6960_v21 = vld [vmem:[#allocation9 + $0xdc] sm:$0xf0]  ;;  %v6531_v10 = vld [vmem:[#allocation9 + $0x7a0] sm:$0xf0] }
 0x180   : > { %v1912_v36 = vadd.f32 %v1911_v29, %v1899_v34  ;;  %v5761_v29 = vld [vmem:[#allocation9 + $0x180] sm:$0xf]  ;;  %3770 = vmatpush.bf16.msra.mxu2 %v6210_v28  ;;  %v6534_v13 = vor.u32 %v7172_v54, %v6531_v10  ;;  %v7156_v53 = vld [vmem:[#allocation9 + $0x704] sm:$0xf] }
 0x181   : > { %v5762_v35 = vor.u32 %v6984_v32, %v5761_v29  ;;  %3784 = vmatpush.bf16.msra.mxu3 %v6434_v61  ;;  %v7024_v28 = vld [vmem:[#allocation9 + $0x2dc] sm:$0xf0]  ;;  %v7180_v61 = vld [vmem:[#allocation9 + $0x7c4] sm:$0xf] }
 0x182   : > { %v6369_v29 = vld [vmem:[#allocation9 + $0x640] sm:$0xf]  ;;  %v6467_v55 = vld [vmem:[#allocation9 + $0x720] sm:$0xf0] }
 0x183   : > { %3742 = vmatpush.bf16.msra.mxu0 %v5762_v35  ;;  %v7136_v35 = vld [vmem:[#allocation9 + $0x65c] sm:$0xf0]  ;;  %v7028_v54 = vld [vmem:[#allocation9 + $0x304] sm:$0xf] }
 0x184   : > { %v6370_v41 = vor.u32 %v7136_v35, %v6369_v29  ;;  %v7016_v52 = vld [vmem:[#allocation9 + $0x29c] sm:$0xf0]  ;;  %v6988_v29 = vld [vmem:[#allocation9 + $0x1c4] sm:$0xf] }
 0x185   : > { %v1900_v57 = vpop.f32.mrf.mxu0  ;;  %v6936_v23 = vld [vmem:[#allocation9 + $0x1c] sm:$0xf0] }
 0x186   : > { %v6145_v57 = vld [vmem:[#allocation9 + $0x480] sm:$0xf] }
 0x187   : > { %v1924_v42 = vpop.f32.mrf.mxu2  ;;  %v1913_v58 = vpop.f32.mrf.mxu1  ;;  %3743 = vmatpush.bf16.msra.mxu0 %v5730_v51 }
 0x188   : > { %v1925_v47 = vadd.f32 %v1924_v42, %v1912_v36  ;;  %v7048_v36 = vld [vmem:[#allocation9 + $0x39c] sm:$0xf0] }
 0x189   : > { %v6018_v40 = vor.u32 %v7048_v36, %v6017_v33  ;;  %v6177_v42 = vld [vmem:[#allocation9 + $0x4c0] sm:$0xf] }
 0x18a   : > { %7399 = vtanh.f32 %v1925_v47  ;;  %v6178_v48 = vor.u32 %v7088_v43, %v6177_v42  ;;  %v7080_v58 = vld [vmem:[#allocation9 + $0x49c] sm:$0xf0]  ;;  %v7116_v43 = vld [vmem:[#allocation9 + $0x5c4] sm:$0xf] }
 0x18b   : > { %7401 = vrcp.f32 %v8144_v38  ;;  %3755 = vmatpush.bf16.msra.mxu1 %v6018_v40  ;;  %v6146_v0 = vor.u32 %v7080_v58, %v6145_v57  ;;  %3744 = vmatpush.bf16.msra.mxu0 %v5698_v4  ;;  %v6081_v36 = vld [vmem:[#allocation9 + $0x400] sm:$0xf] }
 0x18c   : > { %7403 = vrcp.f32 %v8153_v46  ;;  %3771 = vmatpush.bf16.msra.mxu2 %v6178_v48  ;;  %v6082_v42 = vor.u32 %v7064_v37, %v6081_v36  ;;  %v6952_v48 = vld [vmem:[#allocation9 + $0x9c] sm:$0xf0]  ;;  %v7052_v36 = vld [vmem:[#allocation9 + $0x3c4] sm:$0xf] }
 0x18d   : > { %v6051_v37 = vld [vmem:[#allocation9 + $0x3e0] sm:$0xf0] }
 0x18f   : > { %v1926_v7 = vpop.f32.mrf.mxu2  ;;  %3756 = vmatpush.bf16.msra.mxu1 %v5986_v56  ;;  %v763_v56 = vperm.slane %v8111_v30, 6 }
 0x190   : > { %v7400_v60 = vpop.eup %7399  ;;  %3772 = vmatpush.bf16.msra.mxu2 %v6146_v0  ;;  %v7144_v7 = vld [vmem:[#allocation9 + $0x69c] sm:$0xf0]  ;;  %v2080_v0 = vor.u32 1.1754944e-38, %v2079_v24 }
 0x191   : > { %v8184_v18 = vpop.eup %7401  ;;  %v2163_v20 = vmul.f32 %v7400_v60, %v2066_v11  ;;  %v6402_v9 = vor.u32 %v7144_v7, %v6401_v6  ;;  %v2117_v60 = vand.u32 2147483648, %v8153_v46  ;;  %v5601_v6 = vld [vmem:[#allocation9 + $0x40] sm:$0xf] }
 0x192   : > { %v8186_v26 = vpop.eup %7403  ;;  %v2069_v45 = vmul.f32 %v8184_v18, %v8144_v38  ;;  %vm2074_vm12 = vweird.f32 %v8184_v18  ;;  %v6944_v7 = vld [vmem:[#allocation9 + $0x5c] sm:$0xf0] }
 0x193   : > { %v8188_v34 = vadd.f32 %v2163_v20, %v2161_v19  ;;  %v2107_v47 = vmul.f32 %v8186_v26, %v8153_v46  ;;  %vm2112_vm9 = vweird.f32 %v8186_v26  ;;  %3757 = vmatpush.bf16.msra.mxu1 %v5954_v8  ;;  %3785 = vmatpush.bf16.msra.mxu3 %v6402_v9  ;;  %v5665_v20 = vld [vmem:[#allocation9 + $0xc0] sm:$0xf]  ;;  %v5922_v46 = vor.u32 %v7024_v28, %v5921_v22  ;;  %vm8228_vm14 = vmor %vm2073_vm11, %vm2074_vm12 }
 0x194   : > { %v2070_v62 = vsub.f32 1.0, %v2069_v45  ;;  %vm8208_vm10 = vmor %vm2111_vm8, %vm2112_vm9  ;;  %3773 = vmatpush.bf16.msra.mxu2 %v6114_v14  ;;  %v5666_v27 = vor.u32 %v6960_v21, %v5665_v20  ;;  %v2118_v39 = vor.u32 1.1754944e-38, %v2117_v60  ;;  %v6310_v45 = vor.u32 %v7116_v43, %v6307_v44  ;;  %v5857_v8 = vld [vmem:[#allocation9 + $0x240] sm:$0xf]  ;;  %v6243_v20 = vld [vmem:[#allocation9 + $0x560] sm:$0xf0] }
 0x195   : > { %4287 = vst [vmem:[#allocation15] sm:$0xff] %v8188_v34  ;;  %v2108_v63 = vsub.f32 1.0, %v2107_v47  ;;  %v5633_v47 = vld [vmem:[#allocation9 + $0x80] sm:$0xf]  ;;  %v5602_v9 = vor.u32 %v6944_v7, %v5601_v6  ;;  %v7092_v43 = vld [vmem:[#allocation9 + $0x504] sm:$0xf] }
 0x196   : > { %v2071_v15 = vmul.f32 %v8184_v18, %v2070_v62  ;;  %3745 = vmatpush.bf16.msra.mxu0 %v5666_v27  ;;  %v5634_v51 = vor.u32 %v6952_v48, %v5633_v47  ;;  %v6563_v62 = vld [vmem:[#allocation9 + $0x7e0] sm:$0xf0]  ;;  %v5569_v22 = vld [vmem:[#allocation9] sm:$0xf] }
 0x197   : > { %v2109_v3 = vmul.f32 %v8186_v26, %v2108_v63  ;;  %3758 = vmatpush.bf16.msra.mxu1 %v5922_v46  ;;  %3786 = vmatpush.bf16.msra.mxu3 %v6370_v41  ;;  %v548_v63 = vld [vmem:[#allocation15 + $0x8] sm:$0xff]  ;;  %v6566_v2 = vor.u32 %v7180_v61, %v6563_v62  ;;  %v5825_v24 = vld [vmem:[#allocation9 + $0x200] sm:$0xf]  ;;  %v5570_v27 = vor.u32 %v6936_v23, %v5569_v22  ;;  %v6980_v48 = vld [vmem:[#allocation9 + $0x184] sm:$0xf] }
 0x198   : > { %v2072_v33 = vadd.f32 %v8184_v18, %v2071_v15  ;;  %3774 = vmatpush.bf16.msra.mxu2 %v6082_v42  ;;  %v7000_v28 = vld [vmem:[#allocation9 + $0x21c] sm:$0xf0]  ;;  %v6054_v41 = vor.u32 %v7052_v36, %v6051_v37  ;;  %v6499_v42 = vld [vmem:[#allocation9 + $0x760] sm:$0xf0]  ;;  %v550_v23 = vld [vmem:[#allocation13 + $0x10] sm:$0xff] }
 0x199   : > { %v2110_v25 = vadd.f32 %v8186_v26, %v2109_v3  ;;  %v6275_v3 = vld [vmem:[#allocation9 + $0x5a0] sm:$0xf0]  ;;  %v5826_v46 = vor.u32 %v7000_v28, %v5825_v24  ;;  %v551_v24 = vld [vmem:[#allocation13 + $0x18] sm:$0xff] }
 0x19a   : > { %v2076_v38 = vsel %vm8228_vm14, %v8184_v18, %v2072_v33  ;;  %3746 = vmatpush.bf16.msra.mxu0 %v5634_v51  ;;  %v6278_v5 = vor.u32 %v7108_v16, %v6275_v3  ;;  %v7008_v18 = vld [vmem:[#allocation9 + $0x25c] sm:$0xf0]  ;;  %v6179_v61 = vld [vmem:[#allocation9 + $0x4e0] sm:$0xf0] }
 0x19b   : > { %v2114_v50 = vsel %vm8208_vm10, %v8186_v26, %v2110_v25  ;;  %v5890_v26 = vor.u32 %v7016_v52, %v5889_v49  ;;  %3787 = vmatpush.bf16.msra.mxu3 %v6338_v59  ;;  %v5858_v12 = vor.u32 %v7008_v18, %v5857_v8  ;;  %v5763_v49 = vld [vmem:[#allocation9 + $0x1a0] sm:$0xf0] }
 0x19c   : > { %3819 = vmatpush.bf16.msrb.mxu2 %v6310_v45  ;;  %v2119_v15 = vsel %vm8217_vm13, %v2118_v39, %v2114_v50  ;;  %v7164_v39 = vld [vmem:[#allocation9 + $0x744] sm:$0xf]  ;;  %v5766_v51 = vor.u32 %v6980_v48, %v5763_v49  ;;  %v7121_v48 = vld [vmem:[#allocation9 + $0x5e4] sm:$0xf0] }
 0x19d   : > { %v1950_v11 = vpop.f32.mrf.mxu0  ;;  %3759 = vmatpush.bf16.msra.mxu1 %v5890_v26  ;;  %v2162_v14 = vmul.f32 %v2119_v15, %v548_v63  ;;  %v6502_v44 = vor.u32 %v7164_v39, %v6499_v42  ;;  %v6211_v45 = vld [vmem:[#allocation9 + $0x520] sm:$0xf0]  ;;  %v6470_v26 = vor.u32 %v7156_v53, %v6467_v55 }
 0x19e   : > { %v1951_v17 = vadd.f32 %v1950_v11, %v1938_v1  ;;  %v8241_v1 = vpop.f32.mrf.mxu3  ;;  %v2081_v11 = vsel %vm8232_vm15, %v2080_v0, %v2076_v38  ;;  %3747 = vmatpush.bf16.msra.mxu0 %v5602_v9  ;;  %v6214_v47 = vor.u32 %v7092_v43, %v6211_v45  ;;  %v7044_v50 = vld [vmem:[#allocation9 + $0x384] sm:$0xf] }
 0x19f   : > { %v1963_v19 = vpop.f32.mrf.mxu1  ;;  %3832 = vmatpush.bf16.msrb.mxu3 %v6566_v2  ;;  %v6019_v52 = vld [vmem:[#allocation9 + $0x3a0] sm:$0xf0] }
 0x1a0   : > { %v1964_v32 = vadd.f32 %v1963_v19, %v1951_v17  ;;  %3820 = vmatpush.bf16.msrb.mxu2 %v6278_v5  ;;  %v7100_v19 = vld [vmem:[#allocation9 + $0x544] sm:$0xf]  ;;  %v6022_v57 = vor.u32 %v7044_v50, %v6019_v52 }
 0x1a1   : > { %3760 = vmatpush.bf16.msra.mxu1 %v5858_v12  ;;  %v6246_v21 = vor.u32 %v7100_v19, %v6243_v20  ;;  %v7084_v59 = vld [vmem:[#allocation9 + $0x4c4] sm:$0xf] }
 0x1a2   : > { %7405 = vtanh.f32 %v1964_v32  ;;  %v5795_v32 = vld [vmem:[#allocation9 + $0x1e0] sm:$0xf0]  ;;  %3748 = vmatpush.bf16.msra.mxu0 %v5570_v27  ;;  %v6182_v62 = vor.u32 %v7084_v59, %v6179_v61 }
 0x1a3   : > { %3833 = vmatpush.bf16.msrb.mxu3 %v6534_v13  ;;  %v5798_v35 = vor.u32 %v6988_v29, %v5795_v32  ;;  %v6972_v63 = vld [vmem:[#allocation9 + $0x144] sm:$0xf] }
 0x1a4   : > { %3821 = vmatpush.bf16.msrb.mxu2 %v6246_v21  ;;  %v5731_v38 = vld [vmem:[#allocation9 + $0x160] sm:$0xf0]  ;;  %v764_v21 = vperm.slane %v8111_v30, 7 }
 0x1a5   : > { %v1952_v31 = vpop.f32.mrf.mxu0  ;;  %3761 = vmatpush.bf16.msra.mxu1 %v5826_v46  ;;  %v7036_v0 = vld [vmem:[#allocation9 + $0x344] sm:$0xf]  ;;  %v2172_v46 = vpack.c.bf16 %v551_v24, %v550_v23 }
 0x1a6   : > { %v1991_v40 = vpop.f32.mrf.mxu3  ;;  %3793 = vmatpush.bf16.msrb.mxu0 %v5798_v35  ;;  %v5734_v31 = vor.u32 %v6972_v63, %v5731_v38  ;;  %v5987_v2 = vld [vmem:[#allocation9 + $0x360] sm:$0xf0] }
 0x1a7   : > { %v8236_v58 = vpop.f32.mrf.mxu2  ;;  %v1965_v4 = vpop.f32.mrf.mxu1  ;;  %3834 = vmatpush.bf16.msrb.mxu3 %v6502_v44  ;;  %v7148_v16 = vld [vmem:[#allocation9 + $0x6c4] sm:$0xf]  ;;  %v2181_v43 = vunpack.c.l.b16 %v2172_v46  ;;  %v2182_v55 = vunpack.c.h.b16 %v2172_v46 }
 0x1a8   : > { %v7406_v60 = vpop.eup %7405  ;;  %3822 = vmatpush.bf16.msrb.mxu2 %v6214_v47  ;;  %v6435_v3 = vld [vmem:[#allocation9 + $0x6e0] sm:$0xf0]  ;;  %v1977_v15 = vadd.f32 %v8236_v58, %v763_v56  ;;  %v5990_v4 = vor.u32 %v7036_v0, %v5987_v2  ;;  %v6313_v47 = vld [vmem:[#allocation9 + $0x5c8] sm:$0xf] }
 0x1a9   : > { %v2164_v17 = vmul.f32 %v7406_v60, %v2081_v11  ;;  %3806 = vmatpush.bf16.msrb.mxu1 %v6054_v41  ;;  %v6438_v5 = vor.u32 %v7148_v16, %v6435_v3  ;;  %v7076_v6 = vld [vmem:[#allocation9 + $0x484] sm:$0xf]  ;;  %v8254_v49 = vpack.c.b16 %v2181_v43, %v2181_v43  ;;  %v6314_v50 = vor.u32 %v7121_v48, %v6313_v47  ;;  %v6569_v0 = vld [vmem:[#allocation9 + $0x7c8] sm:$0xf] }
 0x1aa   : > { %3794 = vmatpush.bf16.msrb.mxu0 %v5766_v51  ;;  %v6147_v7 = vld [vmem:[#allocation9 + $0x4a0] sm:$0xf0]  ;;  %v1990_v13 = vadd.f32 %v8241_v1, %v1977_v15  ;;  %v8256_v38 = vpack.c.b16 %v2182_v55, %v2182_v55  ;;  %v6185_v47 = vld [vmem:[#allocation9 + $0x4c8] sm:$0xf] }
 0x1ab   : > { %v8247_v25 = vadd.f32 %v2164_v17, %v2162_v14  ;;  %3835 = vmatpush.bf16.msrb.mxu3 %v6470_v26  ;;  %v6150_v8 = vor.u32 %v7076_v6, %v6147_v7  ;;  %v6964_v9 = vld [vmem:[#allocation9 + $0x104] sm:$0xf]  ;;  %3775 = vmatmul.bf16.vlgmr.msra.gmra.mxu2 %v8254_v49  ;;  %v7089_v48 = vld [vmem:[#allocation9 + $0x4e4] sm:$0xf0] }
 0x1ac   : > { %3823 = vmatpush.bf16.msrb.mxu2 %v6182_v62  ;;  %v5699_v18 = vld [vmem:[#allocation9 + $0x120] sm:$0xf0]  ;;  %3788 = vmatmul.bf16.vlgmr.msra.gmra.mxu3 %v8256_v38 }
 0x1ad   : > { %4288 = vst [vmem:[#allocation15 + $0x8] sm:$0xff] %v8247_v25  ;;  %3807 = vmatpush.bf16.msrb.mxu1 %v6022_v57  ;;  %v5702_v10 = vor.u32 %v6964_v9, %v5699_v18  ;;  %v5955_v60 = vld [vmem:[#allocation9 + $0x320] sm:$0xf0] }
 0x1ae   : > { %3795 = vmatpush.bf16.msrb.mxu0 %v5734_v31  ;;  %v7140_v11 = vld [vmem:[#allocation9 + $0x684] sm:$0xf]  ;;  %v5958_v58 = vor.u32 %v7028_v54, %v5955_v60  ;;  %v7185_v31 = vld [vmem:[#allocation9 + $0x7e4] sm:$0xf0] }
 0x1af   : > { %v1978_v33 = vpop.f32.mrf.mxu2  ;;  %3836 = vmatpush.bf16.msrb.mxu3 %v6438_v5  ;;  %v6403_v12 = vld [vmem:[#allocation9 + $0x6a0] sm:$0xf0]  ;;  %v6570_v15 = vor.u32 %v7185_v31, %v6569_v0  ;;  %v7113_v5 = vld [vmem:[#allocation9 + $0x5a4] sm:$0xf0] }
 0x1b0   : > { %3824 = vmatpush.bf16.msrb.mxu2 %v6150_v8  ;;  %v6406_v14 = vor.u32 %v7140_v11, %v6403_v12  ;;  %v7068_v17 = vld [vmem:[#allocation9 + $0x444] sm:$0xf]  ;;  %v6537_v11 = vld [vmem:[#allocation9 + $0x788] sm:$0xf] }
 0x1b1   : > { %3808 = vmatpush.bf16.msrb.mxu1 %v5990_v4  ;;  %v6115_v19 = vld [vmem:[#allocation9 + $0x460] sm:$0xf0]  ;;  %v6281_v4 = vld [vmem:[#allocation9 + $0x588] sm:$0xf] }
 0x1b2   : > { %3796 = vmatpush.bf16.msrb.mxu0 %v5702_v10  ;;  %v6118_v22 = vor.u32 %v7068_v17, %v6115_v19  ;;  %v6956_v29 = vld [vmem:[#allocation9 + $0xc4] sm:$0xf]  ;;  %v6282_v7 = vor.u32 %v7113_v5, %v6281_v4  ;;  %v7177_v12 = vld [vmem:[#allocation9 + $0x7a4] sm:$0xf0] }
 0x1b3   : > { %v5667_v32 = vld [vmem:[#allocation9 + $0xe0] sm:$0xf0]  ;;  %3837 = vmatpush.bf16.msrb.mxu3 %v6406_v14  ;;  %v6538_v19 = vor.u32 %v7177_v12, %v6537_v11  ;;  %v6409_v0 = vld [vmem:[#allocation9 + $0x688] sm:$0xf] }
 0x1b4   : > { %v7020_v33 = vld [vmem:[#allocation9 + $0x2c4] sm:$0xf]  ;;  %v5670_v1 = vor.u32 %v6956_v29, %v5667_v32  ;;  %3825 = vmatpush.bf16.msrb.mxu2 %v6118_v22  ;;  %v6121_v4 = vld [vmem:[#allocation9 + $0x448] sm:$0xf] }
 0x1b5   : > { %3809 = vmatpush.bf16.msrb.mxu1 %v5958_v58  ;;  %v5923_v35 = vld [vmem:[#allocation9 + $0x2e0] sm:$0xf0]  ;;  %v7073_v5 = vld [vmem:[#allocation9 + $0x464] sm:$0xf0] }
 0x1b6   : > { %v7132_v36 = vld [vmem:[#allocation9 + $0x644] sm:$0xf]  ;;  %v5926_v40 = vor.u32 %v7020_v33, %v5923_v35  ;;  %3797 = vmatpush.bf16.msrb.mxu0 %v5670_v1  ;;  %v6505_v1 = vld [vmem:[#allocation9 + $0x748] sm:$0xf] }
 0x1b7   : > { %v6371_v37 = vld [vmem:[#allocation9 + $0x660] sm:$0xf0]  ;;  %v7169_v35 = vld [vmem:[#allocation9 + $0x764] sm:$0xf0] }
 0x1b8   : > { %v6374_v30 = vor.u32 %v7132_v36, %v6371_v37  ;;  %v7060_v41 = vld [vmem:[#allocation9 + $0x404] sm:$0xf]  ;;  %v6217_v36 = vld [vmem:[#allocation9 + $0x508] sm:$0xf]  ;;  %v6506_v37 = vor.u32 %v7169_v35, %v6505_v1  ;;  %v6283_v1 = vld [vmem:[#allocation9 + $0x5a8] sm:$0xf0] }
 0x1b9   : > { %v6083_v42 = vld [vmem:[#allocation9 + $0x420] sm:$0xf0]  ;;  %3810 = vmatpush.bf16.msrb.mxu1 %v5926_v40  ;;  %v2041_v16 = vpop.f32.mrf.mxu3  ;;  %v7137_v12 = vld [vmem:[#allocation9 + $0x664] sm:$0xf0] }
 0x1ba   : > { %v6086_v45 = vor.u32 %v7060_v41, %v6083_v42  ;;  %v6948_v51 = vld [vmem:[#allocation9 + $0x84] sm:$0xf]  ;;  %3838 = vmatpush.bf16.msrb.mxu3 %v6374_v30  ;;  %v6473_v30 = vld [vmem:[#allocation9 + $0x708] sm:$0xf] }
 0x1bb   : > { %v5635_v52 = vld [vmem:[#allocation9 + $0xa0] sm:$0xf0]  ;;  %v7161_v42 = vld [vmem:[#allocation9 + $0x724] sm:$0xf0] }
 0x1bc   : > { %v7012_v53 = vld [vmem:[#allocation9 + $0x284] sm:$0xf]  ;;  %v5638_v56 = vor.u32 %v6948_v51, %v5635_v52  ;;  %3826 = vmatpush.bf16.msrb.mxu2 %v6086_v45  ;;  %v6474_v45 = vor.u32 %v7161_v42, %v6473_v30  ;;  %v6186_v51 = vor.u32 %v7089_v48, %v6185_v47  ;;  %v6539_v30 = vld [vmem:[#allocation9 + $0x7a8] sm:$0xf0]  ;;  %v5801_v42 = vld [vmem:[#allocation9 + $0x1c8] sm:$0xf] }
 0x1bd   : > { %v2002_v20 = vpop.f32.mrf.mxu0  ;;  %v5891_v57 = vld [vmem:[#allocation9 + $0x2a0] sm:$0xf0]  ;;  %v6251_v47 = vld [vmem:[#allocation9 + $0x568] sm:$0xf0] }
 0x1be   : > { %v2003_v27 = vadd.f32 %v2002_v20, %v1990_v13  ;;  %v7124_v26 = vld [vmem:[#allocation9 + $0x604] sm:$0xf]  ;;  %v5894_v62 = vor.u32 %v7012_v53, %v5891_v57  ;;  %3798 = vmatpush.bf16.msrb.mxu0 %v5638_v56  ;;  %v6249_v20 = vld [vmem:[#allocation9 + $0x548] sm:$0xf] }
 0x1bf   : > { %v2015_v28 = vpop.f32.mrf.mxu1  ;;  %v6339_v59 = vld [vmem:[#allocation9 + $0x620] sm:$0xf0]  ;;  %v6441_v56 = vld [vmem:[#allocation9 + $0x6c8] sm:$0xf]  ;;  %3827 = vmatmul.bf16.vlgmr.msrb.gmra.mxu2 %v8254_v49 }
 0x1c0   : > { %v5565_v39 = vmul.f32 -1.442695, %v2003_v27  ;;  %v2016_v44 = vadd.f32 %v2015_v28, %v764_v21  ;;  %v6342_v63 = vor.u32 %v7124_v26, %v6339_v59  ;;  %3871 = vmatpush.bf16.msra.mxu2 %v6314_v50  ;;  %3811 = vmatpush.bf16.msrb.mxu1 %v5894_v62  ;;  %v6940_v8 = vld [vmem:[#allocation9 + $0x44] sm:$0xf]  ;;  %v7105_v21 = vld [vmem:[#allocation9 + $0x564] sm:$0xf0] }
 0x1c1   : > { %v5603_v9 = vld [vmem:[#allocation9 + $0x60] sm:$0xf0]  ;;  %v6250_v28 = vor.u32 %v7105_v21, %v6249_v20  ;;  %v2043_v33 = vpop.f32.mrf.mxu3  ;;  %v7153_v26 = vld [vmem:[#allocation9 + $0x6e4] sm:$0xf0] }
 0x1c2   : > { %7407 = vpow2.f32 %v5565_v39  ;;  %v7004_v18 = vld [vmem:[#allocation9 + $0x244] sm:$0xf]  ;;  %3839 = vmatpush.bf16.msrb.mxu3 %v6342_v63  ;;  %v5606_v10 = vor.u32 %v6940_v8, %v5603_v9  ;;  %v7097_v39 = vld [vmem:[#allocation9 + $0x524] sm:$0xf0]  ;;  %v6442_v62 = vor.u32 %v7153_v26, %v6441_v56  ;;  %v6122_v8 = vor.u32 %v7073_v5, %v6121_v4  ;;  %v7157_v4 = vld [vmem:[#allocation9 + $0x70c] sm:$0xf] }
 0x1c3   : > { %v5859_v60 = vld [vmem:[#allocation9 + $0x260] sm:$0xf0]  ;;  %v6218_v40 = vor.u32 %v7097_v39, %v6217_v36  ;;  %v6153_v59 = vld [vmem:[#allocation9 + $0x488] sm:$0xf]  ;;  %v6475_v5 = vld [vmem:[#allocation9 + $0x728] sm:$0xf0] }
 0x1c4   : > { %v5862_v58 = vor.u32 %v7004_v18, %v5859_v60  ;;  %3799 = vmatpush.bf16.msrb.mxu0 %v5606_v10  ;;  %3872 = vmatpush.bf16.msra.mxu2 %v6282_v7  ;;  %v6932_v22 = vld [vmem:[#allocation9 + $0x4] sm:$0xf]  ;;  %v6377_v60 = vld [vmem:[#allocation9 + $0x648] sm:$0xf] }
 0x1c5   : > { %v2004_v3 = vpop.f32.mrf.mxu0  ;;  %v5571_v23 = vld [vmem:[#allocation9 + $0x20] sm:$0xf0]  ;;  %3840 = vmatmul.bf16.vlgmr.msrb.gmra.mxu3 %v8256_v38  ;;  %v5769_v56 = vld [vmem:[#allocation9 + $0x188] sm:$0xf] }
 0x1c6   : > { %3884 = vmatpush.bf16.msra.mxu3 %v6570_v15  ;;  %3812 = vmatpush.bf16.msrb.mxu1 %v5862_v58  ;;  %v6996_v24 = vld [vmem:[#allocation9 + $0x204] sm:$0xf]  ;;  %v5574_v29 = vor.u32 %v6932_v22, %v5571_v23  ;;  %v6378_v58 = vor.u32 %v7137_v12, %v6377_v60  ;;  %v6345_v23 = vld [vmem:[#allocation9 + $0x608] sm:$0xf] }
 0x1c7   : > { %v2028_v61 = vpop.f32.mrf.mxu2  ;;  %v2017_v6 = vpop.f32.mrf.mxu1  ;;  %v5827_v32 = vld [vmem:[#allocation9 + $0x220] sm:$0xf0]  ;;  %v7041_v60 = vld [vmem:[#allocation9 + $0x364] sm:$0xf0] }
 0x1c8   : > { %v2029_v2 = vadd.f32 %v2028_v61, %v2016_v44  ;;  %v7408_v13 = vpop.eup %7407  ;;  %v5830_v46 = vor.u32 %v6996_v24, %v5827_v32  ;;  %3873 = vmatpush.bf16.msra.mxu2 %v6250_v28  ;;  %3800 = vmatpush.bf16.msrb.mxu0 %v5574_v29  ;;  %v7081_v61 = vld [vmem:[#allocation9 + $0x4a4] sm:$0xf0]  ;;  %v7181_v29 = vld [vmem:[#allocation9 + $0x7cc] sm:$0xf] }
 0x1c9   : > { %v8260_v14 = vadd.f32 1.0, %v7408_v13  ;;  %v6154_v63 = vor.u32 %v7081_v61, %v6153_v59  ;;  %v6089_v13 = vld [vmem:[#allocation9 + $0x408] sm:$0xf]  ;;  %v6571_v32 = vld [vmem:[#allocation9 + $0x7e8] sm:$0xf0] }
 0x1ca   : > { %v2042_v54 = vadd.f32 %v2041_v16, %v2029_v2  ;;  %3885 = vmatpush.bf16.msra.mxu3 %v6538_v19  ;;  %3813 = vmatpush.bf16.msrb.mxu1 %v5830_v46  ;;  %v7145_v2 = vld [vmem:[#allocation9 + $0x6a4] sm:$0xf0]  ;;  %v6315_v19 = vld [vmem:[#allocation9 + $0x5e8] sm:$0xf0]  ;;  %v6574_v33 = vor.u32 %v7181_v29, %v6571_v32 }
 0x1cb   : > { %7409 = vrcp.f32 %v8260_v14  ;;  %v2140_v53 = vand.u32 2147483647, %v8260_v14  ;;  %v2142_v55 = vand.u32 2147483648, %v8260_v14  ;;  %vm2136_vm1 = vweird.f32 %v8260_v14  ;;  %v7129_v24 = vld [vmem:[#allocation9 + $0x624] sm:$0xf0] }
 0x1cc   : > { %v5566_v17 = vmul.f32 -1.442695, %v2042_v54  ;;  %3874 = vmatpush.bf16.msra.mxu2 %v6218_v40  ;;  %v6410_v15 = vor.u32 %v7145_v2, %v6409_v0  ;;  %v6346_v28 = vor.u32 %v7129_v24, %v6345_v23  ;;  %v7109_v46 = vld [vmem:[#allocation9 + $0x58c] sm:$0xf]  ;;  %v6025_v2 = vld [vmem:[#allocation9 + $0x388] sm:$0xf] }
 0x1cd   : > { %v2143_v31 = vor.u32 1.1754944e-38, %v2142_v55  ;;  %vm2141_vm3 = vcmp.eq.f32.partialorder %v2140_v53, 8.507059e+37  ;;  %v6286_v36 = vor.u32 %v7109_v46, %v6283_v1  ;;  %v7173_v40 = vld [vmem:[#allocation9 + $0x78c] sm:$0xf]  ;;  %v5961_v23 = vld [vmem:[#allocation9 + $0x308] sm:$0xf] }
 0x1ce   : > { %7411 = vpow2.f32 %v5566_v17  ;;  %3886 = vmatpush.bf16.msra.mxu3 %v6506_v37  ;;  %v7117_v17 = vld [vmem:[#allocation9 + $0x5cc] sm:$0xf]  ;;  %v7033_v24 = vld [vmem:[#allocation9 + $0x324] sm:$0xf0] }
 0x1cf   : > { %v2030_v27 = vpop.f32.mrf.mxu2  ;;  %7413 = vtanh.f32 %v8188_v34  ;;  %v6318_v22 = vor.u32 %v7117_v17, %v6315_v19  ;;  %v6507_v61 = vld [vmem:[#allocation9 + $0x768] sm:$0xf0]  ;;  %v5705_v19 = vld [vmem:[#allocation9 + $0x108] sm:$0xf] }
 0x1d0   : > { %3875 = vmatpush.bf16.msra.mxu2 %v6186_v51  ;;  %v7057_v51 = vld [vmem:[#allocation9 + $0x3e4] sm:$0xf0]  ;;  %v7141_v29 = vld [vmem:[#allocation9 + $0x68c] sm:$0xf] }
 0x1d1   : > { %v7410_v41 = vpop.eup %7409  ;;  %v6411_v32 = vld [vmem:[#allocation9 + $0x6a8] sm:$0xf0]  ;;  %v5673_v46 = vld [vmem:[#allocation9 + $0xc8] sm:$0xf] }
 0x1d2   : > { %v2132_v44 = vmul.f32 %v7410_v41, %v8260_v14  ;;  %3887 = vmatpush.bf16.msra.mxu3 %v6474_v45  ;;  %vm2137_vm0 = vweird.f32 %v7410_v41  ;;  %v7065_v14 = vld [vmem:[#allocation9 + $0x424] sm:$0xf0]  ;;  %v7101_v45 = vld [vmem:[#allocation9 + $0x54c] sm:$0xf] }
 0x1d3   : > { %vm2138_vm2 = vmor %vm2136_vm1, %vm2137_vm0  ;;  %v6090_v21 = vor.u32 %v7065_v14, %v6089_v13  ;;  %v7149_v13 = vld [vmem:[#allocation9 + $0x6cc] sm:$0xf] }
 0x1d4   : > { %v7412_v43 = vpop.eup %7411  ;;  %v2133_v52 = vsub.f32 1.0, %v2132_v44  ;;  %3876 = vmatpush.bf16.msra.mxu2 %v6154_v63  ;;  %v6993_v44 = vld [vmem:[#allocation9 + $0x1e4] sm:$0xf0]  ;;  %v6219_v63 = vld [vmem:[#allocation9 + $0x528] sm:$0xf0] }
 0x1d5   : > { %v8264_v50 = vadd.f32 1.0, %v7412_v43  ;;  %v7414_v16 = vpop.eup %7413  ;;  %v6542_v43 = vor.u32 %v7173_v40, %v6539_v30  ;;  %v5802_v26 = vor.u32 %v6993_v44, %v5801_v42  ;;  %v7069_v1 = vld [vmem:[#allocation9 + $0x44c] sm:$0xf]  ;;  %v6414_v40 = vor.u32 %v7141_v29, %v6411_v32  ;;  %v5641_v42 = vld [vmem:[#allocation9 + $0x88] sm:$0xf] }
 0x1d6   : > { %v2134_v57 = vmul.f32 %v7410_v41, %v2133_v52  ;;  %3888 = vmatpush.bf16.msra.mxu3 %v6442_v62  ;;  %v6254_v52 = vor.u32 %v7101_v45, %v6251_v47  ;;  %v7093_v62 = vld [vmem:[#allocation9 + $0x50c] sm:$0xf]  ;;  %v6513_v29 = vld [vmem:[#allocation9 + $0x750] sm:$0xf] }
 0x1d7   : > { %7415 = vrcp.f32 %v8264_v50  ;;  %v2155_v54 = vand.u32 2147483647, %v8264_v50  ;;  %v2157_v10 = vand.u32 2147483648, %v8264_v50  ;;  %vm2151_vm5 = vweird.f32 %v8264_v50  ;;  %v6379_v44 = vld [vmem:[#allocation9 + $0x668] sm:$0xf0] }
 0x1d8   : > { %v2135_v34 = vadd.f32 %v7410_v41, %v2134_v57  ;;  %3877 = vmatpush.bf16.msra.mxu2 %v6122_v8  ;;  %7417 = vtanh.f32 %v8247_v25  ;;  %v7165_v57 = vld [vmem:[#allocation9 + $0x74c] sm:$0xf]  ;;  %v5737_v8 = vld [vmem:[#allocation9 + $0x148] sm:$0xf]  ;;  %v7170_v32 = vld [vmem:[#allocation9 + $0x76c] sm:$0xf0] }
 0x1d9   : > { %v2158_v25 = vor.u32 1.1754944e-38, %v2157_v10  ;;  %vm2156_vm7 = vcmp.eq.f32.partialorder %v2155_v54, 8.507059e+37  ;;  %v6977_v54 = vld [vmem:[#allocation9 + $0x164] sm:$0xf0] }
 0x1da   : > { %v2139_v3 = vsel %vm2138_vm2, %v7410_v41, %v2135_v34  ;;  %3889 = vmatpush.bf16.msra.mxu3 %v6410_v15  ;;  %v6222_v15 = vor.u32 %v7093_v62, %v6219_v63  ;;  %v5993_v10 = vld [vmem:[#allocation9 + $0x348] sm:$0xf]  ;;  %v5738_v14 = vor.u32 %v6977_v54, %v5737_v8  ;;  %v6347_v62 = vld [vmem:[#allocation9 + $0x628] sm:$0xf0]  ;;  %v6577_v63 = vld [vmem:[#allocation9 + $0x7d0] sm:$0xf] }
 0x1db   : > { %v2144_v7 = vsel %vm2141_vm3, %v2143_v31, %v2139_v3  ;;  %v6985_v31 = vld [vmem:[#allocation9 + $0x1a4] sm:$0xf0]  ;;  %v6510_v3 = vor.u32 %v7165_v57, %v6507_v61  ;;  %v5994_v17 = vor.u32 %v7041_v60, %v5993_v10  ;;  %v7122_v57 = vld [vmem:[#allocation9 + $0x5ec] sm:$0xf0]  ;;  %v7125_v61 = vld [vmem:[#allocation9 + $0x60c] sm:$0xf] }
 0x1dc   : > { %v2169_v9 = vmul.f32 %v7414_v16, %v2144_v7  ;;  %3878 = vmatpush.bf16.msra.mxu2 %v6090_v21  ;;  %v7049_v16 = vld [vmem:[#allocation9 + $0x3a4] sm:$0xf0]  ;;  %v6155_v21 = vld [vmem:[#allocation9 + $0x4a8] sm:$0xf0]  ;;  %v6545_v54 = vld [vmem:[#allocation9 + $0x790] sm:$0xf] }
 0x1dd   : > { %v7416_v6 = vpop.eup %7415  ;;  %v6026_v7 = vor.u32 %v7049_v16, %v6025_v2  ;;  %v6945_v16 = vld [vmem:[#allocation9 + $0x64] sm:$0xf0]  ;;  %v7178_v10 = vld [vmem:[#allocation9 + $0x7ac] sm:$0xf0] }
 0x1de   : > { %v2147_v18 = vmul.f32 %v7416_v6, %v8264_v50  ;;  %4283 = vst [vmem:[#allocation13] sm:$0xff] %v2169_v9  ;;  %vm2152_vm4 = vweird.f32 %v7416_v6  ;;  %3890 = vmatpush.bf16.msra.mxu3 %v6378_v58  ;;  %v7418_v37 = vpop.eup %7417  ;;  %v6057_v50 = vld [vmem:[#allocation9 + $0x3c8] sm:$0xf]  ;;  %v6443_v58 = vld [vmem:[#allocation9 + $0x6e8] sm:$0xf0] }
 0x1df   : > { %vm2153_vm6 = vmor %vm2151_vm5, %vm2152_vm4  ;;  %3879 = vmatmul.bf16.vlgmr.msra.gmra.mxu2 %v8254_v49  ;;  %v6058_v59 = vor.u32 %v7057_v51, %v6057_v50  ;;  %v7061_v50 = vld [vmem:[#allocation9 + $0x40c] sm:$0xf] }
 0x1e0   : > { %v2148_v11 = vsub.f32 1.0, %v2147_v18  ;;  %3923 = vmatpush.bf16.msrb.mxu2 %v6318_v22  ;;  %v6187_v18 = vld [vmem:[#allocation9 + $0x4e8] sm:$0xf0]  ;;  %v6969_v22 = vld [vmem:[#allocation9 + $0x124] sm:$0xf0] }
 0x1e1   : > { %v6091_v51 = vld [vmem:[#allocation9 + $0x428] sm:$0xf0] }
 0x1e2   : > { %v2149_v20 = vmul.f32 %v7416_v6, %v2148_v11  ;;  %3891 = vmatpush.bf16.msra.mxu3 %v6346_v28  ;;  %v6478_v11 = vor.u32 %v7157_v4, %v6475_v5  ;;  %v7009_v4 = vld [vmem:[#allocation9 + $0x264] sm:$0xf0]  ;;  %v6350_v5 = vor.u32 %v7125_v61, %v6347_v62  ;;  %v6965_v61 = vld [vmem:[#allocation9 + $0x10c] sm:$0xf]  ;;  %v6161_v62 = vld [vmem:[#allocation9 + $0x490] sm:$0xf] }
 0x1e4   : > { %v2150_v27 = vadd.f32 %v7416_v6, %v2149_v20  ;;  %3924 = vmatpush.bf16.msrb.mxu2 %v6286_v36  ;;  %v7077_v20 = vld [vmem:[#allocation9 + $0x48c] sm:$0xf]  ;;  %v6961_v36 = vld [vmem:[#allocation9 + $0xe4] sm:$0xf0] }
 0x1e5   : > { %3892 = vmatmul.bf16.vlgmr.msra.gmra.mxu3 %v8256_v38  ;;  %v6158_v28 = vor.u32 %v7077_v20, %v6155_v21  ;;  %v5674_v45 = vor.u32 %v6961_v36, %v5673_v46  ;;  %v5803_v20 = vld [vmem:[#allocation9 + $0x1e8] sm:$0xf0] }
 0x1e6   : > { %v2154_v35 = vsel %vm2153_vm6, %v7416_v6, %v2150_v27  ;;  %3936 = vmatpush.bf16.msrb.mxu3 %v6574_v33  ;;  %v5770_v6 = vor.u32 %v6985_v31, %v5769_v56  ;;  %v6446_v27 = vor.u32 %v7149_v13, %v6443_v58  ;;  %v5962_v33 = vor.u32 %v7033_v24, %v5961_v23  ;;  %v6321_v56 = vld [vmem:[#allocation9 + $0x5d0] sm:$0xf]  ;;  %v5833_v13 = vld [vmem:[#allocation9 + $0x208] sm:$0xf]  ;;  %v7053_v21 = vld [vmem:[#allocation9 + $0x3cc] sm:$0xf] }
 0x1e7   : > { %v2159_v39 = vsel %vm2156_vm7, %v2158_v25, %v2154_v35  ;;  %v5706_v25 = vor.u32 %v6969_v22, %v5705_v19  ;;  %v6123_v35 = vld [vmem:[#allocation9 + $0x468] sm:$0xf0]  ;;  %v7001_v58 = vld [vmem:[#allocation9 + $0x224] sm:$0xf0]  ;;  %v7106_v19 = vld [vmem:[#allocation9 + $0x56c] sm:$0xf0]  ;;  %v6546_v23 = vor.u32 %v7178_v10, %v6545_v54 }
 0x1e8   : > { %v2170_v41 = vmul.f32 %v7418_v37, %v2159_v39  ;;  %3925 = vmatpush.bf16.msrb.mxu2 %v6254_v52  ;;  %v5929_v37 = vld [vmem:[#allocation9 + $0x2c8] sm:$0xf]  ;;  %v6126_v30 = vor.u32 %v7069_v1, %v6123_v35  ;;  %v6059_v22 = vld [vmem:[#allocation9 + $0x3e8] sm:$0xf0]  ;;  %v6225_v1 = vld [vmem:[#allocation9 + $0x510] sm:$0xf] }
 0x1e9   : > { %v7025_v39 = vld [vmem:[#allocation9 + $0x2e4] sm:$0xf0]  ;;  %v6981_v46 = vld [vmem:[#allocation9 + $0x18c] sm:$0xf]  ;;  %v7098_v35 = vld [vmem:[#allocation9 + $0x52c] sm:$0xf0] }
 0x1ea   : > { %v2171_v48 = vpack.c.bf16 %v2170_v41, %v2169_v9  ;;  %4284 = vst [vmem:[#allocation13 + $0x8] sm:$0xff] %v2170_v41  ;;  %3937 = vmatpush.bf16.msrb.mxu3 %v6542_v43  ;;  %v7085_v9 = vld [vmem:[#allocation9 + $0x4cc] sm:$0xf]  ;;  %v6953_v43 = vld [vmem:[#allocation9 + $0xa4] sm:$0xf0]  ;;  %v5930_v47 = vor.u32 %v7025_v39, %v5929_v37 }
 0x1eb   : > { %v6190_v12 = vor.u32 %v7085_v9, %v6187_v18  ;;  %v7133_v41 = vld [vmem:[#allocation9 + $0x64c] sm:$0xf]  ;;  %v7017_v52 = vld [vmem:[#allocation9 + $0x2a4] sm:$0xf0]  ;;  %v5642_v31 = vor.u32 %v6953_v43, %v5641_v42  ;;  %v7162_v42 = vld [vmem:[#allocation9 + $0x72c] sm:$0xf0] }
 0x1ec   : > { %v2174_v53 = vunpack.c.l.b16 %v2171_v48  ;;  %v2175_v55 = vunpack.c.h.b16 %v2171_v48  ;;  %3926 = vmatpush.bf16.msrb.mxu2 %v6222_v15  ;;  %v5897_v48 = vld [vmem:[#allocation9 + $0x288] sm:$0xf]  ;;  %v7186_v15 = vld [vmem:[#allocation9 + $0x7ec] sm:$0xf0]  ;;  %v5771_v36 = vld [vmem:[#allocation9 + $0x1a8] sm:$0xf0] }
 0x1ed   : > { %v5898_v2 = vor.u32 %v7017_v52, %v5897_v48  ;;  %v6578_v8 = vor.u32 %v7186_v15, %v6577_v63  ;;  %v5577_v18 = vld [vmem:[#allocation9 + $0x8] sm:$0xf]  ;;  %v7045_v37 = vld [vmem:[#allocation9 + $0x38c] sm:$0xf]  ;;  %v5774_v43 = vor.u32 %v6981_v46, %v5771_v36  ;;  %v7090_v48 = vld [vmem:[#allocation9 + $0x4ec] sm:$0xf0] }
 0x1ee   : > { %v8280_v34 = vpack.c.b16 %v2174_v53, %v2174_v53  ;;  %v8282_v0 = vpack.c.b16 %v2175_v55, %v2175_v55  ;;  %3938 = vmatpush.bf16.msrb.mxu3 %v6510_v3  ;;  %v6382_v53 = vor.u32 %v7133_v41, %v6379_v44  ;;  %v6094_v55 = vor.u32 %v7061_v50, %v6091_v51  ;;  %v5865_v3 = vld [vmem:[#allocation9 + $0x248] sm:$0xf]  ;;  %v6027_v39 = vld [vmem:[#allocation9 + $0x3a8] sm:$0xf0]  ;;  %v6481_v41 = vld [vmem:[#allocation9 + $0x710] sm:$0xf] }
 0x1ef   : > { %v6030_v44 = vor.u32 %v7045_v37, %v6027_v39  ;;  %v5739_v50 = vld [vmem:[#allocation9 + $0x168] sm:$0xf0]  ;;  %v7082_v63 = vld [vmem:[#allocation9 + $0x4ac] sm:$0xf0] }
 0x1f0   : > { %3749 = vmatmul.bf16.vlgmr.msra.gmra.mxu0 %v8280_v34  ;;  %3762 = vmatmul.bf16.vlgmr.msra.gmra.mxu1 %v8282_v0  ;;  %v7037_v51 = vld [vmem:[#allocation9 + $0x34c] sm:$0xf]  ;;  %v6162_v15 = vor.u32 %v7082_v63, %v6161_v62  ;;  %v6353_v46 = vld [vmem:[#allocation9 + $0x610] sm:$0xf] }
 0x1f1   : > { %3845 = vmatpush.bf16.msra.mxu0 %v5802_v26  ;;  %3858 = vmatpush.bf16.msra.mxu1 %v6058_v59  ;;  %v6322_v26 = vor.u32 %v7122_v57, %v6321_v56  ;;  %v5609_v59 = vld [vmem:[#allocation9 + $0x48] sm:$0xf]  ;;  %v5995_v52 = vld [vmem:[#allocation9 + $0x368] sm:$0xf0]  ;;  %v6449_v56 = vld [vmem:[#allocation9 + $0x6d0] sm:$0xf] }
 0x1f2   : > { %3939 = vmatpush.bf16.msrb.mxu3 %v6478_v11  ;;  %3927 = vmatpush.bf16.msrb.mxu2 %v6190_v12  ;;  %v5610_v60 = vor.u32 %v6945_v16, %v5609_v59  ;;  %v5866_v11 = vor.u32 %v7009_v4, %v5865_v3  ;;  %v6937_v12 = vld [vmem:[#allocation9 + $0x24] sm:$0xf0]  ;;  %v7154_v57 = vld [vmem:[#allocation9 + $0x6ec] sm:$0xf0]  ;;  %v5998_v59 = vor.u32 %v7037_v51, %v5995_v52  ;;  %v5963_v16 = vld [vmem:[#allocation9 + $0x328] sm:$0xf0] }
 0x1f3   : > { %v6450_v3 = vor.u32 %v7154_v57, %v6449_v56  ;;  %v6417_v4 = vld [vmem:[#allocation9 + $0x690] sm:$0xf]  ;;  %v5675_v54 = vld [vmem:[#allocation9 + $0xe8] sm:$0xf0]  ;;  %v6547_v51 = vld [vmem:[#allocation9 + $0x7b0] sm:$0xf0] }
 0x1f4   : > { %v7021_v10 = vld [vmem:[#allocation9 + $0x2cc] sm:$0xf]  ;;  %v6994_v62 = vld [vmem:[#allocation9 + $0x1ec] sm:$0xf0] }
 0x1f5   : > { %3846 = vmatpush.bf16.msra.mxu0 %v5770_v6  ;;  %3859 = vmatpush.bf16.msra.mxu1 %v6026_v7  ;;  %v6289_v6 = vld [vmem:[#allocation9 + $0x590] sm:$0xf]  ;;  %v5611_v39 = vld [vmem:[#allocation9 + $0x68] sm:$0xf0] }
 0x1f6   : > { %3940 = vmatpush.bf16.msrb.mxu3 %v6446_v27  ;;  %3928 = vmatpush.bf16.msrb.mxu2 %v6158_v28  ;;  %v7114_v7 = vld [vmem:[#allocation9 + $0x5ac] sm:$0xf0]  ;;  %v5578_v27 = vor.u32 %v6937_v12, %v5577_v18  ;;  %v5834_v28 = vor.u32 %v7001_v58, %v5833_v13  ;;  %v6949_v58 = vld [vmem:[#allocation9 + $0x8c] sm:$0xf] }
 0x1f7   : > { %v6290_v9 = vor.u32 %v7114_v7, %v6289_v6  ;;  %v7074_v18 = vld [vmem:[#allocation9 + $0x46c] sm:$0xf0]  ;;  %v6997_v56 = vld [vmem:[#allocation9 + $0x20c] sm:$0xf] }
 0x1f8   : > { %v6385_v13 = vld [vmem:[#allocation9 + $0x650] sm:$0xf]  ;;  %v5835_v57 = vld [vmem:[#allocation9 + $0x228] sm:$0xf0] }
 0x1f9   : > { %3847 = vmatpush.bf16.msra.mxu0 %v5738_v14  ;;  %3860 = vmatpush.bf16.msra.mxu1 %v5994_v17  ;;  %v6989_v14 = vld [vmem:[#allocation9 + $0x1cc] sm:$0xf]  ;;  %v6257_v17 = vld [vmem:[#allocation9 + $0x550] sm:$0xf] }
 0x1fa   : > { %3941 = vmatpush.bf16.msrb.mxu3 %v6414_v40  ;;  %3929 = vmatpush.bf16.msrb.mxu2 %v6126_v30  ;;  %v6258_v24 = vor.u32 %v7106_v19, %v6257_v17  ;;  %v6514_v40 = vor.u32 %v7170_v32, %v6513_v29  ;;  %v6226_v30 = vor.u32 %v7098_v35, %v6225_v1  ;;  %v7138_v17 = vld [vmem:[#allocation9 + $0x66c] sm:$0xf0]  ;;  %v7118_v29 = vld [vmem:[#allocation9 + $0x5d4] sm:$0xf] }
 0x1fb   : > { %v6323_v32 = vld [vmem:[#allocation9 + $0x5f0] sm:$0xf0]  ;;  %v7130_v1 = vld [vmem:[#allocation9 + $0x62c] sm:$0xf0] }
 0x1fc   : > { %v7182_v35 = vld [vmem:[#allocation9 + $0x7d4] sm:$0xf]  ;;  %v6065_v63 = vld [vmem:[#allocation9 + $0x3d0] sm:$0xf] }
 0x1fd   : > { %3848 = vmatpush.bf16.msra.mxu0 %v5706_v25  ;;  %3861 = vmatpush.bf16.msra.mxu1 %v5962_v33  ;;  %v5806_v25 = vor.u32 %v6989_v14, %v5803_v20  ;;  %v6062_v33 = vor.u32 %v7053_v21, %v6059_v22  ;;  %v5643_v14 = vld [vmem:[#allocation9 + $0xa8] sm:$0xf0]  ;;  %v6097_v22 = vld [vmem:[#allocation9 + $0x410] sm:$0xf] }
 0x1fe   : > { %3942 = vmatpush.bf16.msrb.mxu3 %v6382_v53  ;;  %3930 = vmatpush.bf16.msrb.mxu2 %v6094_v55  ;;  %v6482_v53 = vor.u32 %v7162_v42, %v6481_v41  ;;  %v7013_v21 = vld [vmem:[#allocation9 + $0x28c] sm:$0xf]  ;;  %v5646_v36 = vor.u32 %v6949_v58, %v5643_v14  ;;  %v6354_v42 = vor.u32 %v7130_v1, %v6353_v46  ;;  %v6483_v58 = vld [vmem:[#allocation9 + $0x730] sm:$0xf0]  ;;  %v5713_v46 = vld [vmem:[#allocation9 + $0x110] sm:$0xf] }
 0x1ff   : > { %v5867_v41 = vld [vmem:[#allocation9 + $0x268] sm:$0xf0]  ;;  %v7078_v1 = vld [vmem:[#allocation9 + $0x494] sm:$0xf] }
 0x200   : > { %3801 = vmatmul.bf16.vlgmr.msrb.gmra.mxu0 %v8280_v34  ;;  %3814 = vmatmul.bf16.vlgmr.msrb.gmra.mxu1 %v8282_v0 }
 0x201   : > { %3849 = vmatpush.bf16.msra.mxu0 %v5674_v45  ;;  %3862 = vmatpush.bf16.msra.mxu1 %v5930_v47  ;;  %v6973_v45 = vld [vmem:[#allocation9 + $0x14c] sm:$0xf]  ;;  %v6193_v47 = vld [vmem:[#allocation9 + $0x4d0] sm:$0xf] }
 0x202   : > { %3975 = vmatpush.bf16.msra.mxu2 %v6322_v26  ;;  %3943 = vmatpush.bf16.msrb.mxu3 %v6350_v5  ;;  %v6194_v55 = vor.u32 %v7090_v48, %v6193_v47  ;;  %v5742_v26 = vor.u32 %v6973_v45, %v5739_v50  ;;  %v7146_v5 = vld [vmem:[#allocation9 + $0x6ac] sm:$0xf0]  ;;  %v6933_v48 = vld [vmem:[#allocation9 + $0xc] sm:$0xf]  ;;  %v7174_v50 = vld [vmem:[#allocation9 + $0x794] sm:$0xf] }
 0x203   : > { %3931 = vmatmul.bf16.vlgmr.msrb.gmra.mxu2 %v8254_v49 }
 0x205   : > { %3850 = vmatpush.bf16.msra.mxu0 %v5642_v31  ;;  %3863 = vmatpush.bf16.msra.mxu1 %v5898_v2  ;;  %v5707_v31 = vld [vmem:[#allocation9 + $0x128] sm:$0xf0] }
 0x206   : > { %3988 = vmatpush.bf16.msra.mxu3 %v6578_v8  ;;  %3976 = vmatpush.bf16.msra.mxu2 %v6290_v9  ;;  %v7029_v2 = vld [vmem:[#allocation9 + $0x30c] sm:$0xf]  ;;  %v5710_v6 = vor.u32 %v6965_v61, %v5707_v31  ;;  %v6129_v9 = vld [vmem:[#allocation9 + $0x450] sm:$0xf]  ;;  %v6259_v61 = vld [vmem:[#allocation9 + $0x570] sm:$0xf0] }
 0x207   : > { %3944 = vmatmul.bf16.vlgmr.msrb.gmra.mxu3 %v8256_v38  ;;  %v5966_v7 = vor.u32 %v7029_v2, %v5963_v16  ;;  %v6957_v8 = vld [vmem:[#allocation9 + $0xcc] sm:$0xf]  ;;  %v6130_v12 = vor.u32 %v7074_v18, %v6129_v9  ;;  %v7058_v31 = vld [vmem:[#allocation9 + $0x3ec] sm:$0xf0]  ;;  %v6550_v2 = vor.u32 %v7174_v50, %v6547_v51  ;;  %v7094_v9 = vld [vmem:[#allocation9 + $0x514] sm:$0xf] }
 0x208   : > { %v5678_v19 = vor.u32 %v6957_v8, %v5675_v54  ;;  %v5777_v8 = vld [vmem:[#allocation9 + $0x190] sm:$0xf]  ;;  %v6227_v18 = vld [vmem:[#allocation9 + $0x530] sm:$0xf0] }
 0x209   : > { %3851 = vmatpush.bf16.msra.mxu0 %v5610_v60  ;;  %3864 = vmatpush.bf16.msra.mxu1 %v5866_v11  ;;  %v5931_v60 = vld [vmem:[#allocation9 + $0x2e8] sm:$0xf0]  ;;  %v6418_v11 = vor.u32 %v7146_v5, %v6417_v4  ;;  %v7166_v4 = vld [vmem:[#allocation9 + $0x754] sm:$0xf]  ;;  %v6986_v54 = vld [vmem:[#allocation9 + $0x1ac] sm:$0xf0] }
 0x20a   : > { %3989 = vmatpush.bf16.msra.mxu3 %v6546_v23  ;;  %3977 = vmatpush.bf16.msra.mxu2 %v6258_v24  ;;  %v5934_v20 = vor.u32 %v7021_v10, %v5931_v60  ;;  %v7066_v23 = vld [vmem:[#allocation9 + $0x42c] sm:$0xf0]  ;;  %v5899_v24 = vld [vmem:[#allocation9 + $0x2a8] sm:$0xf0]  ;;  %v6515_v5 = vld [vmem:[#allocation9 + $0x770] sm:$0xf0]  ;;  %v5778_v14 = vor.u32 %v6986_v54, %v5777_v8 }
 0x20b   : > { %v5902_v37 = vor.u32 %v7013_v21, %v5899_v24  ;;  %v6033_v10 = vld [vmem:[#allocation9 + $0x390] sm:$0xf]  ;;  %v6195_v21 = vld [vmem:[#allocation9 + $0x4f0] sm:$0xf0] }
 0x20c   : > { %v7050_v60 = vld [vmem:[#allocation9 + $0x3ac] sm:$0xf0]  ;;  %v7126_v8 = vld [vmem:[#allocation9 + $0x614] sm:$0xf] }
 0x20d   : > { %3852 = vmatpush.bf16.msra.mxu0 %v5578_v27  ;;  %3865 = vmatpush.bf16.msra.mxu1 %v5834_v28  ;;  %v6386_v27 = vor.u32 %v7138_v17, %v6385_v13  ;;  %v6098_v28 = vor.u32 %v7066_v23, %v6097_v22  ;;  %v7158_v13 = vld [vmem:[#allocation9 + $0x714] sm:$0xf]  ;;  %v6034_v17 = vor.u32 %v7050_v60, %v6033_v10  ;;  %v6978_v22 = vld [vmem:[#allocation9 + $0x16c] sm:$0xf0] }
 0x20e   : > { %3990 = vmatpush.bf16.msra.mxu3 %v6514_v40  ;;  %3978 = vmatpush.bf16.msra.mxu2 %v6226_v30  ;;  %v7005_v40 = vld [vmem:[#allocation9 + $0x24c] sm:$0xf]  ;;  %v6579_v30 = vld [vmem:[#allocation9 + $0x7f0] sm:$0xf0]  ;;  %v6001_v23 = vld [vmem:[#allocation9 + $0x350] sm:$0xf] }
 0x20f   : > { %v6582_v45 = vor.u32 %v7182_v35, %v6579_v30  ;;  %v7042_v24 = vld [vmem:[#allocation9 + $0x36c] sm:$0xf0]  ;;  %v6163_v35 = vld [vmem:[#allocation9 + $0x4b0] sm:$0xf0] }
 0x210   : > { %3853 = vmatmul.bf16.vlgmr.msra.gmra.mxu0 %v8280_v34  ;;  %3866 = vmatmul.bf16.vlgmr.msra.gmra.mxu1 %v8282_v0  ;;  %v6166_v30 = vor.u32 %v7078_v1, %v6163_v35  ;;  %v6962_v50 = vld [vmem:[#allocation9 + $0xec] sm:$0xf0]  ;;  %v5811_v1 = vld [vmem:[#allocation9 + $0x1f0] sm:$0xf0] }
 0x211   : > { %3897 = vmatpush.bf16.msrb.mxu0 %v5806_v25  ;;  %3910 = vmatpush.bf16.msrb.mxu1 %v6062_v33  ;;  %v6326_v25 = vor.u32 %v7118_v29, %v6323_v32  ;;  %v6941_v33 = vld [vmem:[#allocation9 + $0x4c] sm:$0xf]  ;;  %v7150_v29 = vld [vmem:[#allocation9 + $0x6d4] sm:$0xf]  ;;  %v5937_v51 = vld [vmem:[#allocation9 + $0x2d0] sm:$0xf] }
 0x212   : > { %3991 = vmatpush.bf16.msra.mxu3 %v6482_v53  ;;  %3979 = vmatpush.bf16.msra.mxu2 %v6194_v55  ;;  %v5614_v52 = vor.u32 %v6941_v33, %v5611_v39  ;;  %v5870_v53 = vor.u32 %v7005_v40, %v5867_v41  ;;  %v5579_v55 = vld [vmem:[#allocation9 + $0x28] sm:$0xf0]  ;;  %v6451_v32 = vld [vmem:[#allocation9 + $0x6f0] sm:$0xf0]  ;;  %v6002_v33 = vor.u32 %v7042_v24, %v6001_v23  ;;  %v7034_v39 = vld [vmem:[#allocation9 + $0x32c] sm:$0xf0] }
 0x213   : > { %v6454_v40 = vor.u32 %v7150_v29, %v6451_v32  ;;  %v7142_v41 = vld [vmem:[#allocation9 + $0x694] sm:$0xf]  ;;  %v6946_v60 = vld [vmem:[#allocation9 + $0x6c] sm:$0xf0]  ;;  %v7179_v23 = vld [vmem:[#allocation9 + $0x7b4] sm:$0xf0] }
 0x214   : > { %v5841_v29 = vld [vmem:[#allocation9 + $0x210] sm:$0xf]  ;;  %v7054_v35 = vld [vmem:[#allocation9 + $0x3d4] sm:$0xf] }
 0x215   : > { %3898 = vmatpush.bf16.msrb.mxu0 %v5774_v43  ;;  %3911 = vmatpush.bf16.msrb.mxu1 %v6030_v44  ;;  %v7110_v43 = vld [vmem:[#allocation9 + $0x594] sm:$0xf]  ;;  %v7002_v32 = vld [vmem:[#allocation9 + $0x22c] sm:$0xf0] }
 0x216   : > { %3992 = vmatpush.bf16.msra.mxu3 %v6450_v3  ;;  %3980 = vmatpush.bf16.msra.mxu2 %v6162_v15  ;;  %v6291_v44 = vld [vmem:[#allocation9 + $0x5b0] sm:$0xf0]  ;;  %v5582_v3 = vor.u32 %v6933_v48, %v5579_v55  ;;  %v5838_v15 = vor.u32 %v6997_v56, %v5835_v57  ;;  %v5649_v57 = vld [vmem:[#allocation9 + $0x90] sm:$0xf] }
 0x217   : > { %v6294_v47 = vor.u32 %v7110_v43, %v6291_v44  ;;  %v6131_v48 = vld [vmem:[#allocation9 + $0x470] sm:$0xf0] }
 0x218   : > { %v7134_v56 = vld [vmem:[#allocation9 + $0x654] sm:$0xf] }
 0x219   : > { %3899 = vmatpush.bf16.msrb.mxu0 %v5742_v26  ;;  %3912 = vmatpush.bf16.msrb.mxu1 %v5998_v59  ;;  %v5809_v26 = vld [vmem:[#allocation9 + $0x1d0] sm:$0xf]  ;;  %v7102_v59 = vld [vmem:[#allocation9 + $0x554] sm:$0xf] }
 0x21a   : > { %3993 = vmatpush.bf16.msra.mxu3 %v6418_v11  ;;  %3981 = vmatpush.bf16.msra.mxu2 %v6130_v12  ;;  %v6262_v16 = vor.u32 %v7102_v59, %v6259_v61  ;;  %v6518_v11 = vor.u32 %v7166_v4, %v6515_v5  ;;  %v6230_v12 = vor.u32 %v7094_v9, %v6227_v18  ;;  %v6387_v59 = vld [vmem:[#allocation9 + $0x670] sm:$0xf0]  ;;  %v6329_v4 = vld [vmem:[#allocation9 + $0x5d8] sm:$0xf] }
 0x21b   : > { %v7123_v5 = vld [vmem:[#allocation9 + $0x5f4] sm:$0xf0]  ;;  %v6355_v9 = vld [vmem:[#allocation9 + $0x630] sm:$0xf0] }
 0x21c   : > { %v6585_v18 = vld [vmem:[#allocation9 + $0x7d8] sm:$0xf] }
 0x21d   : > { %3900 = vmatpush.bf16.msrb.mxu0 %v5710_v6  ;;  %3913 = vmatpush.bf16.msrb.mxu1 %v5966_v7  ;;  %v5810_v6 = vor.u32 %v6994_v62, %v5809_v26  ;;  %v6066_v7 = vor.u32 %v7058_v31, %v6065_v63  ;;  %v6954_v26 = vld [vmem:[#allocation9 + $0xac] sm:$0xf0]  ;;  %v7062_v31 = vld [vmem:[#allocation9 + $0x414] sm:$0xf] }
 0x21e   : > { %3994 = vmatpush.bf16.msra.mxu3 %v6386_v27  ;;  %3982 = vmatpush.bf16.msra.mxu2 %v6098_v28  ;;  %v6486_v27 = vor.u32 %v7158_v13, %v6483_v58  ;;  %v5905_v63 = vld [vmem:[#allocation9 + $0x290] sm:$0xf]  ;;  %v5650_v54 = vor.u32 %v6954_v26, %v5649_v57  ;;  %v6358_v58 = vor.u32 %v7126_v8, %v6355_v9  ;;  %v7163_v57 = vld [vmem:[#allocation9 + $0x734] sm:$0xf0]  ;;  %v6966_v9 = vld [vmem:[#allocation9 + $0x114] sm:$0xf] }
 0x21f   : > { %v7010_v13 = vld [vmem:[#allocation9 + $0x26c] sm:$0xf0] }
 0x221   : > { %3901 = vmatpush.bf16.msrb.mxu0 %v5678_v19  ;;  %3914 = vmatpush.bf16.msrb.mxu1 %v5934_v20  ;;  %v5745_v19 = vld [vmem:[#allocation9 + $0x150] sm:$0xf]  ;;  %v7086_v20 = vld [vmem:[#allocation9 + $0x4d4] sm:$0xf] }
 0x222   : > { %4027 = vmatpush.bf16.msrb.mxu2 %v6326_v25  ;;  %3995 = vmatpush.bf16.msra.mxu3 %v6354_v42  ;;  %v6198_v28 = vor.u32 %v7086_v20, %v6195_v21  ;;  %v5746_v25 = vor.u32 %v6978_v22, %v5745_v19  ;;  %v6419_v42 = vld [vmem:[#allocation9 + $0x6b0] sm:$0xf0]  ;;  %v5585_v21 = vld [vmem:[#allocation9 + $0x10] sm:$0xf]  ;;  %v6553_v22 = vld [vmem:[#allocation9 + $0x798] sm:$0xf] }
 0x223   : > { %3983 = vmatmul.bf16.vlgmr.msra.gmra.mxu2 %v8254_v49 }
 0x225   : > { %3902 = vmatpush.bf16.msrb.mxu0 %v5646_v36  ;;  %3915 = vmatpush.bf16.msrb.mxu1 %v5902_v37  ;;  %v6970_v36 = vld [vmem:[#allocation9 + $0x12c] sm:$0xf0] }
 0x226   : > { %4040 = vmatpush.bf16.msrb.mxu3 %v6582_v45  ;;  %4028 = vmatpush.bf16.msrb.mxu2 %v6294_v47  ;;  %v5969_v37 = vld [vmem:[#allocation9 + $0x310] sm:$0xf]  ;;  %v5714_v43 = vor.u32 %v6970_v36, %v5713_v46  ;;  %v7070_v47 = vld [vmem:[#allocation9 + $0x454] sm:$0xf]  ;;  %v7107_v46 = vld [vmem:[#allocation9 + $0x574] sm:$0xf0] }
 0x227   : > { %3996 = vmatmul.bf16.vlgmr.msra.gmra.mxu3 %v8256_v38  ;;  %v5970_v44 = vor.u32 %v7034_v39, %v5969_v37  ;;  %v5681_v45 = vld [vmem:[#allocation9 + $0xd0] sm:$0xf]  ;;  %v6134_v55 = vor.u32 %v7070_v47, %v6131_v48  ;;  %v6067_v36 = vld [vmem:[#allocation9 + $0x3f0] sm:$0xf0]  ;;  %v6554_v37 = vor.u32 %v7179_v23, %v6553_v22  ;;  %v6233_v47 = vld [vmem:[#allocation9 + $0x518] sm:$0xf] }
 0x228   : > { %v5682_v61 = vor.u32 %v6962_v50, %v5681_v45  ;;  %v6982_v45 = vld [vmem:[#allocation9 + $0x194] sm:$0xf]  ;;  %v7099_v48 = vld [vmem:[#allocation9 + $0x534] sm:$0xf0] }
 0x229   : > { %3903 = vmatpush.bf16.msrb.mxu0 %v5614_v52  ;;  %3916 = vmatpush.bf16.msrb.mxu1 %v5870_v53  ;;  %v7026_v52 = vld [vmem:[#allocation9 + $0x2ec] sm:$0xf0]  ;;  %v6422_v53 = vor.u32 %v7142_v41, %v6419_v42  ;;  %v6521_v41 = vld [vmem:[#allocation9 + $0x758] sm:$0xf]  ;;  %v5779_v50 = vld [vmem:[#allocation9 + $0x1b0] sm:$0xf0] }
 0x22a   : > { %4041 = vmatpush.bf16.msrb.mxu3 %v6550_v2  ;;  %4029 = vmatpush.bf16.msrb.mxu2 %v6262_v16  ;;  %v5938_v62 = vor.u32 %v7026_v52, %v5937_v51  ;;  %v6099_v2 = vld [vmem:[#allocation9 + $0x430] sm:$0xf0]  ;;  %v7018_v16 = vld [vmem:[#allocation9 + $0x2ac] sm:$0xf0]  ;;  %v7171_v42 = vld [vmem:[#allocation9 + $0x774] sm:$0xf0]  ;;  %v5782_v26 = vor.u32 %v6982_v45, %v5779_v50 }
 0x22b   : > { %v5906_v10 = vor.u32 %v7018_v16, %v5905_v63  ;;  %v7046_v51 = vld [vmem:[#allocation9 + $0x394] sm:$0xf]  ;;  %v7091_v63 = vld [vmem:[#allocation9 + $0x4f4] sm:$0xf0]  ;;  %v7119_v45 = vld [vmem:[#allocation9 + $0x5dc] sm:$0xf] }
 0x22c   : > { %v6035_v52 = vld [vmem:[#allocation9 + $0x3b0] sm:$0xf0]  ;;  %v6137_v22 = vld [vmem:[#allocation9 + $0x458] sm:$0xf] }
 0x22d   : > { %3904 = vmatpush.bf16.msrb.mxu0 %v5582_v3  ;;  %3917 = vmatpush.bf16.msrb.mxu1 %v5838_v15  ;;  %v6390_v3 = vor.u32 %v7134_v56, %v6387_v59  ;;  %v6102_v15 = vor.u32 %v7062_v31, %v6099_v2  ;;  %v6489_v56 = vld [vmem:[#allocation9 + $0x718] sm:$0xf]  ;;  %v6038_v59 = vor.u32 %v7046_v51, %v6035_v52  ;;  %v5747_v31 = vld [vmem:[#allocation9 + $0x170] sm:$0xf0] }
 0x22e   : > { %4042 = vmatpush.bf16.msrb.mxu3 %v6518_v11  ;;  %4030 = vmatpush.bf16.msrb.mxu2 %v6230_v12  ;;  %v5873_v11 = vld [vmem:[#allocation9 + $0x250] sm:$0xf]  ;;  %v7187_v12 = vld [vmem:[#allocation9 + $0x7f4] sm:$0xf0]  ;;  %v7038_v2 = vld [vmem:[#allocation9 + $0x354] sm:$0xf] }
 0x22f   : > { %v6586_v19 = vor.u32 %v7187_v12, %v6585_v18  ;;  %v6003_v16 = vld [vmem:[#allocation9 + $0x370] sm:$0xf0]  ;;  %v6169_v18 = vld [vmem:[#allocation9 + $0x498] sm:$0xf]  ;;  %v8302_v12 = vpop.f32.mrf.mxu3 }
 0x230   : > { %3905 = vmatmul.bf16.vlgmr.msrb.gmra.mxu0 %v8280_v34  ;;  %3918 = vmatmul.bf16.vlgmr.msrb.gmra.mxu1 %v8282_v0  ;;  %v6006_v8 = vor.u32 %v7038_v2, %v6003_v16  ;;  %v7075_v23 = vld [vmem:[#allocation9 + $0x474] sm:$0xf0]  ;;  %v6942_v50 = vld [vmem:[#allocation9 + $0x54] sm:$0xf] }
 0x231   : > { %3949 = vmatpush.bf16.msra.mxu0 %v5810_v6  ;;  %3962 = vmatpush.bf16.msra.mxu1 %v6066_v7  ;;  %v6330_v6 = vor.u32 %v7123_v5, %v6329_v4  ;;  %v5617_v7 = vld [vmem:[#allocation9 + $0x50] sm:$0xf]  ;;  %v8300_v4 = vpop.f32.mrf.mxu2  ;;  %v6457_v5 = vld [vmem:[#allocation9 + $0x6d8] sm:$0xf]  ;;  %v5619_v51 = vld [vmem:[#allocation9 + $0x70] sm:$0xf0] }
 0x232   : > { %4043 = vmatpush.bf16.msrb.mxu3 %v6486_v27  ;;  %4031 = vmatpush.bf16.msrb.mxu2 %v6198_v28  ;;  %v5618_v24 = vor.u32 %v6946_v60, %v5617_v7  ;;  %v5874_v27 = vor.u32 %v7010_v13, %v5873_v11  ;;  %v6938_v28 = vld [vmem:[#allocation9 + $0x2c] sm:$0xf0]  ;;  %v7030_v60 = vld [vmem:[#allocation9 + $0x314] sm:$0xf]  ;;  %v6361_v52 = vld [vmem:[#allocation9 + $0x618] sm:$0xf] }
 0x233   : > { %v5971_v11 = vld [vmem:[#allocation9 + $0x330] sm:$0xf0] }
 0x235   : > { %3950 = vmatpush.bf16.msra.mxu0 %v5778_v14  ;;  %3963 = vmatpush.bf16.msra.mxu1 %v6034_v17  ;;  %v6297_v14 = vld [vmem:[#allocation9 + $0x598] sm:$0xf] }
 0x236   : > { %4044 = vmatpush.bf16.msrb.mxu3 %v6454_v40  ;;  %4032 = vmatpush.bf16.msrb.mxu2 %v6166_v30  ;;  %v7115_v17 = vld [vmem:[#allocation9 + $0x5b4] sm:$0xf0]  ;;  %v5586_v40 = vor.u32 %v6938_v28, %v5585_v21  ;;  %v5842_v30 = vor.u32 %v7002_v32, %v5841_v29  ;;  %v6958_v21 = vld [vmem:[#allocation9 + $0xd4] sm:$0xf]  ;;  %v6138_v32 = vor.u32 %v7075_v23, %v6137_v22  ;;  %v7167_v22 = vld [vmem:[#allocation9 + $0x75c] sm:$0xf] }
 0x237   : > { %v6298_v20 = vor.u32 %v7115_v17, %v6297_v14  ;;  %v6425_v14 = vld [vmem:[#allocation9 + $0x698] sm:$0xf]  ;;  %v5939_v28 = vld [vmem:[#allocation9 + $0x2f0] sm:$0xf0] }
 0x238   : > { %v7147_v17 = vld [vmem:[#allocation9 + $0x6b4] sm:$0xf0] }
 0x239   : > { %3951 = vmatpush.bf16.msra.mxu0 %v5746_v25  ;;  %3964 = vmatpush.bf16.msra.mxu1 %v6002_v33  ;;  %v6990_v25 = vld [vmem:[#allocation9 + $0x1d4] sm:$0xf]  ;;  %v6265_v33 = vld [vmem:[#allocation9 + $0x558] sm:$0xf]  ;;  %v6426_v29 = vor.u32 %v7147_v17, %v6425_v14 }
 0x23a   : > { %4045 = vmatpush.bf16.msrb.mxu3 %v6422_v53  ;;  %4033 = vmatpush.bf16.msrb.mxu2 %v6134_v55  ;;  %v6266_v39 = vor.u32 %v7107_v46, %v6265_v33  ;;  %v6522_v53 = vor.u32 %v7171_v42, %v6521_v41  ;;  %v6234_v55 = vor.u32 %v7099_v48, %v6233_v47  ;;  %v6950_v33 = vld [vmem:[#allocation9 + $0x94] sm:$0xf]  ;;  %v3791_v42 = vpop.f32.mrf.mxu3  ;;  %v6331_v47 = vld [vmem:[#allocation9 + $0x5f8] sm:$0xf0] }
 0x23b   : > { %v5651_v46 = vld [vmem:[#allocation9 + $0xb0] sm:$0xf0]  ;;  %v6334_v48 = vor.u32 %v7119_v45, %v6331_v47  ;;  %v8313_v42 = vld [vmem:[%s8566_s13] sm:$0xff]  ;;  %v6979_v45 = vld [vmem:[#allocation9 + $0x174] sm:$0xf0] }
 0x23c   : > { %v5907_v41 = vld [vmem:[#allocation9 + $0x2b0] sm:$0xf0]  ;;  %v6009_v47 = vld [vmem:[#allocation9 + $0x358] sm:$0xf] }
 0x23d   : > { %3952 = vmatpush.bf16.msra.mxu0 %v5714_v43  ;;  %3965 = vmatpush.bf16.msra.mxu1 %v5970_v44  ;;  %v5814_v43 = vor.u32 %v6990_v25, %v5811_v1  ;;  %v6070_v44 = vor.u32 %v7054_v35, %v6067_v36  ;;  %v3778_v25 = vpop.f32.mrf.mxu2  ;;  %v6393_v1 = vld [vmem:[#allocation9 + $0x658] sm:$0xf] }
 0x23e   : > { %4046 = vmatpush.bf16.msrb.mxu3 %v6390_v3  ;;  %4034 = vmatpush.bf16.msrb.mxu2 %v6102_v15  ;;  %v6490_v3 = vor.u32 %v7163_v57, %v6489_v56  ;;  %v7139_v35 = vld [vmem:[#allocation9 + $0x674] sm:$0xf0]  ;;  %v7006_v57 = vld [vmem:[#allocation9 + $0x254] sm:$0xf] }
 0x23f   : > { %v6041_v25 = vld [vmem:[#allocation9 + $0x398] sm:$0xf] }
 0x241   : > { %3953 = vmatpush.bf16.msra.mxu0 %v5682_v61  ;;  %3966 = vmatpush.bf16.msra.mxu1 %v5938_v62  ;;  %v6974_v61 = vld [vmem:[#allocation9 + $0x154] sm:$0xf]  ;;  %v6201_v62 = vld [vmem:[#allocation9 + $0x4d8] sm:$0xf] }
 0x242   : > { %4079 = vmatpush.bf16.msra.mxu2 %v6330_v6  ;;  %4047 = vmatpush.bf16.msrb.mxu3 %v6358_v58  ;;  %v6202_v15 = vor.u32 %v7091_v63, %v6201_v62  ;;  %v7155_v6 = vld [vmem:[#allocation9 + $0x6f4] sm:$0xf0]  ;;  %v5750_v7 = vor.u32 %v6974_v61, %v5747_v31  ;;  %v5875_v61 = vld [vmem:[#allocation9 + $0x270] sm:$0xf0]  ;;  %v7111_v63 = vld [vmem:[#allocation9 + $0x59c] sm:$0xf] }
 0x243   : > { %4035 = vmatmul.bf16.vlgmr.msrb.gmra.mxu2 %v8254_v49  ;;  %v6458_v13 = vor.u32 %v7155_v6, %v6457_v5  ;;  %v6299_v31 = vld [vmem:[#allocation9 + $0x5b8] sm:$0xf0]  ;;  %v5622_v6 = vor.u32 %v6942_v50, %v5619_v51 }
 0x244   : > { %v6302_v16 = vor.u32 %v7111_v63, %v6299_v31  ;;  %v6555_v5 = vld [vmem:[#allocation9 + $0x7b8] sm:$0xf0]  ;;  %v5977_v63 = vld [vmem:[#allocation9 + $0x318] sm:$0xf] }
 0x245   : > { %3954 = vmatpush.bf16.msra.mxu0 %v5650_v54  ;;  %3967 = vmatpush.bf16.msra.mxu1 %v5906_v10  ;;  %v7083_v54 = vld [vmem:[#allocation9 + $0x4b4] sm:$0xf0]  ;;  %v5715_v10 = vld [vmem:[#allocation9 + $0x130] sm:$0xf0] }
 0x246   : > { %4092 = vmatpush.bf16.msra.mxu3 %v6586_v19  ;;  %4080 = vmatpush.bf16.msra.mxu2 %v6298_v20  ;;  %v6170_v58 = vor.u32 %v7083_v54, %v6169_v18  ;;  %v5718_v19 = vor.u32 %v6966_v9, %v5715_v10  ;;  %v5974_v20 = vor.u32 %v7030_v60, %v5971_v11  ;;  %v6998_v9 = vld [vmem:[#allocation9 + $0x214] sm:$0xf]  ;;  %v5817_v54 = vld [vmem:[#allocation9 + $0x1d8] sm:$0xf]  ;;  %v7103_v10 = vld [vmem:[#allocation9 + $0x55c] sm:$0xf] }
 0x247   : > { %4048 = vmatmul.bf16.vlgmr.msrb.gmra.mxu3 %v8256_v38  ;;  %v5843_v18 = vld [vmem:[#allocation9 + $0x230] sm:$0xf0]  ;;  %v6267_v60 = vld [vmem:[#allocation9 + $0x578] sm:$0xf0]  ;;  %v6995_v11 = vld [vmem:[#allocation9 + $0x1f4] sm:$0xf0] }
 0x248   : > { %v6270_v17 = vor.u32 %v7103_v10, %v6267_v60  ;;  %v5818_v23 = vor.u32 %v6995_v11, %v5817_v54  ;;  %v7035_v31 = vld [vmem:[#allocation9 + $0x334] sm:$0xf0]  ;;  %v7071_v10 = vld [vmem:[#allocation9 + $0x45c] sm:$0xf] }
 0x249   : > { %3955 = vmatpush.bf16.msra.mxu0 %v5618_v24  ;;  %3968 = vmatpush.bf16.msra.mxu1 %v5874_v27  ;;  %v5683_v24 = vld [vmem:[#allocation9 + $0xf0] sm:$0xf0]  ;;  %v5689_v54 = vld [vmem:[#allocation9 + $0xd8] sm:$0xf]  ;;  %v6139_v60 = vld [vmem:[#allocation9 + $0x478] sm:$0xf0] }
 0x24a   : > { %4093 = vmatpush.bf16.msra.mxu3 %v6554_v37  ;;  %4081 = vmatpush.bf16.msra.mxu2 %v6266_v39  ;;  %v7022_v27 = vld [vmem:[#allocation9 + $0x2d4] sm:$0xf]  ;;  %v5686_v36 = vor.u32 %v6958_v21, %v5683_v24  ;;  %v5785_v21 = vld [vmem:[#allocation9 + $0x198] sm:$0xf] }
 0x24b   : > { %v5942_v37 = vor.u32 %v7022_v27, %v5939_v28  ;;  %v7014_v39 = vld [vmem:[#allocation9 + $0x294] sm:$0xf]  ;;  %v6523_v27 = vld [vmem:[#allocation9 + $0x778] sm:$0xf0] }
 0x24c   : > { %v5910_v56 = vor.u32 %v7014_v39, %v5907_v41  ;;  %v7095_v28 = vld [vmem:[#allocation9 + $0x51c] sm:$0xf] }
 0x24d   : > { %3956 = vmatpush.bf16.msra.mxu0 %v5586_v40  ;;  %3969 = vmatpush.bf16.msra.mxu1 %v5842_v30  ;;  %v6105_v40 = vld [vmem:[#allocation9 + $0x418] sm:$0xf]  ;;  %v7159_v39 = vld [vmem:[#allocation9 + $0x71c] sm:$0xf] }
 0x24e   : > { %4094 = vmatpush.bf16.msra.mxu3 %v6522_v53  ;;  %4082 = vmatpush.bf16.msra.mxu2 %v6234_v55  ;;  %v7067_v30 = vld [vmem:[#allocation9 + $0x434] sm:$0xf0]  ;;  %v5654_v55 = vor.u32 %v6950_v33, %v5651_v46  ;;  %v8306_v46 = vpop.f32.mrf.mxu2 }
 0x24f   : > { %v7131_v53 = vld [vmem:[#allocation9 + $0x634] sm:$0xf0] }
 0x250   : > { %3957 = vmatmul.bf16.vlgmr.msra.gmra.mxu0 %v8280_v34  ;;  %3970 = vmatmul.bf16.vlgmr.msra.gmra.mxu1 %v8282_v0  ;;  %v6362_v62 = vor.u32 %v7131_v53, %v6361_v52  ;;  %v7051_v33 = vld [vmem:[#allocation9 + $0x3b4] sm:$0xf0]  ;;  %v2445_v52 = vperm.slane %v8313_v42, 0  ;;  %v7151_v53 = vld [vmem:[#allocation9 + $0x6dc] sm:$0xf] }
 0x251   : > { %4001 = vmatpush.bf16.msrb.mxu0 %v5814_v43  ;;  %4014 = vmatpush.bf16.msrb.mxu1 %v6070_v44  ;;  %v6394_v43 = vor.u32 %v7139_v35, %v6393_v1  ;;  %v6106_v44 = vor.u32 %v7067_v30, %v6105_v40  ;;  %v6526_v1 = vor.u32 %v7167_v22, %v6523_v27  ;;  %v6491_v40 = vld [vmem:[#allocation9 + $0x738] sm:$0xf0]  ;;  %v5657_v27 = vld [vmem:[#allocation9 + $0x98] sm:$0xf] }
 0x252   : > { %4095 = vmatpush.bf16.msra.mxu3 %v6490_v3  ;;  %4083 = vmatpush.bf16.msra.mxu2 %v6202_v15  ;;  %v6934_v3 = vld [vmem:[#allocation9 + $0x14] sm:$0xf]  ;;  %v7175_v15 = vld [vmem:[#allocation9 + $0x79c] sm:$0xf]  ;;  %v6042_v41 = vor.u32 %v7051_v33, %v6041_v25  ;;  %v6494_v50 = vor.u32 %v7159_v39, %v6491_v40  ;;  %v6955_v25 = vld [vmem:[#allocation9 + $0xb4] sm:$0xf0] }
 0x253   : > { %v6558_v14 = vor.u32 %v7175_v15, %v6555_v5  ;;  %v7143_v5 = vld [vmem:[#allocation9 + $0x69c] sm:$0xf]  ;;  %v5913_v33 = vld [vmem:[#allocation9 + $0x298] sm:$0xf] }
 0x254   : > { %v6395_v22 = vld [vmem:[#allocation9 + $0x678] sm:$0xf0] }
 0x255   : > { %4002 = vmatpush.bf16.msrb.mxu0 %v5782_v26  ;;  %4015 = vmatpush.bf16.msrb.mxu1 %v6038_v59  ;;  %v7183_v26 = vld [vmem:[#allocation9 + $0x7dc] sm:$0xf] }
 0x256   : > { %4096 = vmatpush.bf16.msra.mxu3 %v6458_v13  ;;  %4084 = vmatpush.bf16.msra.mxu2 %v6170_v58  ;;  %v6587_v59 = vld [vmem:[#allocation9 + $0x7f8] sm:$0xf0]  ;;  %v6073_v13 = vld [vmem:[#allocation9 + $0x3d8] sm:$0xf] }
 0x257   : > { %v6590_v2 = vor.u32 %v7183_v26, %v6587_v59  ;;  %v7059_v58 = vld [vmem:[#allocation9 + $0x3f4] sm:$0xf0]  ;;  %v7079_v59 = vld [vmem:[#allocation9 + $0x49c] sm:$0xf] }
 0x258   : > { %v6074_v24 = vor.u32 %v7059_v58, %v6073_v13  ;;  %v5721_v26 = vld [vmem:[#allocation9 + $0x118] sm:$0xf] }
 0x259   : > { %4003 = vmatpush.bf16.msrb.mxu0 %v5750_v7  ;;  %4016 = vmatpush.bf16.msrb.mxu1 %v6006_v8  ;;  %v5878_v7 = vor.u32 %v7006_v57, %v5875_v61  ;;  %v5587_v8 = vld [vmem:[#allocation9 + $0x30] sm:$0xf0]  ;;  %v6171_v61 = vld [vmem:[#allocation9 + $0x4b8] sm:$0xf0]  ;;  %v6963_v13 = vld [vmem:[#allocation9 + $0xf4] sm:$0xf0] }
 0x25a   : > { %4097 = vmatpush.bf16.msra.mxu3 %v6426_v29  ;;  %4085 = vmatpush.bf16.msra.mxu2 %v6138_v32  ;;  %v6235_v29 = vld [vmem:[#allocation9 + $0x538] sm:$0xf0]  ;;  %v6987_v32 = vld [vmem:[#allocation9 + $0x1b4] sm:$0xf0] }
 0x25b   : > { %v6238_v35 = vor.u32 %v7095_v28, %v6235_v29  ;;  %v5786_v30 = vor.u32 %v6987_v32, %v5785_v21  ;;  %v5945_v58 = vld [vmem:[#allocation9 + $0x2d8] sm:$0xf]  ;;  %v7135_v21 = vld [vmem:[#allocation9 + $0x65c] sm:$0xf] }
 0x25c   : > { %v7063_v28 = vld [vmem:[#allocation9 + $0x41c] sm:$0xf] }
 0x25d   : > { %4004 = vmatpush.bf16.msrb.mxu0 %v5718_v19  ;;  %4017 = vmatpush.bf16.msrb.mxu1 %v5974_v20  ;;  %v5590_v19 = vor.u32 %v6934_v3, %v5587_v8  ;;  %v5846_v20 = vor.u32 %v6998_v9, %v5843_v18  ;;  %v6174_v3 = vor.u32 %v7079_v59, %v6171_v61  ;;  %v6107_v29 = vld [vmem:[#allocation9 + $0x438] sm:$0xf0]  ;;  %v5849_v59 = vld [vmem:[#allocation9 + $0x218] sm:$0xf] }
 0x25e   : > { %4098 = vmatpush.bf16.msra.mxu3 %v6394_v43  ;;  %4086 = vmatpush.bf16.msra.mxu2 %v6106_v44  ;;  %v7087_v43 = vld [vmem:[#allocation9 + $0x4dc] sm:$0xf]  ;;  %v5978_v18 = vor.u32 %v7035_v31, %v5977_v63  ;;  %v6110_v39 = vor.u32 %v7063_v28, %v6107_v29  ;;  %v7003_v61 = vld [vmem:[#allocation9 + $0x234] sm:$0xf0] }
 0x25f   : > { %v6203_v44 = vld [vmem:[#allocation9 + $0x4f8] sm:$0xf0] }
 0x260   : > { %v6206_v51 = vor.u32 %v7087_v43, %v6203_v44  ;;  %v6363_v43 = vld [vmem:[#allocation9 + $0x638] sm:$0xf0] }
 0x261   : > { %4005 = vmatpush.bf16.msrb.mxu0 %v5686_v36  ;;  %4018 = vmatpush.bf16.msrb.mxu1 %v5942_v37  ;;  %v5753_v36 = vld [vmem:[#allocation9 + $0x158] sm:$0xf]  ;;  %v8308_v37 = vpop.f32.mrf.mxu3  ;;  %v5819_v31 = vld [vmem:[#allocation9 + $0x1f8] sm:$0xf0] }
 0x262   : > { %4131 = vmatpush.bf16.msrb.mxu2 %v6334_v48  ;;  %4099 = vmatpush.bf16.msra.mxu3 %v6362_v62  ;;  %v7043_v48 = vld [vmem:[#allocation9 + $0x374] sm:$0xf0]  ;;  %v5723_v28 = vld [vmem:[#allocation9 + $0x138] sm:$0xf0] }
 0x263   : > { %4087 = vmatmul.bf16.vlgmr.msra.gmra.mxu2 %v8254_v49  ;;  %v6010_v57 = vor.u32 %v7043_v48, %v6009_v47  ;;  %v6971_v62 = vld [vmem:[#allocation9 + $0x134] sm:$0xf0]  ;;  %v7031_v29 = vld [vmem:[#allocation9 + $0x31c] sm:$0xf] }
 0x264   : > { %v5722_v9 = vor.u32 %v6971_v62, %v5721_v26  ;;  %v5625_v48 = vld [vmem:[#allocation9 + $0x58] sm:$0xf]  ;;  %v6991_v62 = vld [vmem:[#allocation9 + $0x1dc] sm:$0xf] }
 0x265   : > { %4006 = vmatpush.bf16.msrb.mxu0 %v5654_v55  ;;  %4019 = vmatpush.bf16.msrb.mxu1 %v5910_v56  ;;  %v6459_v55 = vld [vmem:[#allocation9 + $0x6f8] sm:$0xf0]  ;;  %v5754_v56 = vor.u32 %v6979_v45, %v5753_v36  ;;  %v6398_v36 = vor.u32 %v7135_v21, %v6395_v22  ;;  %v5658_v45 = vor.u32 %v6955_v25, %v5657_v27  ;;  %v6939_v26 = vld [vmem:[#allocation9 + $0x34] sm:$0xf0]  ;;  %v2447_v25 = vperm.slane %v8313_v42, 2 }
 0x266   : > { %4144 = vmatpush.bf16.msrb.mxu3 %v6590_v2  ;;  %4132 = vmatpush.bf16.msrb.mxu2 %v6302_v16  ;;  %v3830_v2 = vpop.f32.mrf.mxu2  ;;  %v6462_v16 = vor.u32 %v7151_v53, %v6459_v55  ;;  %v6011_v21 = vld [vmem:[#allocation9 + $0x378] sm:$0xf0] }
 0x267   : > { %4100 = vmatmul.bf16.vlgmr.msra.gmra.mxu3 %v8256_v38  ;;  %v7055_v2 = vld [vmem:[#allocation9 + $0x3dc] sm:$0xf] }
 0x268   : > { %v6967_v27 = vld [vmem:[#allocation9 + $0x11c] sm:$0xf] }
 0x269   : > { %4007 = vmatpush.bf16.msrb.mxu0 %v5622_v6  ;;  %4020 = vmatpush.bf16.msrb.mxu1 %v5878_v7  ;;  %v3843_v15 = vpop.f32.mrf.mxu3  ;;  %v6427_v6 = vld [vmem:[#allocation9 + $0x6b8] sm:$0xf0] }
 0x26a   : > { %4145 = vmatpush.bf16.msrb.mxu3 %v6558_v14  ;;  %4133 = vmatpush.bf16.msrb.mxu2 %v6270_v17  ;;  %v7027_v14 = vld [vmem:[#allocation9 + $0x2f4] sm:$0xf0]  ;;  %v6430_v17 = vor.u32 %v7143_v5, %v6427_v6 }
 0x26d   : > { %4008 = vmatpush.bf16.msrb.mxu0 %v5590_v19  ;;  %4021 = vmatpush.bf16.msrb.mxu1 %v5846_v20  ;;  %v3750_v7 = vpop.f32.mrf.mxu0  ;;  %v3763_v8 = vpop.f32.mrf.mxu1  ;;  %v6142_v19 = vor.u32 %v7071_v10, %v6139_v60  ;;  %v5787_v10 = vld [vmem:[#allocation9 + $0x1b8] sm:$0xf0] }
 0x26e   : > { %4146 = vmatpush.bf16.msrb.mxu3 %v6526_v1  ;;  %4134 = vmatpush.bf16.msrb.mxu2 %v6238_v35  ;;  %v3751_v11 = vadd.f32 %v3750_v7, %v2445_v52  ;;  %v7019_v1 = vld [vmem:[#allocation9 + $0x2b4] sm:$0xf0]  ;;  %v8319_v35 = vpop.f32.mrf.mxu2  ;;  %v5850_v7 = vor.u32 %v7003_v61, %v5849_v59  ;;  %v7047_v60 = vld [vmem:[#allocation9 + $0x39c] sm:$0xf] }
 0x26f   : > { %v5914_v47 = vor.u32 %v7019_v1, %v5913_v33  ;;  %v7011_v52 = vld [vmem:[#allocation9 + $0x274] sm:$0xf0]  ;;  %v6959_v1 = vld [vmem:[#allocation9 + $0xdc] sm:$0xf] }
 0x270   : > { %4009 = vmatmul.bf16.vlgmr.msrb.gmra.mxu0 %v8280_v34  ;;  %4022 = vmatmul.bf16.vlgmr.msrb.gmra.mxu1 %v8282_v0  ;;  %v3764_v20 = vadd.f32 %v3763_v8, %v3751_v11  ;;  %v6943_v59 = vld [vmem:[#allocation9 + $0x5c] sm:$0xf] }
 0x271   : > { %4053 = vmatpush.bf16.msra.mxu0 %v5818_v23  ;;  %4066 = vmatpush.bf16.msra.mxu1 %v6074_v24  ;;  %v5690_v23 = vor.u32 %v6963_v13, %v5689_v54  ;;  %v5946_v24 = vor.u32 %v7027_v14, %v5945_v58  ;;  %v6983_v54 = vld [vmem:[#allocation9 + $0x19c] sm:$0xf] }
 0x272   : > { %4147 = vmatpush.bf16.msrb.mxu3 %v6494_v50  ;;  %4135 = vmatpush.bf16.msrb.mxu2 %v6206_v51  ;;  %v3777_v32 = vadd.f32 %v8300_v4, %v3764_v20  ;;  %v6947_v50 = vld [vmem:[#allocation9 + $0x74] sm:$0xf0]  ;;  %v5790_v58 = vor.u32 %v6983_v54, %v5787_v10  ;;  %v7039_v20 = vld [vmem:[#allocation9 + $0x35c] sm:$0xf]  ;;  %v2448_v10 = vperm.slane %v8313_v42, 3 }
 0x273   : > { %v5881_v51 = vld [vmem:[#allocation9 + $0x258] sm:$0xf]  ;;  %v5627_v61 = vld [vmem:[#allocation9 + $0x78] sm:$0xf0] }
 0x274   : > { %v8322_v40 = vadd.f32 %v8302_v12, %v3777_v32  ;;  %v5626_v12 = vor.u32 %v6947_v50, %v5625_v48  ;;  %v5882_v55 = vor.u32 %v7011_v52, %v5881_v51  ;;  %v5979_v32 = vld [vmem:[#allocation9 + $0x338] sm:$0xf0] }
 0x275   : > { %4054 = vmatpush.bf16.msra.mxu0 %v5786_v30  ;;  %4067 = vmatpush.bf16.msra.mxu1 %v6042_v41  ;;  %v8324_v30 = vpop.f32.mrf.mxu3  ;;  %v7127_v41 = vld [vmem:[#allocation9 + $0x61c] sm:$0xf]  ;;  %v3752_v44 = vpop.f32.mrf.mxu0  ;;  %v5982_v33 = vor.u32 %v7031_v29, %v5979_v32 }
 0x276   : > { %4148 = vmatpush.bf16.msrb.mxu3 %v6462_v16  ;;  %4136 = vmatpush.bf16.msrb.mxu2 %v6174_v3  ;;  %v3765_v4 = vpop.f32.mrf.mxu1  ;;  %v6366_v53 = vor.u32 %v7127_v41, %v6363_v43  ;;  %v3882_v63 = vpop.f32.mrf.mxu2  ;;  %v6075_v16 = vld [vmem:[#allocation9 + $0x3f8] sm:$0xf0] }
 0x277   : > { %v5947_v41 = vld [vmem:[#allocation9 + $0x2f8] sm:$0xf0] }
 0x278   : > { %v6951_v48 = vld [vmem:[#allocation9 + $0x9c] sm:$0xf] }
 0x279   : > { %4055 = vmatpush.bf16.msra.mxu0 %v5754_v56  ;;  %4068 = vmatpush.bf16.msra.mxu1 %v6010_v57  ;;  %v2446_v56 = vperm.slane %v8313_v42, 1  ;;  %v5593_v57 = vld [vmem:[#allocation9 + $0x18] sm:$0xf]  ;;  %v5659_v51 = vld [vmem:[#allocation9 + $0xb8] sm:$0xf0] }
 0x27a   : > { %4149 = vmatpush.bf16.msrb.mxu3 %v6430_v17  ;;  %4137 = vmatpush.bf16.msrb.mxu2 %v6142_v19  ;;  %v5594_v6 = vor.u32 %v6939_v26, %v5593_v57  ;;  %v6975_v17 = vld [vmem:[#allocation9 + $0x15c] sm:$0xf]  ;;  %v5662_v57 = vor.u32 %v6951_v48, %v5659_v51 }
 0x27b   : > { %v5755_v19 = vld [vmem:[#allocation9 + $0x178] sm:$0xf0] }
 0x27c   : > { %v7015_v52 = vld [vmem:[#allocation9 + $0x29c] sm:$0xf] }
 0x27d   : > { %4056 = vmatpush.bf16.msra.mxu0 %v5722_v9  ;;  %4069 = vmatpush.bf16.msra.mxu1 %v5978_v18  ;;  %v3895_v3 = vpop.f32.mrf.mxu3  ;;  %v3802_v15 = vpop.f32.mrf.mxu0  ;;  %v5822_v9 = vor.u32 %v6991_v62, %v5819_v31  ;;  %v6078_v18 = vor.u32 %v7055_v2, %v6075_v16  ;;  %v7007_v62 = vld [vmem:[#allocation9 + $0x25c] sm:$0xf] }
 0x27e   : > { %4150 = vmatpush.bf16.msrb.mxu3 %v6398_v36  ;;  %4138 = vmatpush.bf16.msrb.mxu2 %v6110_v39  ;;  %v3815_v5 = vpop.f32.mrf.mxu1  ;;  %v3803_v8 = vadd.f32 %v3802_v15, %v2446_v56  ;;  %v5691_v36 = vld [vmem:[#allocation9 + $0xf8] sm:$0xf0]  ;;  %v5630_v3 = vor.u32 %v6943_v59, %v5627_v61 }
 0x27f   : > { %v7023_v39 = vld [vmem:[#allocation9 + $0x2dc] sm:$0xf] }
 0x280   : > { %v3816_v11 = vadd.f32 %v3815_v5, %v3803_v8  ;;  %v5883_v63 = vld [vmem:[#allocation9 + $0x278] sm:$0xf0] }
 0x281   : > { %4057 = vmatpush.bf16.msra.mxu0 %v5690_v23  ;;  %4070 = vmatpush.bf16.msra.mxu1 %v5946_v24  ;;  %v6014_v24 = vor.u32 %v7039_v20, %v6011_v21  ;;  %v5886_v15 = vor.u32 %v7007_v62, %v5883_v63  ;;  %v6935_v5 = vld [vmem:[#allocation9 + $0x1c] sm:$0xf] }
 0x282   : > { %4151 = vmatpush.bf16.msrb.mxu3 %v6366_v53  ;;  %4139 = vmatmul.bf16.vlgmr.msrb.gmra.mxu2 %v8254_v49  ;;  %v6043_v49 = vld [vmem:[#allocation9 + $0x3b8] sm:$0xf0]  ;;  %v3829_v13 = vadd.f32 %v8306_v46, %v3816_v11  ;;  %v5758_v46 = vor.u32 %v6975_v17, %v5755_v19 }
 0x283   : > { %v6046_v14 = vor.u32 %v7047_v60, %v6043_v49  ;;  %v5915_v53 = vld [vmem:[#allocation9 + $0x2b8] sm:$0xf0]  ;;  %v6591_v60 = vmul.f32 -1.442695, %v8322_v40 }
 0x284   : > { %v8331_v22 = vadd.f32 %v8308_v37, %v3829_v13  ;;  %v5726_v37 = vor.u32 %v6967_v27, %v5723_v28  ;;  %v5918_v26 = vor.u32 %v7015_v52, %v5915_v53  ;;  %v5851_v8 = vld [vmem:[#allocation9 + $0x238] sm:$0xf0] }
 0x285   : > { %4058 = vmatpush.bf16.msra.mxu0 %v5658_v45  ;;  %4071 = vmatpush.bf16.msra.mxu1 %v5914_v47  ;;  %v5694_v45 = vor.u32 %v6959_v1, %v5691_v36  ;;  %v5950_v47 = vor.u32 %v7023_v39, %v5947_v41 }
 0x286   : > { %4152 = vmatmul.bf16.vlgmr.msrb.gmra.mxu3 %v8256_v38  ;;  %v3804_v38 = vpop.f32.mrf.mxu0  ;;  %v3817_v23 = vpop.f32.mrf.mxu1  ;;  %v6592_v1 = vmul.f32 -1.442695, %v8331_v22 }
 0x287   : > { %v3932_v50 = vpop.f32.mrf.mxu2 }
 0x289   : > { %4059 = vmatpush.bf16.msra.mxu0 %v5626_v12  ;;  %4072 = vmatpush.bf16.msra.mxu1 %v5882_v55 }
 0x28a   : > { %v3945_v12 = vpop.f32.mrf.mxu3 }
 0x28d   : > { %4060 = vmatpush.bf16.msra.mxu0 %v5594_v6  ;;  %4073 = vmatpush.bf16.msra.mxu1 %v5850_v7  ;;  %v5595_v7 = vld [vmem:[#allocation9 + $0x38] sm:$0xf0] }
 0x28e   : > { %v3854_v43 = vpop.f32.mrf.mxu0  ;;  %v3867_v44 = vpop.f32.mrf.mxu1 }
 0x28f   : > { %v3855_v4 = vadd.f32 %v3854_v43, %v2447_v25  ;;  %v3934_v6 = vpop.f32.mrf.mxu2 }
 0x290   : > { %4061 = vmatmul.bf16.vlgmr.msra.gmra.mxu0 %v8280_v34  ;;  %4074 = vmatmul.bf16.vlgmr.msra.gmra.mxu1 %v8282_v0  ;;  %v553_v6 = vld [vmem:[#allocation15 + $0x10] sm:$0xff] }
 0x291   : > { %4105 = vmatpush.bf16.msrb.mxu0 %v5822_v9  ;;  %4118 = vmatpush.bf16.msrb.mxu1 %v6078_v18  ;;  %v3868_v55 = vadd.f32 %v3867_v44, %v3855_v4  ;;  %v5598_v18 = vor.u32 %v6935_v5, %v5595_v7 }
 0x292   : > { %v3947_v9 = vpop.f32.mrf.mxu3 }
 0x293   : > { %v3881_v56 = vadd.f32 %v8319_v35, %v3868_v55  ;;  %v6999_v35 = vld [vmem:[#allocation9 + $0x21c] sm:$0xf] }
 0x294   : > { %v5854_v54 = vor.u32 %v6999_v35, %v5851_v8 }
 0x295   : > { %4106 = vmatpush.bf16.msrb.mxu0 %v5790_v58  ;;  %4119 = vmatpush.bf16.msrb.mxu1 %v6046_v14  ;;  %v3894_v31 = vadd.f32 %v8324_v30, %v3881_v56 }
 0x296   : > { %v3856_v2 = vpop.f32.mrf.mxu0  ;;  %v3869_v16 = vpop.f32.mrf.mxu1 }
 0x297   : > { %v6593_v30 = vmul.f32 -1.442695, %v3894_v31 }
 0x299   : > { %4107 = vmatpush.bf16.msrb.mxu0 %v5758_v46  ;;  %4120 = vmatpush.bf16.msrb.mxu1 %v6014_v24  ;;  %7419 = vpow2.f32 %v6593_v30 }
 0x29a   : > { %7421 = vpow2.f32 %v6591_v60 }
 0x29d   : > { %4108 = vmatpush.bf16.msrb.mxu0 %v5726_v37  ;;  %4121 = vmatpush.bf16.msrb.mxu1 %v5982_v33  ;;  %v2449_v37 = vperm.slane %v8313_v42, 4 }
 0x29f   : > { %v7420_v20 = vpop.eup %7419 }
 0x2a0   : > { %v7422_v23 = vpop.eup %7421  ;;  %v4201_v46 = vadd.f32 1.0, %v7420_v20 }
 0x2a1   : > { %4109 = vmatpush.bf16.msrb.mxu0 %v5694_v45  ;;  %4122 = vmatpush.bf16.msrb.mxu1 %v5950_v47  ;;  %v4163_v27 = vadd.f32 1.0, %v7422_v23 }
 0x2a2   : > { %7423 = vrcp.f32 %v4201_v46  ;;  %v4214_v53 = vand.u32 2147483648, %v4201_v46  ;;  %vm4208_vm9 = vweird.f32 %v4201_v46  ;;  %v4212_v22 = vand.u32 2147483647, %v4201_v46 }
 0x2a3   : > { %7425 = vrcp.f32 %v4163_v27  ;;  %v4176_v61 = vand.u32 2147483648, %v4163_v27  ;;  %vm4170_vm12 = vweird.f32 %v4163_v27  ;;  %v4174_v31 = vand.u32 2147483647, %v4163_v27 }
 0x2a4   : > { %vm4213_vm14 = vcmp.eq.f32.partialorder %v4212_v22, 8.507059e+37 }
 0x2a5   : > { %4110 = vmatpush.bf16.msrb.mxu0 %v5662_v57  ;;  %4123 = vmatpush.bf16.msrb.mxu1 %v5918_v26  ;;  %v4177_v7 = vor.u32 1.1754944e-38, %v4176_v61  ;;  %vm4175_vm15 = vcmp.eq.f32.partialorder %v4174_v31, 8.507059e+37 }
 0x2a6   : > { %v3984_v58 = vpop.f32.mrf.mxu2 }
 0x2a8   : > { %v7424_v40 = vpop.eup %7423 }
 0x2a9   : > { %4111 = vmatpush.bf16.msrb.mxu0 %v5630_v3  ;;  %4124 = vmatpush.bf16.msrb.mxu1 %v5886_v15  ;;  %v7426_v28 = vpop.eup %7425  ;;  %v4204_v29 = vmul.f32 %v7424_v40, %v4201_v46  ;;  %vm4209_vm8 = vweird.f32 %v7424_v40  ;;  %v4215_v3 = vor.u32 1.1754944e-38, %v4214_v53 }
 0x2aa   : > { %v3997_v14 = vpop.f32.mrf.mxu3  ;;  %v4166_v32 = vmul.f32 %v7426_v28, %v4163_v27  ;;  %vm4171_vm10 = vweird.f32 %v7426_v28  ;;  %vm8344_vm11 = vmor %vm4208_vm9, %vm4209_vm8 }
 0x2ab   : > { %v4205_v33 = vsub.f32 1.0, %v4204_v29  ;;  %vm4172_vm13 = vmor %vm4170_vm12, %vm4171_vm10 }
 0x2ac   : > { %v4167_v41 = vsub.f32 1.0, %v4166_v32 }
 0x2ad   : > { %4112 = vmatpush.bf16.msrb.mxu0 %v5598_v18  ;;  %4125 = vmatpush.bf16.msrb.mxu1 %v5854_v54  ;;  %v3906_v49 = vpop.f32.mrf.mxu0  ;;  %v3919_v11 = vpop.f32.mrf.mxu1  ;;  %v4206_v4 = vmul.f32 %v7424_v40, %v4205_v33 }
 0x2ae   : > { %v3907_v13 = vadd.f32 %v3906_v49, %v2448_v10  ;;  %v4168_v48 = vmul.f32 %v7426_v28, %v4167_v41 }
 0x2af   : > { %v4207_v51 = vadd.f32 %v7424_v40, %v4206_v4 }
 0x2b0   : > { %4113 = vmatmul.bf16.vlgmr.msrb.gmra.mxu0 %v8280_v34  ;;  %4126 = vmatmul.bf16.vlgmr.msrb.gmra.mxu1 %v8282_v0  ;;  %v3920_v17 = vadd.f32 %v3919_v11, %v3907_v13  ;;  %v3986_v0 = vpop.f32.mrf.mxu2  ;;  %v4169_v55 = vadd.f32 %v7426_v28, %v4168_v48  ;;  %v2450_v13 = vperm.slane %v8313_v42, 5 }
 0x2b1   : > { %v4211_v2 = vsel %vm8344_vm11, %v7424_v40, %v4207_v51 }
 0x2b2   : > { %v3933_v19 = vadd.f32 %v3932_v50, %v3920_v17  ;;  %v3999_v24 = vpop.f32.mrf.mxu3  ;;  %v4173_v5 = vsel %vm4172_vm13, %v7426_v28, %v4169_v55  ;;  %v4216_v35 = vsel %vm4213_vm14, %v4215_v3, %v4211_v2 }
 0x2b3   : > { %v4178_v9 = vsel %vm4175_vm15, %v4177_v7, %v4173_v5  ;;  %v4273_v18 = vmul.f32 %v4216_v35, %v553_v6  ;;  %v2452_v6 = vperm.slane %v8313_v42, 7 }
 0x2b4   : > { %v3946_v21 = vadd.f32 %v3945_v12, %v3933_v19 }
 0x2b5   : > { %v3908_v38 = vpop.f32.mrf.mxu0  ;;  %v3921_v34 = vpop.f32.mrf.mxu1 }
 0x2b6   : > { %v6594_v25 = vmul.f32 -1.442695, %v3946_v21 }
 0x2b8   : > { %7427 = vpow2.f32 %v6594_v25 }
 0x2b9   : > { %7429 = vpow2.f32 %v6592_v1 }
 0x2be   : > { %v7428_v52 = vpop.eup %7427 }
 0x2bf   : > { %v7430_v26 = vpop.eup %7429  ;;  %v4202_v63 = vadd.f32 1.0, %v7428_v52 }
 0x2c0   : > { %v4164_v15 = vadd.f32 1.0, %v7430_v26 }
 0x2c1   : > { %v4229_v27 = vand.u32 2147483648, %v4202_v63  ;;  %vm4223_vm1 = vweird.f32 %v4202_v63  ;;  %v4227_v29 = vand.u32 2147483647, %v4202_v63 }
 0x2c2   : > { %vm4185_vm4 = vweird.f32 %v4164_v15  ;;  %v4189_v1 = vand.u32 2147483647, %v4164_v15 }
 0x2c3   : > { %v4230_v41 = vor.u32 1.1754944e-38, %v4229_v27  ;;  %vm4228_vm6 = vcmp.eq.f32.partialorder %v4227_v29, 8.507059e+37 }
 0x2c4   : > { %vm4190_vm7 = vcmp.eq.f32.partialorder %v4189_v1, 8.507059e+37 }
 0x2c6   : > { %v4036_v44 = vpop.f32.mrf.mxu2 }
 0x2ca   : > { %v4049_v45 = vpop.f32.mrf.mxu3 }
 0x2cd   : > { %v3958_v36 = vpop.f32.mrf.mxu0  ;;  %v3971_v39 = vpop.f32.mrf.mxu1 }
 0x2ce   : > { %v3959_v43 = vadd.f32 %v3958_v36, %v2449_v37  ;;  %v4038_v62 = vpop.f32.mrf.mxu2  ;;  %v4191_v37 = vand.u32 2147483648, %v4164_v15 }
 0x2d0   : > { %v3972_v47 = vadd.f32 %v3971_v39, %v3959_v43  ;;  %v4192_v4 = vor.u32 1.1754944e-38, %v4191_v37 }
 0x2d2   : > { %v3985_v50 = vadd.f32 %v3984_v58, %v3972_v47  ;;  %v4051_v16 = vpop.f32.mrf.mxu3 }
 0x2d4   : > { %v3998_v12 = vadd.f32 %v3997_v14, %v3985_v50 }
 0x2d5   : > { %v3960_v56 = vpop.f32.mrf.mxu0  ;;  %v3973_v57 = vpop.f32.mrf.mxu1 }
 0x2d6   : > { %7431 = vtanh.f32 %v3998_v12  ;;  %v2451_v12 = vperm.slane %v8313_v42, 6 }
 0x2d7   : > { %7433 = vrcp.f32 %v4202_v63 }
 0x2d8   : > { %7435 = vrcp.f32 %v4164_v15 }
 0x2dc   : > { %v7432_v8 = vpop.eup %7431 }
 0x2dd   : > { %v4275_v54 = vmul.f32 %v7432_v8, %v4178_v9  ;;  %v7434_v10 = vpop.eup %7433 }
 0x2de   : > { %v7436_v60 = vpop.eup %7435  ;;  %v4219_v49 = vmul.f32 %v7434_v10, %v4202_v63  ;;  %vm4224_vm0 = vweird.f32 %v7434_v10 }
 0x2df   : > { %v8351_v30 = vadd.f32 %v4275_v54, %v4273_v18  ;;  %v4181_v11 = vmul.f32 %v7436_v60, %v4164_v15  ;;  %vm4186_vm2 = vweird.f32 %v7436_v60  ;;  %vm4225_vm3 = vmor %vm4223_vm1, %vm4224_vm0 }
 0x2e0   : > { %v4220_v58 = vsub.f32 1.0, %v4219_v49  ;;  %vm4187_vm5 = vmor %vm4185_vm4, %vm4186_vm2 }
 0x2e1   : > { %4289 = vst [vmem:[#allocation15 + $0x10] sm:$0xff] %v8351_v30  ;;  %v4182_v14 = vsub.f32 1.0, %v4181_v11 }
 0x2e2   : > { %v4221_v38 = vmul.f32 %v7434_v10, %v4220_v58 }
 0x2e3   : > { %v4183_v0 = vmul.f32 %v7436_v60, %v4182_v14 }
 0x2e4   : > { %v4222_v24 = vadd.f32 %v7434_v10, %v4221_v38 }
 0x2e5   : > { %v4184_v28 = vadd.f32 %v7436_v60, %v4183_v0 }
 0x2e6   : > { %v4088_v21 = vpop.f32.mrf.mxu2  ;;  %v4226_v36 = vsel %vm4225_vm3, %v7434_v10, %v4222_v24 }
 0x2e7   : > { %v4188_v43 = vsel %vm4187_vm5, %v7436_v60, %v4184_v28 }
 0x2e8   : > { %v4193_v48 = vsel %vm4190_vm7, %v4192_v4, %v4188_v43 }
 0x2ea   : > { %v4101_v34 = vpop.f32.mrf.mxu3 }
 0x2ed   : > { %v4010_v17 = vpop.f32.mrf.mxu0  ;;  %v4023_v19 = vpop.f32.mrf.mxu1 }
 0x2ee   : > { %v4011_v20 = vadd.f32 %v4010_v17, %v2450_v13  ;;  %v4090_v33 = vpop.f32.mrf.mxu2 }
 0x2f0   : > { %v4024_v23 = vadd.f32 %v4023_v19, %v4011_v20 }
 0x2f2   : > { %v4037_v46 = vadd.f32 %v4036_v44, %v4024_v23  ;;  %v4103_v39 = vpop.f32.mrf.mxu3  ;;  %v554_v44 = vld [vmem:[#allocation15 + $0x18] sm:$0xff] }
 0x2f4   : > { %v4050_v40 = vadd.f32 %v4049_v45, %v4037_v46  ;;  %v4231_v45 = vsel %vm4228_vm6, %v4230_v41, %v4226_v36 }
 0x2f5   : > { %v4012_v32 = vpop.f32.mrf.mxu0  ;;  %v4025_v25 = vpop.f32.mrf.mxu1  ;;  %v4274_v50 = vmul.f32 %v4231_v45, %v554_v44 }
 0x2f6   : > { %7437 = vtanh.f32 %v4050_v40 }
 0x2fc   : > { %v7438_v47 = vpop.eup %7437 }
 0x2fd   : > { %v4276_v51 = vmul.f32 %v7438_v47, %v4193_v48 }
 0x2ff   : > { %v4278_v52 = vadd.f32 %v4276_v51, %v4274_v50 }
 0x301   : > { %4290 = vst [vmem:[#allocation15 + $0x18] sm:$0xff] %v4278_v52 }
 0x305   : > { %v4140_v53 = vpop.f32.mrf.mxu2 }
 0x309   : > { %v4153_v57 = vpop.f32.mrf.mxu3 }
 0x30d   : > { %v4062_v55 = vpop.f32.mrf.mxu0  ;;  %v4075_v22 = vpop.f32.mrf.mxu1 }
 0x30e   : > { %v4063_v56 = vadd.f32 %v4062_v55, %v2451_v12  ;;  %v4142_v59 = vpop.f32.mrf.mxu2 }
 0x310   : > { %v4076_v26 = vadd.f32 %v4075_v22, %v4063_v56 }
 0x311   : > { %v4155_v16 = vpop.f32.mrf.mxu3 }
 0x312   : > { %v4089_v61 = vadd.f32 %v4088_v21, %v4076_v26 }
 0x314   : > { %v4102_v62 = vadd.f32 %v4101_v34, %v4089_v61 }
 0x315   : > { %v4064_v63 = vpop.f32.mrf.mxu0  ;;  %v4077_v31 = vpop.f32.mrf.mxu1 }
 0x316   : > { %v6595_v2 = vmul.f32 -1.442695, %v4102_v62 }
 0x318   : > { %7439 = vpow2.f32 %v6595_v2 }
 0x31e   : > { %v7440_v3 = vpop.eup %7439 }
 0x31f   : > { %v4241_v15 = vadd.f32 1.0, %v7440_v3 }
 0x321   : > { %7441 = vrcp.f32 %v4241_v15  ;;  %v4254_v18 = vand.u32 2147483648, %v4241_v15  ;;  %v4252_v60 = vand.u32 2147483647, %v4241_v15  ;;  %vm4248_vm9 = vweird.f32 %v4241_v15 }
 0x322   : > { %7443 = vtanh.f32 %v8351_v30 }
 0x323   : > { %v4255_v13 = vor.u32 1.1754944e-38, %v4254_v18  ;;  %vm4253_vm11 = vcmp.eq.f32.partialorder %v4252_v60, 8.507059e+37 }
 0x327   : > { %v7442_v5 = vpop.eup %7441 }
 0x328   : > { %v4244_v7 = vmul.f32 %v7442_v5, %v4241_v15  ;;  %vm4249_vm8 = vweird.f32 %v7442_v5  ;;  %v7444_v14 = vpop.eup %7443 }
 0x329   : > { %vm4250_vm10 = vmor %vm4248_vm9, %vm4249_vm8 }
 0x32a   : > { %v4245_v35 = vsub.f32 1.0, %v4244_v7 }
 0x32c   : > { %v4246_v10 = vmul.f32 %v7442_v5, %v4245_v35 }
 0x32d   : > { %v4114_v8 = vpop.f32.mrf.mxu0  ;;  %v4127_v9 = vpop.f32.mrf.mxu1 }
 0x32e   : > { %v4115_v54 = vadd.f32 %v4114_v8, %v2452_v6  ;;  %v4247_v11 = vadd.f32 %v7442_v5, %v4246_v10 }
 0x330   : > { %v4128_v49 = vadd.f32 %v4127_v9, %v4115_v54  ;;  %v4251_v42 = vsel %vm4250_vm10, %v7442_v5, %v4247_v11 }
 0x331   : > { %v4256_v17 = vsel %vm4253_vm11, %v4255_v13, %v4251_v42 }
 0x332   : > { %v4141_v58 = vadd.f32 %v4140_v53, %v4128_v49  ;;  %v4281_v20 = vmul.f32 %v7444_v14, %v4256_v17 }
 0x334   : > { %v4154_v19 = vadd.f32 %v4153_v57, %v4141_v58  ;;  %4285 = vst [vmem:[#allocation13 + $0x10] sm:$0xff] %v4281_v20 }
 0x335   : > { %v4116_v21 = vpop.f32.mrf.mxu0  ;;  %v4129_v30 = vpop.f32.mrf.mxu1  ;;  %4294 = vst [vmem:[%s4293_s20] sm:$0xff] %v4281_v20 }
 0x336   : > { %v6596_v38 = vmul.f32 -1.442695, %v4154_v19 }
 0x338   : > { %7445 = vpow2.f32 %v6596_v38 }
 0x33e   : > { %v7446_v34 = vpop.eup %7445 }
 0x33f   : > { %v4242_v23 = vadd.f32 1.0, %v7446_v34 }
 0x341   : > { %7447 = vrcp.f32 %v4242_v23  ;;  %v4269_v27 = vand.u32 2147483648, %v4242_v23  ;;  %v4267_v28 = vand.u32 2147483647, %v4242_v23  ;;  %vm4263_vm13 = vweird.f32 %v4242_v23 }
 0x342   : > { %7449 = vtanh.f32 %v4278_v52 }
 0x343   : > { %v4270_v32 = vor.u32 1.1754944e-38, %v4269_v27  ;;  %vm4268_vm15 = vcmp.eq.f32.partialorder %v4267_v28, 8.507059e+37 }
 0x347   : > { %v7448_v0 = vpop.eup %7447 }
 0x348   : > { %v4259_v46 = vmul.f32 %v7448_v0, %v4242_v23  ;;  %vm4264_vm12 = vweird.f32 %v7448_v0  ;;  %v7450_v37 = vpop.eup %7449 }
 0x349   : > { %vm4265_vm14 = vmor %vm4263_vm13, %vm4264_vm12 }
 0x34a   : > { %v4260_v24 = vsub.f32 1.0, %v4259_v46 }
 0x34c   : > { %v4261_v40 = vmul.f32 %v7448_v0, %v4260_v24 }
 0x34e   : > { %v4262_v29 = vadd.f32 %v7448_v0, %v4261_v40 }
 0x350   : > { %v4266_v25 = vsel %vm4265_vm14, %v7448_v0, %v4262_v29 }
 0x351   : > { %v4271_v33 = vsel %vm4268_vm15, %v4270_v32, %v4266_v25 }
 0x352   : > { %v4282_v1 = vmul.f32 %v7450_v37, %v4271_v33 }
 0x354   : > { %4286 = vst [vmem:[#allocation13 + $0x18] sm:$0xff] %v4282_v1 }
 0x355   : > { %4295 = vst [vmem:[%s4293_s20 + $0x8] sm:$0xff] %v4282_v1 }
 0x356 PF: > { %v6659_v36 = vld [vmem:[%s8052_s15 + $0x70] sm:$0xf]  ;;  %v7205_v39 = vld [vmem:[%s8052_s15 + $0x74] sm:$0xf0]  ;;  %v7204_v4 = vld [vmem:[%s8052_s15 + $0x74] sm:$0xf] }
 0x357   : > { %v6723_v41 = vld [vmem:[%s8052_s15 + $0xf0] sm:$0xf]  ;;  %v6660_v43 = vor.u32 %v7205_v39, %v6659_v36  ;;  %v7221_v44 = vld [vmem:[%s8052_s15 + $0xf4] sm:$0xf0]  ;;  %v6661_v45 = vld [vmem:[%s8052_s15 + $0x78] sm:$0xf0] }
 0x358   : > { %v6724_v47 = vor.u32 %v7221_v44, %v6723_v41  ;;  %v6664_v48 = vor.u32 %v7204_v4, %v6661_v45  ;;  %v7220_v50 = vld [vmem:[%s8052_s15 + $0xf4] sm:$0xf]  ;;  %v6725_v51 = vld [vmem:[%s8052_s15 + $0xf8] sm:$0xf0]  ;;  %v6651_v52 = vld [vmem:[%s8052_s15 + $0x60] sm:$0xf] }
 0x359   : > { %4501 = vmatpush.bf16.msra.mxu0 %v6660_v43  ;;  %v6728_v53 = vor.u32 %v7220_v50, %v6725_v51  ;;  %v7203_v12 = vld [vmem:[%s8052_s15 + $0x64] sm:$0xf0]  ;;  %v6715_v55 = vld [vmem:[%s8052_s15 + $0xe0] sm:$0xf]  ;;  %v7202_v26 = vld [vmem:[%s8052_s15 + $0x64] sm:$0xf] }
 0x35a   : > { %v7219_v22 = vld [vmem:[%s8052_s15 + $0xe4] sm:$0xf0]  ;;  %4514 = vmatpush.bf16.msra.mxu1 %v6724_v47  ;;  %4527 = vmatpush.bf16.msra.mxu2 %v6664_v48  ;;  %v6652_v56 = vor.u32 %v7203_v12, %v6651_v52  ;;  %v6653_v59 = vld [vmem:[%s8052_s15 + $0x68] sm:$0xf0]  ;;  %v7218_v61 = vld [vmem:[%s8052_s15 + $0xe4] sm:$0xf] }
 0x35b   : > { %v6716_v57 = vor.u32 %v7219_v22, %v6715_v55  ;;  %4540 = vmatpush.bf16.msra.mxu3 %v6728_v53  ;;  %v6656_v62 = vor.u32 %v7202_v26, %v6653_v59  ;;  %v6717_v63 = vld [vmem:[%s8052_s15 + $0xe8] sm:$0xf0]  ;;  %v6643_v31 = vld [vmem:[%s8052_s15 + $0x50] sm:$0xf]  ;;  %v7201_v2 = vld [vmem:[%s8052_s15 + $0x54] sm:$0xf0] }
 0x35c   : > { %v6720_v16 = vor.u32 %v7218_v61, %v6717_v63  ;;  %v6707_v3 = vld [vmem:[%s8052_s15 + $0xd0] sm:$0xf]  ;;  %v7217_v15 = vld [vmem:[%s8052_s15 + $0xd4] sm:$0xf0]  ;;  %v7200_v5 = vld [vmem:[%s8052_s15 + $0x54] sm:$0xf]  ;;  %v6644_v6 = vor.u32 %v7201_v2, %v6643_v31 }
 0x35d   : > { %4502 = vmatpush.bf16.msra.mxu0 %v6652_v56  ;;  %v6645_v7 = vld [vmem:[%s8052_s15 + $0x58] sm:$0xf0]  ;;  %v7216_v35 = vld [vmem:[%s8052_s15 + $0xd4] sm:$0xf]  ;;  %v6708_v9 = vor.u32 %v7217_v15, %v6707_v3  ;;  %v6635_v54 = vld [vmem:[%s8052_s15 + $0x40] sm:$0xf] }
 0x35e   : > { %v6709_v8 = vld [vmem:[%s8052_s15 + $0xd8] sm:$0xf0]  ;;  %4515 = vmatpush.bf16.msra.mxu1 %v6716_v57  ;;  %4528 = vmatpush.bf16.msra.mxu2 %v6656_v62  ;;  %v6648_v18 = vor.u32 %v7200_v5, %v6645_v7  ;;  %v7199_v10 = vld [vmem:[%s8052_s15 + $0x44] sm:$0xf0]  ;;  %v6699_v60 = vld [vmem:[%s8052_s15 + $0xc0] sm:$0xf] }
 0x35f   : > { %4541 = vmatpush.bf16.msra.mxu3 %v6720_v16  ;;  %v6712_v49 = vor.u32 %v7216_v35, %v6709_v8  ;;  %v7215_v11 = vld [vmem:[%s8052_s15 + $0xc4] sm:$0xf0]  ;;  %v7198_v13 = vld [vmem:[%s8052_s15 + $0x44] sm:$0xf]  ;;  %v6637_v58 = vld [vmem:[%s8052_s15 + $0x48] sm:$0xf0]  ;;  %v6636_v17 = vor.u32 %v7199_v10, %v6635_v54 }
 0x360   : > { %v7214_v42 = vld [vmem:[%s8052_s15 + $0xc4] sm:$0xf]  ;;  %v6701_v14 = vld [vmem:[%s8052_s15 + $0xc8] sm:$0xf0]  ;;  %v6700_v19 = vor.u32 %v7215_v11, %v6699_v60  ;;  %v6640_v20 = vor.u32 %v7198_v13, %v6637_v58  ;;  %v6627_v21 = vld [vmem:[%s8052_s15 + $0x30] sm:$0xf] }
 0x361   : > { %4503 = vmatpush.bf16.msra.mxu0 %v6644_v6  ;;  %v7197_v30 = vld [vmem:[%s8052_s15 + $0x34] sm:$0xf0]  ;;  %v6691_v38 = vld [vmem:[%s8052_s15 + $0xb0] sm:$0xf]  ;;  %v6704_v34 = vor.u32 %v7214_v42, %v6701_v14  ;;  %v7196_v0 = vld [vmem:[%s8052_s15 + $0x34] sm:$0xf] }
 0x362   : > { %4516 = vmatpush.bf16.msra.mxu1 %v6708_v9  ;;  %4529 = vmatpush.bf16.msra.mxu2 %v6648_v18  ;;  %v7213_v23 = vld [vmem:[%s8052_s15 + $0xb4] sm:$0xf0]  ;;  %v6629_v46 = vld [vmem:[%s8052_s15 + $0x38] sm:$0xf0]  ;;  %v7212_v24 = vld [vmem:[%s8052_s15 + $0xb4] sm:$0xf]  ;;  %v6628_v40 = vor.u32 %v7197_v30, %v6627_v21 }
 0x363   : > { %4542 = vmatpush.bf16.msra.mxu3 %v6712_v49  ;;  %v6693_v27 = vld [vmem:[%s8052_s15 + $0xb8] sm:$0xf0]  ;;  %v6692_v28 = vor.u32 %v7213_v23, %v6691_v38  ;;  %v6632_v29 = vor.u32 %v7196_v0, %v6629_v46  ;;  %v6619_v32 = vld [vmem:[%s8052_s15 + $0x20] sm:$0xf]  ;;  %v7195_v25 = vld [vmem:[%s8052_s15 + $0x24] sm:$0xf0] }
 0x364   : > { %v6683_v37 = vld [vmem:[%s8052_s15 + $0xa0] sm:$0xf]  ;;  %v6696_v33 = vor.u32 %v7212_v24, %v6693_v27  ;;  %v7211_v1 = vld [vmem:[%s8052_s15 + $0xa4] sm:$0xf0]  ;;  %v7194_v36 = vld [vmem:[%s8052_s15 + $0x24] sm:$0xf]  ;;  %v6620_v44 = vor.u32 %v7195_v25, %v6619_v32 }
 0x365   : > { %4504 = vmatpush.bf16.msra.mxu0 %v6636_v17  ;;  %v6621_v39 = vld [vmem:[%s8052_s15 + $0x28] sm:$0xf0]  ;;  %v7210_v41 = vld [vmem:[%s8052_s15 + $0xa4] sm:$0xf]  ;;  %v6611_v4 = vld [vmem:[%s8052_s15 + $0x10] sm:$0xf]  ;;  %v6684_v45 = vor.u32 %v7211_v1, %v6683_v37 }
 0x366   : > { %4517 = vmatpush.bf16.msra.mxu1 %v6700_v19  ;;  %4530 = vmatpush.bf16.msra.mxu2 %v6640_v20  ;;  %v6685_v43 = vld [vmem:[%s8052_s15 + $0xa8] sm:$0xf0]  ;;  %v6624_v47 = vor.u32 %v7194_v36, %v6621_v39  ;;  %v7193_v48 = vld [vmem:[%s8052_s15 + $0x14] sm:$0xf0]  ;;  %v6675_v50 = vld [vmem:[%s8052_s15 + $0x90] sm:$0xf] }
 0x367   : > { %4543 = vmatpush.bf16.msra.mxu3 %v6704_v34  ;;  %v7209_v51 = vld [vmem:[%s8052_s15 + $0x94] sm:$0xf0]  ;;  %v6688_v52 = vor.u32 %v7210_v41, %v6685_v43  ;;  %v7192_v53 = vld [vmem:[%s8052_s15 + $0x14] sm:$0xf]  ;;  %v6613_v12 = vld [vmem:[%s8052_s15 + $0x18] sm:$0xf0]  ;;  %v6612_v56 = vor.u32 %v7193_v48, %v6611_v4 }
 0x368   : > { %s7189_s1 = sshll.u32 %s7780_s23, 4  ;;  %v7208_v55 = vld [vmem:[%s8052_s15 + $0x94] sm:$0xf]  ;;  %v6677_v22 = vld [vmem:[%s8052_s15 + $0x98] sm:$0xf0]  ;;  %v6676_v26 = vor.u32 %v7209_v51, %v6675_v50  ;;  %v6616_v59 = vor.u32 %v7192_v53, %v6613_v12  ;;  %s8569_s16 = sld [smem:[#allocation36_spill]] }
 0x369   : > { %4505 = vmatpush.bf16.msra.mxu0 %v6628_v40  ;;  %v6603_v57 = vld [vmem:[%s8052_s15] sm:$0xf]  ;;  %v7191_v61 = vld [vmem:[%s8052_s15 + $0x4] sm:$0xf0]  ;;  %v6680_v63 = vor.u32 %v7208_v55, %v6677_v22  ;;  %v7190_v2 = vld [vmem:[%s8052_s15 + $0x4] sm:$0xf] }
 0x36a   : > { %4518 = vmatpush.bf16.msra.mxu1 %v6692_v28  ;;  %4531 = vmatpush.bf16.msra.mxu2 %v6632_v29  ;;  %v6667_v62 = vld [vmem:[%s8052_s15 + $0x80] sm:$0xf]  ;;  %v7207_v31 = vld [vmem:[%s8052_s15 + $0x84] sm:$0xf0]  ;;  %v6605_v16 = vld [vmem:[%s8052_s15 + $0x8] sm:$0xf0]  ;;  %v6604_v5 = vor.u32 %v7191_v61, %v6603_v57 }
 0x36b   : > { %4544 = vmatpush.bf16.msra.mxu3 %v6696_v33  ;;  %v7206_v3 = vld [vmem:[%s8052_s15 + $0x84] sm:$0xf]  ;;  %v6669_v15 = vld [vmem:[%s8052_s15 + $0x88] sm:$0xf0]  ;;  %s4298_s6 = scalar_lea.vmem [#allocation2], %s7189_s1  ;;  %v6668_v7 = vor.u32 %v7207_v31, %v6667_v62  ;;  %v6608_v35 = vor.u32 %v7190_v2, %v6605_v16  ;;  %s7808_s24 = smov [#allocation13]  }
 0x36c   : > { %v4299_v6 = vld [vmem:[%s4298_s6] sm:$0xff]  ;;  %v4300_v8 = vld [vmem:[%s4298_s6 + $0x8] sm:$0xff]  ;;  %v6672_v9 = vor.u32 %v7206_v3, %v6669_v15  ;;  %s4582_s5 = sshll.u32 %s7808_s24, 4  ;;  %s7809_s9 = smov 256   ;;  %s4583_s5 = int_to_ptr.vmem [resolvable:$true] %s4582_s5 }
 0x36d   : > { %4506 = vmatpush.bf16.msra.mxu0 %v6620_v44  ;;  %v4301_v18 = vpack.c.bf16 %v4299_v6, %v4299_v6  ;;  %v4302_v54 = vpack.c.bf16 %v4300_v8, %v4300_v8  ;;  %s7810_s27 = smov 16   ;;  %s7811_s12 = smov [#allocation15]   ;;  %v4335_v10 = vld [vmem:[%s516_s4] sm:$0x3] }
 0x36e   : > { %4519 = vmatpush.bf16.msra.mxu1 %v6684_v45  ;;  %4532 = vmatpush.bf16.msra.mxu2 %v6624_v47  ;;  %s4584_s10 = sshll.u32 %s8569_s16, 4  ;;  %s4596_s13 = sshll.u32 %s7811_s12, 4  ;;  %v4337_v60 = vperm.slane %v4335_v10, 0  ;;  %v4338_v42 = vperm.slane %v4335_v10, 1  ;;  %s4585_s10 = int_to_ptr.hbm [resolvable:$true] %s4584_s10  ;;  %s4597_s13 = int_to_ptr.vmem [resolvable:$true] %s4596_s13 }
 0x36f   : > { %4545 = vmatpush.bf16.msra.mxu3 %v6688_v52  ;;  %7242 = dma.vmem_to_hbm [thread:$0]  (%p265_p7), %s4583_s5, 512, %s4585_s10, [#allocation14], %s7809_s9, %s7809_s9, %s7810_s27  }
 0x370   : > { %s8570_s1 = sld [smem:[#allocation37_spill]]  ;;  %s6731_s24 = sshll.u32 %s7780_s23, 2 }
 0x371   : > { %4507 = vmatpush.bf16.msra.mxu0 %v6612_v56  ;;  %s4567_s10 = sadd.s32 %s6731_s24, %s8063_s30  ;;  %s8572_s20 = sld [smem:[#allocation35_spill]] }
 0x372   : > { %4520 = vmatpush.bf16.msra.mxu1 %v6676_v26  ;;  %4533 = vmatpush.bf16.msra.mxu2 %v6616_v59  ;;  %s6732_s5 = sshll.u32 %s4567_s10, 3  ;;  %s4571_s8 = sshll.u32 %s8081_s3, 4  ;;  %s4572_s8 = int_to_ptr.vmem [resolvable:$true] %s4571_s8 }
 0x373   : > { %4546 = vmatpush.bf16.msra.mxu3 %v6680_v63  ;;  %s4556_s23 = scalar_lea.sflag [#allocation5], %s501_s29 }
 0x375   : > { %4508 = vmatpush.bf16.msra.mxu0 %v6604_v5 }
 0x376   : > { %4521 = vmatpush.bf16.msra.mxu1 %v6668_v7  ;;  %4534 = vmatpush.bf16.msra.mxu2 %v6608_v35  ;;  %s4598_s6 = sshll.u32 %s8570_s1, 4  ;;  %s4599_s6 = int_to_ptr.hbm [resolvable:$true] %s4598_s6 }
 0x377   : > { %4547 = vmatpush.bf16.msra.mxu3 %v6672_v9  ;;  %7244 = dma.vmem_to_hbm [thread:$0]  (%p265_p7), %s4597_s13, 512, %s4599_s6, [#allocation14], %s7809_s9, %s7809_s9, %s7810_s27  }
 0x378   : > { %4509 = vmatmul.bf16.vlgmr.msra.gmra.mxu0 %v4301_v18  ;;  %s8573_s1 = smov %s8572_s20  ;;  %s4569_s9 = scalar_lea.hbm %s8572_s20, %s6732_s5 }
 0x379   : > { %4522 = vmatmul.bf16.vlgmr.msra.gmra.mxu1 %v4302_v54  ;;  %4535 = vmatmul.bf16.vlgmr.msra.gmra.mxu2 %v4301_v18  ;;  %s4573_s4 = sshll.u32 %s4569_s9, 4  ;;  %s7678_s2 = scalar_lea.hbm %s8573_s1, 192  ;;  %s4574_s4 = int_to_ptr.hbm [resolvable:$true] %s4573_s4 }
 0x37a   : > { %4548 = vmatmul.bf16.vlgmr.msra.gmra.mxu3 %v4302_v54  ;;  %s7672_s30 = sshra.s32 %s4574_s4, 4  ;;  %s7673_s30 = int_to_ptr.hbm [resolvable:$true] %s7672_s30 }
 0x37b   : > { %s7674_s13 = scalar_lea.hbm %s7673_s30, 16  ;;  %p7679_p11 = scmp.lt.s32.totalorder %s7673_s30, %s8573_s1 }
 0x37c   : > { %p7675_p8 = scmp.ne.s32.totalorder %s7673_s30, %s7674_s13  ;;  %p7680_p13 = scmp.lt.s32.totalorder %s7678_s2, %s7674_s13 }
 0x37e   : > { %p7676_p4 = pnand %p7675_p8, %p7953_p10  ;;  %p7681_p3 = por %p7680_p13, %p7679_p11 }
 0x380   : > { %p7677_p9 = pneg %p7676_p4 }
 0x382   : > { %p7682_p0 = pnand %p7681_p3, %p7677_p9 }
 0x3f5   : > { %v4510_v49 = vpop.f32.mrf.mxu0 }
 0x3f6   : > { %v4511_v11 = vadd.f32 %v4510_v49, %v4337_v60  ;;  %v4523_v13 = vpop.f32.mrf.mxu1 }
 0x3f8   : > { %v4524_v58 = vadd.f32 %v4523_v13, %v4511_v11 }
 0x3fa   : > { %4553 = vst [vmem:[%s8081_s3] sm:$0xff] %v4524_v58 }
 0x3fc   : > { %v4536_v14 = vpop.f32.mrf.mxu2 }
 0x3fd   : > { %v4537_v17 = vadd.f32 %v4536_v14, %v4338_v42  ;;  %v4549_v19 = vpop.f32.mrf.mxu3  ;;  %v4512_v20 = vpop.f32.mrf.mxu0 }
 0x3fe   : > { %v4525_v21 = vpop.f32.mrf.mxu1 }
 0x3ff   : > { %v4550_v30 = vadd.f32 %v4549_v19, %v4537_v17 }
 0x401   : > { %4554 = vst [vmem:[%s8081_s3 + $0x8] sm:$0xff] %v4550_v30 }
 0x402   : > { %7685 = shalt.err (!%p7682_p0)
}
 0x403   : > { %7240 = dma.vmem_to_hbm [thread:$0]  (%p7953_p10), %s4572_s8, 256, %s4574_s4, %s4556_s23  }
 0x404   : > { %v4538_v38 = vpop.f32.mrf.mxu2 }
 0x405   : > { %v4551_v34 = vpop.f32.mrf.mxu3 }
 0x406   : > { %7747 = dma.done.wait (%p265_p7), [#allocation14], 1024  }
 0x407   : > { %7749 = vsyncadd (%p265_p7), [#allocation14], 4294966272 }
 0x408 PF: > { %s8575_s29 = sld [smem:[#allocation24_spill]] }
 0x409   : > { %s8576_s3 = sld [smem:[#allocation22_spill]] }
 0x40e   : > { %p7284_p6 = scmp.ge.s32.totalorder %s8575_s29, 2 }
 0x40f   : > { %s4623_s5 = sand.u32 1, %s8576_s3  }
 0x410   : > { %p7268_p1 = pnand %p7284_p6, %p7958_p12  ;;  %s4624_s12 = scalar_lea.sflag [#allocation5], %s4623_s5 }
 0x412   : > { %p7269_p2 = pneg %p7268_p1 }
 0x414   : > { %7751 = dma.done.wait (%p7269_p2), %s4624_s12, 256  }
 0x415   : > { %7753 = vsyncadd (%p7269_p2), %s4624_s12, 4294967040  ;;  %s29_s27 = sadd.s32 1, %s8575_s29   ;;  %s8578_s23 = sld [smem:[#allocation23_spill]] }
 0x416   : > { %p26_p10 = scmp.ge.s32.totalorder %s29_s27, 14   ;;  %s8579_s28 = sld [smem:[#allocation27_spill]] }
 0x417   : > { %s8580_s14 = smov %s8595_s17  ;;  %s8581_s17 = smov %s7760_s18 }
 0x418   : > { %s8582_s18 = smov %s7764_s19  ;;  %s8583_s19 = smov %s8031_s25 }
 0x419   : > { %s8584_s20 = smov %s7772_s21  ;;  %s8585_s21 = smov %s7776_s22 }
 0x41a   : > { %s8586_s22 = smov %s8026_s11  ;;  %s8587_s24 = smov %s7792_s26 }
 0x41b   : > { %s8589_s26 = smov %s8580_s14  ;;  %28 = sbr.rel (!%p26_p10) target bundleno = 22 (0x16), region = 150 }
 0x41c   : > { %s8588_s25 = smov %s8579_s28 }
 0x420   :  { %4630 = vsyncpa [#allocation4], 1 }
 0x421   :  { %4632 = vsyncpa [#allocation4 + $0x1], 1 }
 0x422   :  { %4633 = vsyncpa [#allocation7], 1 }
 0x423   :  { %4634 = vsyncpa [#allocation10], 1 }
 0x424   :  { %4635 = vsyncpa [#allocation5], 1 }
 0x425   :  { %4637 = vsyncpa [#allocation5 + $0x1], 1 }
 0x426   :  { %4638 = vsyncpa [#allocation14], 1 }

</bundles_post_ra>
